<compile_context>
chip_gen: v7x
topology: tpu7x:2x2x1
jax: 0.10.0
libtpu: 0.0.40
codegen_flags: <defaults>
</compile_context>

<pallas_src>
import functools

import numpy as np
import jax
import jax.numpy as jnp
from jax.experimental import pallas as pl
from jax.experimental.pallas import tpu as pltpu


def _layer_norm(x, gamma, beta, eps):
    mu = jnp.mean(x, axis=-1, keepdims=True)
    var = jnp.mean((x - mu) ** 2, axis=-1, keepdims=True)
    return (x - mu) * jax.lax.rsqrt(var + eps) * gamma + beta


def deepfilter_kernel(
    x_ref,                              # (B*S, D)   batch-major rows: row = b*S + s
    mlp_w_ref, mlp_b_ref,               # (D, H), (1, H)
    rf_re_ref, rf_im_ref,               # (F, S)     ortho rfft matrices
    ir_re_ref, ir_im_ref,               # (S, F)     ortho irfft matrices
    fwr_ref, fwi_ref,                   # (R, F, H)  FilterLayer complex weight
    ln1g_ref, ln1b_ref,                 # (R, 1, H)  FilterLayer LayerNorm (eps 1e-12)
    w1_ref, b1_ref,                     # (R, H, H), (R, 1, H)   FFN conv1d(k=1) #1
    w2_ref, b2_ref,                     # (R, H, H), (R, 1, H)   FFN conv1d(k=1) #2
    ln2g_ref, ln2b_ref,                 # (R, 1, H)  FFN LayerNorm (eps 1e-5)
    wih_r_ref, wih_z_ref, wih_n_ref,    # (L, H, Rh)  per-gate GRU input weights
    whh_r_ref, whh_z_ref, whh_n_ref,    # (L, Rh, Rh) per-gate GRU recurrent weights
    br_ref, bz_ref, bin_ref, bhn_ref,   # (L, 1, Rh)  b_ir+b_hr, b_iz+b_hz, b_in, b_hn
    ow_ref, ob_ref,                     # (Rh, O), (1, O)
    out_ref,                            # (B, O)
    *, seq_len, batch,
):
    S, B = seq_len, batch
    R = fwr_ref.shape[0]
    L = wih_r_ref.shape[0]
    Rh = whh_r_ref.shape[1]

    dot = functools.partial(jnp.dot, preferred_element_type=jnp.float32)

    # ---- mlp1 on the batch-major (B*S, D) slab ----
    h = dot(x_ref[...], mlp_w_ref[...]) + mlp_b_ref[...]             # (B*S, H)

    rf_re = rf_re_ref[...]
    rf_im = rf_im_ref[...]
    ir_re = ir_re_ref[...]
    ir_im = ir_im_ref[...]

    # ---- rounds: FilterLayer (rfft -> complex weight -> irfft) + FFN ----
    for rnd in range(R):
        fwr = fwr_ref[rnd]                                            # (F, H)
        fwi = fwi_ref[rnd]
        y_blocks = []
        for b in range(B):
            # Contiguous, 8-aligned per-batch block of the slab (S == 8).
            hb = h[b * S:(b + 1) * S, :]                              # (S, H)
            xr = dot(rf_re, hb)                                       # (F, H)
            xi = dot(rf_im, hb)
            yr = xr * fwr - xi * fwi
            yi = xr * fwi + xi * fwr
            y_blocks.append(dot(ir_re, yr) + dot(ir_im, yi))          # (S, H)
        y = jnp.concatenate(y_blocks, axis=0)                         # (B*S, H), aligned
        h = _layer_norm(y + h, ln1g_ref[rnd], ln1b_ref[rnd], 1e-12)

        ff = jnp.maximum(dot(h, w1_ref[rnd]) + b1_ref[rnd], 0.0)
        ff = dot(ff, w2_ref[rnd]) + b2_ref[rnd]
        h = _layer_norm(ff + h, ln2g_ref[rnd], ln2b_ref[rnd], 1e-5)

    # ---- multi-layer GRU, wavefront-scheduled ----
    Wir = [wih_r_ref[l] for l in range(L)]
    Wiz = [wih_z_ref[l] for l in range(L)]
    Win = [wih_n_ref[l] for l in range(L)]
    Whr = [whh_r_ref[l] for l in range(L)]
    Whz = [whh_z_ref[l] for l in range(L)]
    Whn = [whh_n_ref[l] for l in range(L)]
    Br = [br_ref[l] for l in range(L)]
    Bz = [bz_ref[l] for l in range(L)]
    Bin = [bin_ref[l] for l in range(L)]
    Bhn = [bhn_ref[l] for l in range(L)]

    # Layer-0 input projections hoisted (one matmul per gate over the whole
    # slab); r/z recurrence biases are already folded into Br/Bz host-side.
    gx_r0 = dot(h, Wir[0]) + Br[0]                                    # (B*S, Rh)
    gx_z0 = dot(h, Wiz[0]) + Bz[0]
    gx_n0 = dot(h, Win[0]) + Bin[0]

    def gather_step(m, t):
        # Stack rows {b*S + t} -> (B, Rh).  Pure data motion on precomputed
        # values; off the recurrence critical path.
        return jnp.concatenate(
            [m[b * S + t:b * S + t + 1, :] for b in range(B)], axis=0)

    gx0 = [(gather_step(gx_r0, t), gather_step(gx_z0, t), gather_step(gx_n0, t))
           for t in range(S)]

    hidden = [jnp.zeros((B, Rh), jnp.float32) for _ in range(L)]
    inter = [[None] * S for _ in range(max(L - 1, 1))]

    # Wavefront: super-step `step` runs layer l at time t = step - l.  The
    # cells inside a super-step are data-independent, so their MXU pushes,
    # EUP sigmoids/tanh and VPU combines overlap in the VLIW schedule.
    for step in range(S + L - 1):
        for l in range(L):
            t = step - l
            if not (0 <= t < S):
                continue
            if l == 0:
                xr, xz, xn = gx0[t]
            else:
                xin = inter[l - 1][t]                                 # (B, Rh), ready last super-step
                xr = dot(xin, Wir[l]) + Br[l]
                xz = dot(xin, Wiz[l]) + Bz[l]
                xn = dot(xin, Win[l]) + Bin[l]
            hp = hidden[l]
            hr = dot(hp, Whr[l])                                      # lane-0-aligned (B, Rh)
            hz = dot(hp, Whz[l])
            hn = dot(hp, Whn[l]) + Bhn[l]                             # b_hn stays inside r*(...)
            rg = jax.nn.sigmoid(xr + hr)
            zg = jax.nn.sigmoid(xz + hz)
            ng = jnp.tanh(xn + rg * hn)
            hp = (1.0 - zg) * ng + zg * hp
            hidden[l] = hp
            if l < L - 1:
                inter[l][t] = hp

    # ---- output head (dropout = identity at inference) ----
    out_ref[...] = dot(hidden[L - 1], ow_ref[...]) + ob_ref[...]      # (B, O)


def init_params(key, *, seq_len, dim_s, hidden, hid_r, layer_r, n_round,
                output_num, init_ratio=1.0):
    # Stacked GRU layers require input size == hidden size for layers > 0.
    assert hidden == hid_r
    F = seq_len // 2 + 1
    ks = iter(jax.random.split(key, 16))
    nrm = lambda kk, shape, s=0.1: jax.random.normal(kk, shape, jnp.float32) * s

    # Exact ortho-norm DFT matrices (host-side numpy; R-linear maps matching
    # torch.fft.rfft / irfft with norm='ortho').
    eye_s = np.eye(seq_len, dtype=np.float64)
    m = np.fft.rfft(eye_s, axis=0, norm="ortho")                      # (F, S) complex
    eye_f = np.eye(F, dtype=np.complex128)
    g_re = np.fft.irfft(eye_f, n=seq_len, axis=0, norm="ortho")       # (S, F)
    g_im = np.fft.irfft(1j * eye_f, n=seq_len, axis=0, norm="ortho")  # (S, F)

    return dict(
        rf_re=jnp.asarray(np.real(m), jnp.float32),
        rf_im=jnp.asarray(np.imag(m), jnp.float32),
        ir_re=jnp.asarray(g_re, jnp.float32),
        ir_im=jnp.asarray(g_im, jnp.float32),
        mlp_w=nrm(next(ks), (dim_s, hidden)),
        mlp_b=nrm(next(ks), (1, hidden)),
        f_wr=nrm(next(ks), (n_round, F, hidden), init_ratio),
        f_wi=nrm(next(ks), (n_round, F, hidden), init_ratio),
        ln1_g=jnp.ones((n_round, 1, hidden), jnp.float32),
        ln1_b=jnp.zeros((n_round, 1, hidden), jnp.float32),
        ffn_w1=nrm(next(ks), (n_round, hidden, hidden)),
        ffn_b1=nrm(next(ks), (n_round, 1, hidden)),
        ffn_w2=nrm(next(ks), (n_round, hidden, hidden)),
        ffn_b2=nrm(next(ks), (n_round, 1, hidden)),
        ln2_g=jnp.ones((n_round, 1, hidden), jnp.float32),
        ln2_b=jnp.zeros((n_round, 1, hidden), jnp.float32),
        gru_wih=nrm(next(ks), (layer_r, 3, hidden, hid_r)),     # gates [r, z, n]
        gru_whh=nrm(next(ks), (layer_r, 3, hid_r, hid_r)),
        gru_bih=nrm(next(ks), (layer_r, 3, hid_r)),
        gru_bhh=nrm(next(ks), (layer_r, 3, hid_r)),
        out_w=nrm(next(ks), (hid_r, output_num)),
        out_b=nrm(next(ks), (1, output_num)),
    )


def deepfilter_forward(x, p):
    B, S, D = x.shape
    H = p["mlp_w"].shape[1]
    O = p["out_b"].shape[-1]
    L = p["gru_wih"].shape[0]
    Rh = p["gru_whh"].shape[-1]
    R = p["f_wr"].shape[0]
    F = S // 2 + 1

    # Batch-major slab (row = b*S + s): a free host reshape, no transpose.
    x_bm = x.reshape(B * S, D)

    # Per-gate GRU weights (gate order [r, z, n]); fold b_hr/b_hz into the
    # input-projection bias.  b_in and b_hn stay separate because PyTorch
    # computes tanh(x W_in + b_in + r*(h W_hn + b_hn)).
    wih, whh = p["gru_wih"], p["gru_whh"]
    bih, bhh = p["gru_bih"], p["gru_bhh"]
    wih_r, wih_z, wih_n = wih[:, 0], wih[:, 1], wih[:, 2]
    whh_r, whh_z, whh_n = whh[:, 0], whh[:, 1], whh[:, 2]
    b_r = (bih[:, 0] + bhh[:, 0])[:, None, :]                         # (L, 1, Rh)
    b_z = (bih[:, 1] + bhh[:, 1])[:, None, :]
    b_in = bih[:, 2][:, None, :]
    b_hn = bhh[:, 2][:, None, :]

    args = [
        x_bm, p["mlp_w"], p["mlp_b"],
        p["rf_re"], p["rf_im"], p["ir_re"], p["ir_im"],
        p["f_wr"], p["f_wi"], p["ln1_g"], p["ln1_b"],
        p["ffn_w1"], p["ffn_b1"], p["ffn_w2"], p["ffn_b2"],
        p["ln2_g"], p["ln2_b"],
        wih_r, wih_z, wih_n, whh_r, whh_z, whh_n,
        b_r, b_z, b_in, b_hn,
        p["out_w"], p["out_b"],
    ]

    # Advisory cost estimate for XLA scheduling around the custom call.
    mm = lambda m, k, n: 2 * m * k * n
    flops = (mm(B * S, D, H)
             + R * (B * (2 * mm(F, S, H) + 2 * mm(S, F, H)) + 2 * mm(B * S, H, H))
             + 3 * mm(B * S, H, Rh)
             + (L - 1) * S * 3 * mm(B, H, Rh)
             + L * S * 3 * mm(B, Rh, Rh)
             + mm(B, Rh, O))
    transcendentals = L * S * 3 * B * Rh + 4 * R * B * S
    bytes_accessed = 4 * (sum(int(np.prod(a.shape)) for a in args) + B * O)

    kernel = functools.partial(deepfilter_kernel, seq_len=S, batch=B)
    return pl.pallas_call(
        kernel,
        out_shape=jax.ShapeDtypeStruct((B, O), jnp.float32),
        in_specs=[pl.BlockSpec(memory_space=pltpu.MemorySpace.VMEM)] * len(args),
        out_specs=pl.BlockSpec(memory_space=pltpu.MemorySpace.VMEM),
        cost_estimate=pl.CostEstimate(flops=flops,
                                      transcendentals=transcendentals,
                                      bytes_accessed=bytes_accessed),
    )(*args)


if __name__ == "__main__":
    # args.window=8, featureNum=4, args.d_k=32, args.hidR=32, args.layerR=2,
    # args.round=2, outputNum=4, args.init_ratio=1, dropout -> identity (eval)
    B, S, D = 2, 8, 4
    H = HID_R = 32
    LAYER_R = 2
    ROUND = 2
    OUT = 4

    key = jax.random.PRNGKey(0)
    pkey, xkey = jax.random.split(key)
    params = init_params(pkey, seq_len=S, dim_s=D, hidden=H, hid_r=HID_R,
                         layer_r=LAYER_R, n_round=ROUND, output_num=OUT,
                         init_ratio=1.0)
    x = jax.random.normal(xkey, (B, S, D), jnp.float32)

    out = deepfilter_forward(x, params)
    jax.block_until_ready(out)
    assert out.shape == (B, OUT) and out.dtype == jnp.float32
    assert bool(jnp.all(jnp.isfinite(out)))
    print("KERNEL_OK")
</pallas_src>

<mosaic_0001>
module attributes {stable_mosaic.version = 11 : i64} {
  func.func @deepfilter_kernel(%arg0: memref<16x4xf32, #tpu.memory_space<vmem>>, %arg1: memref<4x32xf32, #tpu.memory_space<vmem>>, %arg2: memref<1x32xf32, #tpu.memory_space<vmem>>, %arg3: memref<5x8xf32, #tpu.memory_space<vmem>>, %arg4: memref<5x8xf32, #tpu.memory_space<vmem>>, %arg5: memref<8x5xf32, #tpu.memory_space<vmem>>, %arg6: memref<8x5xf32, #tpu.memory_space<vmem>>, %arg7: memref<2x5x32xf32, #tpu.memory_space<vmem>>, %arg8: memref<2x5x32xf32, #tpu.memory_space<vmem>>, %arg9: memref<2x1x32xf32, #tpu.memory_space<vmem>>, %arg10: memref<2x1x32xf32, #tpu.memory_space<vmem>>, %arg11: memref<2x32x32xf32, #tpu.memory_space<vmem>>, %arg12: memref<2x1x32xf32, #tpu.memory_space<vmem>>, %arg13: memref<2x32x32xf32, #tpu.memory_space<vmem>>, %arg14: memref<2x1x32xf32, #tpu.memory_space<vmem>>, %arg15: memref<2x1x32xf32, #tpu.memory_space<vmem>>, %arg16: memref<2x1x32xf32, #tpu.memory_space<vmem>>, %arg17: memref<2x32x32xf32, #tpu.memory_space<vmem>>, %arg18: memref<2x32x32xf32, #tpu.memory_space<vmem>>, %arg19: memref<2x32x32xf32, #tpu.memory_space<vmem>>, %arg20: memref<2x32x32xf32, #tpu.memory_space<vmem>>, %arg21: memref<2x32x32xf32, #tpu.memory_space<vmem>>, %arg22: memref<2x32x32xf32, #tpu.memory_space<vmem>>, %arg23: memref<2x1x32xf32, #tpu.memory_space<vmem>>, %arg24: memref<2x1x32xf32, #tpu.memory_space<vmem>>, %arg25: memref<2x1x32xf32, #tpu.memory_space<vmem>>, %arg26: memref<2x1x32xf32, #tpu.memory_space<vmem>>, %arg27: memref<32x4xf32, #tpu.memory_space<vmem>>, %arg28: memref<1x4xf32, #tpu.memory_space<vmem>>, %arg29: memref<2x4xf32, #tpu.memory_space<vmem>>) attributes {dimension_semantics = [], scalar_prefetch = 0 : i64, scratch_operands = 0 : i64, tpu.core_type = #tpu.core_type<tc>} {
    %c0 = arith.constant 0 : index
    %c0_0 = arith.constant 0 : index
    %0 = vector.load %arg0[%c0, %c0_0] : memref<16x4xf32, #tpu.memory_space<vmem>>, vector<16x4xf32>
    %c0_1 = arith.constant 0 : index
    %c0_2 = arith.constant 0 : index
    %1 = vector.load %arg1[%c0_1, %c0_2] : memref<4x32xf32, #tpu.memory_space<vmem>>, vector<4x32xf32>
    %cst = arith.constant dense<0.000000e+00> : vector<16x32xf32>
    %2 = tpu.matmul %0, %1, %cst {dimension_numbers = #tpu.dot_dimension_numbers<[1], [0], [0], [1], [0, 0, 1, 1], [], []>} : vector<16x4xf32>, vector<4x32xf32>, vector<16x32xf32> -> vector<16x32xf32>
    %c0_3 = arith.constant 0 : index
    %c0_4 = arith.constant 0 : index
    %3 = vector.load %arg2[%c0_3, %c0_4] : memref<1x32xf32, #tpu.memory_space<vmem>>, vector<1x32xf32>
    %4 = vector.broadcast %3 : vector<1x32xf32> to vector<16x32xf32>
    %5 = arith.addf %2, %4 : vector<16x32xf32>
    %c0_5 = arith.constant 0 : index
    %c0_6 = arith.constant 0 : index
    %6 = vector.load %arg3[%c0_5, %c0_6] : memref<5x8xf32, #tpu.memory_space<vmem>>, vector<5x8xf32>
    %c0_7 = arith.constant 0 : index
    %c0_8 = arith.constant 0 : index
    %7 = vector.load %arg4[%c0_7, %c0_8] : memref<5x8xf32, #tpu.memory_space<vmem>>, vector<5x8xf32>
    %c0_9 = arith.constant 0 : index
    %c0_10 = arith.constant 0 : index
    %8 = vector.load %arg5[%c0_9, %c0_10] : memref<8x5xf32, #tpu.memory_space<vmem>>, vector<8x5xf32>
    %c0_11 = arith.constant 0 : index
    %c0_12 = arith.constant 0 : index
    %9 = vector.load %arg6[%c0_11, %c0_12] : memref<8x5xf32, #tpu.memory_space<vmem>>, vector<8x5xf32>
    %c0_13 = arith.constant 0 : index
    %c0_14 = arith.constant 0 : index
    %c0_15 = arith.constant 0 : index
    %10 = vector.load %arg7[%c0_13, %c0_14, %c0_15] : memref<2x5x32xf32, #tpu.memory_space<vmem>>, vector<1x5x32xf32>
    %11 = vector.shape_cast %10 : vector<1x5x32xf32> to vector<5x32xf32>
    %c0_16 = arith.constant 0 : index
    %c0_17 = arith.constant 0 : index
    %c0_18 = arith.constant 0 : index
    %12 = vector.load %arg8[%c0_16, %c0_17, %c0_18] : memref<2x5x32xf32, #tpu.memory_space<vmem>>, vector<1x5x32xf32>
    %13 = vector.shape_cast %12 : vector<1x5x32xf32> to vector<5x32xf32>
    %14 = vector.extract_strided_slice %5 {offsets = [0, 0], sizes = [8, 32], strides = [1, 1]} : vector<16x32xf32> to vector<8x32xf32>
    %cst_19 = arith.constant dense<0.000000e+00> : vector<5x32xf32>
    %15 = tpu.matmul %6, %14, %cst_19 {dimension_numbers = #tpu.dot_dimension_numbers<[1], [0], [0], [1], [0, 0, 1, 1], [], []>} : vector<5x8xf32>, vector<8x32xf32>, vector<5x32xf32> -> vector<5x32xf32>
    %cst_20 = arith.constant dense<0.000000e+00> : vector<5x32xf32>
    %16 = tpu.matmul %7, %14, %cst_20 {dimension_numbers = #tpu.dot_dimension_numbers<[1], [0], [0], [1], [0, 0, 1, 1], [], []>} : vector<5x8xf32>, vector<8x32xf32>, vector<5x32xf32> -> vector<5x32xf32>
    %17 = arith.mulf %15, %11 : vector<5x32xf32>
    %18 = arith.mulf %16, %13 : vector<5x32xf32>
    %19 = arith.subf %17, %18 : vector<5x32xf32>
    %20 = arith.mulf %15, %13 : vector<5x32xf32>
    %21 = arith.mulf %16, %11 : vector<5x32xf32>
    %22 = arith.addf %20, %21 : vector<5x32xf32>
    %cst_21 = arith.constant dense<0.000000e+00> : vector<8x32xf32>
    %23 = tpu.matmul %8, %19, %cst_21 {dimension_numbers = #tpu.dot_dimension_numbers<[1], [0], [0], [1], [0, 0, 1, 1], [], []>} : vector<8x5xf32>, vector<5x32xf32>, vector<8x32xf32> -> vector<8x32xf32>
    %cst_22 = arith.constant dense<0.000000e+00> : vector<8x32xf32>
    %24 = tpu.matmul %9, %22, %cst_22 {dimension_numbers = #tpu.dot_dimension_numbers<[1], [0], [0], [1], [0, 0, 1, 1], [], []>} : vector<8x5xf32>, vector<5x32xf32>, vector<8x32xf32> -> vector<8x32xf32>
    %25 = arith.addf %23, %24 : vector<8x32xf32>
    %26 = vector.extract_strided_slice %5 {offsets = [8, 0], sizes = [8, 32], strides = [1, 1]} : vector<16x32xf32> to vector<8x32xf32>
    %cst_23 = arith.constant dense<0.000000e+00> : vector<5x32xf32>
    %27 = tpu.matmul %6, %26, %cst_23 {dimension_numbers = #tpu.dot_dimension_numbers<[1], [0], [0], [1], [0, 0, 1, 1], [], []>} : vector<5x8xf32>, vector<8x32xf32>, vector<5x32xf32> -> vector<5x32xf32>
    %cst_24 = arith.constant dense<0.000000e+00> : vector<5x32xf32>
    %28 = tpu.matmul %7, %26, %cst_24 {dimension_numbers = #tpu.dot_dimension_numbers<[1], [0], [0], [1], [0, 0, 1, 1], [], []>} : vector<5x8xf32>, vector<8x32xf32>, vector<5x32xf32> -> vector<5x32xf32>
    %29 = arith.mulf %27, %11 : vector<5x32xf32>
    %30 = arith.mulf %28, %13 : vector<5x32xf32>
    %31 = arith.subf %29, %30 : vector<5x32xf32>
    %32 = arith.mulf %27, %13 : vector<5x32xf32>
    %33 = arith.mulf %28, %11 : vector<5x32xf32>
    %34 = arith.addf %32, %33 : vector<5x32xf32>
    %cst_25 = arith.constant dense<0.000000e+00> : vector<8x32xf32>
    %35 = tpu.matmul %8, %31, %cst_25 {dimension_numbers = #tpu.dot_dimension_numbers<[1], [0], [0], [1], [0, 0, 1, 1], [], []>} : vector<8x5xf32>, vector<5x32xf32>, vector<8x32xf32> -> vector<8x32xf32>
    %cst_26 = arith.constant dense<0.000000e+00> : vector<8x32xf32>
    %36 = tpu.matmul %9, %34, %cst_26 {dimension_numbers = #tpu.dot_dimension_numbers<[1], [0], [0], [1], [0, 0, 1, 1], [], []>} : vector<8x5xf32>, vector<5x32xf32>, vector<8x32xf32> -> vector<8x32xf32>
    %37 = arith.addf %35, %36 : vector<8x32xf32>
    %38 = tpu.concatenate %25, %37 in 0 : vector<8x32xf32>, vector<8x32xf32> -> vector<16x32xf32>
    %39 = arith.addf %38, %5 : vector<16x32xf32>
    %c0_27 = arith.constant 0 : index
    %c0_28 = arith.constant 0 : index
    %c0_29 = arith.constant 0 : index
    %40 = vector.load %arg9[%c0_27, %c0_28, %c0_29] : memref<2x1x32xf32, #tpu.memory_space<vmem>>, vector<1x1x32xf32>
    %41 = vector.shape_cast %40 : vector<1x1x32xf32> to vector<1x32xf32>
    %c0_30 = arith.constant 0 : index
    %c0_31 = arith.constant 0 : index
    %c0_32 = arith.constant 0 : index
    %42 = vector.load %arg10[%c0_30, %c0_31, %c0_32] : memref<2x1x32xf32, #tpu.memory_space<vmem>>, vector<1x1x32xf32>
    %43 = vector.shape_cast %42 : vector<1x1x32xf32> to vector<1x32xf32>
    %cst_33 = arith.constant dense<0.000000e+00> : vector<16xf32>
    %44 = vector.multi_reduction <add>, %39, %cst_33 [1] : vector<16x32xf32> to vector<16xf32>
    %45 = vector.shape_cast %44 : vector<16xf32> to vector<16x1xf32>
    %cst_34 = arith.constant 3.200000e+01 : f32
    %46 = vector.broadcast %cst_34 : f32 to vector<16x1xf32>
    %47 = arith.divf %45, %46 : vector<16x1xf32>
    %48 = vector.broadcast %47 : vector<16x1xf32> to vector<16x32xf32>
    %49 = arith.subf %39, %48 : vector<16x32xf32>
    %50 = arith.mulf %49, %49 : vector<16x32xf32>
    %cst_35 = arith.constant dense<0.000000e+00> : vector<16xf32>
    %51 = vector.multi_reduction <add>, %50, %cst_35 [1] : vector<16x32xf32> to vector<16xf32>
    %52 = vector.shape_cast %51 : vector<16xf32> to vector<16x1xf32>
    %cst_36 = arith.constant 3.200000e+01 : f32
    %53 = vector.broadcast %cst_36 : f32 to vector<16x1xf32>
    %54 = arith.divf %52, %53 : vector<16x1xf32>
    %55 = vector.broadcast %47 : vector<16x1xf32> to vector<16x32xf32>
    %56 = arith.subf %39, %55 : vector<16x32xf32>
    %cst_37 = arith.constant 9.99999996E-13 : f32
    %57 = vector.broadcast %cst_37 : f32 to vector<16x1xf32>
    %58 = arith.addf %54, %57 : vector<16x1xf32>
    %59 = math.rsqrt %58 : vector<16x1xf32>
    %60 = vector.broadcast %59 : vector<16x1xf32> to vector<16x32xf32>
    %61 = arith.mulf %56, %60 : vector<16x32xf32>
    %62 = vector.broadcast %41 : vector<1x32xf32> to vector<16x32xf32>
    %63 = arith.mulf %61, %62 : vector<16x32xf32>
    %64 = vector.broadcast %43 : vector<1x32xf32> to vector<16x32xf32>
    %65 = arith.addf %63, %64 : vector<16x32xf32>
    %c0_38 = arith.constant 0 : index
    %c0_39 = arith.constant 0 : index
    %c0_40 = arith.constant 0 : index
    %66 = vector.load %arg11[%c0_38, %c0_39, %c0_40] : memref<2x32x32xf32, #tpu.memory_space<vmem>>, vector<1x32x32xf32>
    %67 = vector.shape_cast %66 : vector<1x32x32xf32> to vector<32x32xf32>
    %cst_41 = arith.constant dense<0.000000e+00> : vector<16x32xf32>
    %68 = tpu.matmul %65, %67, %cst_41 {dimension_numbers = #tpu.dot_dimension_numbers<[1], [0], [0], [1], [0, 0, 1, 1], [], []>} : vector<16x32xf32>, vector<32x32xf32>, vector<16x32xf32> -> vector<16x32xf32>
    %c0_42 = arith.constant 0 : index
    %c0_43 = arith.constant 0 : index
    %c0_44 = arith.constant 0 : index
    %69 = vector.load %arg12[%c0_42, %c0_43, %c0_44] : memref<2x1x32xf32, #tpu.memory_space<vmem>>, vector<1x1x32xf32>
    %70 = vector.shape_cast %69 : vector<1x1x32xf32> to vector<1x32xf32>
    %71 = vector.broadcast %70 : vector<1x32xf32> to vector<16x32xf32>
    %72 = arith.addf %68, %71 : vector<16x32xf32>
    %cst_45 = arith.constant 0.000000e+00 : f32
    %73 = vector.broadcast %cst_45 : f32 to vector<16x32xf32>
    %74 = arith.maximumf %72, %73 : vector<16x32xf32>
    %c0_46 = arith.constant 0 : index
    %c0_47 = arith.constant 0 : index
    %c0_48 = arith.constant 0 : index
    %75 = vector.load %arg13[%c0_46, %c0_47, %c0_48] : memref<2x32x32xf32, #tpu.memory_space<vmem>>, vector<1x32x32xf32>
    %76 = vector.shape_cast %75 : vector<1x32x32xf32> to vector<32x32xf32>
    %cst_49 = arith.constant dense<0.000000e+00> : vector<16x32xf32>
    %77 = tpu.matmul %74, %76, %cst_49 {dimension_numbers = #tpu.dot_dimension_numbers<[1], [0], [0], [1], [0, 0, 1, 1], [], []>} : vector<16x32xf32>, vector<32x32xf32>, vector<16x32xf32> -> vector<16x32xf32>
    %c0_50 = arith.constant 0 : index
    %c0_51 = arith.constant 0 : index
    %c0_52 = arith.constant 0 : index
    %78 = vector.load %arg14[%c0_50, %c0_51, %c0_52] : memref<2x1x32xf32, #tpu.memory_space<vmem>>, vector<1x1x32xf32>
    %79 = vector.shape_cast %78 : vector<1x1x32xf32> to vector<1x32xf32>
    %80 = vector.broadcast %79 : vector<1x32xf32> to vector<16x32xf32>
    %81 = arith.addf %77, %80 : vector<16x32xf32>
    %82 = arith.addf %81, %65 : vector<16x32xf32>
    %c0_53 = arith.constant 0 : index
    %c0_54 = arith.constant 0 : index
    %c0_55 = arith.constant 0 : index
    %83 = vector.load %arg15[%c0_53, %c0_54, %c0_55] : memref<2x1x32xf32, #tpu.memory_space<vmem>>, vector<1x1x32xf32>
    %84 = vector.shape_cast %83 : vector<1x1x32xf32> to vector<1x32xf32>
    %c0_56 = arith.constant 0 : index
    %c0_57 = arith.constant 0 : index
    %c0_58 = arith.constant 0 : index
    %85 = vector.load %arg16[%c0_56, %c0_57, %c0_58] : memref<2x1x32xf32, #tpu.memory_space<vmem>>, vector<1x1x32xf32>
    %86 = vector.shape_cast %85 : vector<1x1x32xf32> to vector<1x32xf32>
    %cst_59 = arith.constant dense<0.000000e+00> : vector<16xf32>
    %87 = vector.multi_reduction <add>, %82, %cst_59 [1] : vector<16x32xf32> to vector<16xf32>
    %88 = vector.shape_cast %87 : vector<16xf32> to vector<16x1xf32>
    %cst_60 = arith.constant 3.200000e+01 : f32
    %89 = vector.broadcast %cst_60 : f32 to vector<16x1xf32>
    %90 = arith.divf %88, %89 : vector<16x1xf32>
    %91 = vector.broadcast %90 : vector<16x1xf32> to vector<16x32xf32>
    %92 = arith.subf %82, %91 : vector<16x32xf32>
    %93 = arith.mulf %92, %92 : vector<16x32xf32>
    %cst_61 = arith.constant dense<0.000000e+00> : vector<16xf32>
    %94 = vector.multi_reduction <add>, %93, %cst_61 [1] : vector<16x32xf32> to vector<16xf32>
    %95 = vector.shape_cast %94 : vector<16xf32> to vector<16x1xf32>
    %cst_62 = arith.constant 3.200000e+01 : f32
    %96 = vector.broadcast %cst_62 : f32 to vector<16x1xf32>
    %97 = arith.divf %95, %96 : vector<16x1xf32>
    %98 = vector.broadcast %90 : vector<16x1xf32> to vector<16x32xf32>
    %99 = arith.subf %82, %98 : vector<16x32xf32>
    %cst_63 = arith.constant 9.99999974E-6 : f32
    %100 = vector.broadcast %cst_63 : f32 to vector<16x1xf32>
    %101 = arith.addf %97, %100 : vector<16x1xf32>
    %102 = math.rsqrt %101 : vector<16x1xf32>
    %103 = vector.broadcast %102 : vector<16x1xf32> to vector<16x32xf32>
    %104 = arith.mulf %99, %103 : vector<16x32xf32>
    %105 = vector.broadcast %84 : vector<1x32xf32> to vector<16x32xf32>
    %106 = arith.mulf %104, %105 : vector<16x32xf32>
    %107 = vector.broadcast %86 : vector<1x32xf32> to vector<16x32xf32>
    %108 = arith.addf %106, %107 : vector<16x32xf32>
    %c1 = arith.constant 1 : index
    %c0_64 = arith.constant 0 : index
    %c0_65 = arith.constant 0 : index
    %109 = vector.load %arg7[%c1, %c0_64, %c0_65] : memref<2x5x32xf32, #tpu.memory_space<vmem>>, vector<1x5x32xf32>
    %110 = vector.shape_cast %109 : vector<1x5x32xf32> to vector<5x32xf32>
    %c1_66 = arith.constant 1 : index
    %c0_67 = arith.constant 0 : index
    %c0_68 = arith.constant 0 : index
    %111 = vector.load %arg8[%c1_66, %c0_67, %c0_68] : memref<2x5x32xf32, #tpu.memory_space<vmem>>, vector<1x5x32xf32>
    %112 = vector.shape_cast %111 : vector<1x5x32xf32> to vector<5x32xf32>
    %113 = vector.extract_strided_slice %108 {offsets = [0, 0], sizes = [8, 32], strides = [1, 1]} : vector<16x32xf32> to vector<8x32xf32>
    %cst_69 = arith.constant dense<0.000000e+00> : vector<5x32xf32>
    %114 = tpu.matmul %6, %113, %cst_69 {dimension_numbers = #tpu.dot_dimension_numbers<[1], [0], [0], [1], [0, 0, 1, 1], [], []>} : vector<5x8xf32>, vector<8x32xf32>, vector<5x32xf32> -> vector<5x32xf32>
    %cst_70 = arith.constant dense<0.000000e+00> : vector<5x32xf32>
    %115 = tpu.matmul %7, %113, %cst_70 {dimension_numbers = #tpu.dot_dimension_numbers<[1], [0], [0], [1], [0, 0, 1, 1], [], []>} : vector<5x8xf32>, vector<8x32xf32>, vector<5x32xf32> -> vector<5x32xf32>
    %116 = arith.mulf %114, %110 : vector<5x32xf32>
    %117 = arith.mulf %115, %112 : vector<5x32xf32>
    %118 = arith.subf %116, %117 : vector<5x32xf32>
    %119 = arith.mulf %114, %112 : vector<5x32xf32>
    %120 = arith.mulf %115, %110 : vector<5x32xf32>
    %121 = arith.addf %119, %120 : vector<5x32xf32>
    %cst_71 = arith.constant dense<0.000000e+00> : vector<8x32xf32>
    %122 = tpu.matmul %8, %118, %cst_71 {dimension_numbers = #tpu.dot_dimension_numbers<[1], [0], [0], [1], [0, 0, 1, 1], [], []>} : vector<8x5xf32>, vector<5x32xf32>, vector<8x32xf32> -> vector<8x32xf32>
    %cst_72 = arith.constant dense<0.000000e+00> : vector<8x32xf32>
    %123 = tpu.matmul %9, %121, %cst_72 {dimension_numbers = #tpu.dot_dimension_numbers<[1], [0], [0], [1], [0, 0, 1, 1], [], []>} : vector<8x5xf32>, vector<5x32xf32>, vector<8x32xf32> -> vector<8x32xf32>
    %124 = arith.addf %122, %123 : vector<8x32xf32>
    %125 = vector.extract_strided_slice %108 {offsets = [8, 0], sizes = [8, 32], strides = [1, 1]} : vector<16x32xf32> to vector<8x32xf32>
    %cst_73 = arith.constant dense<0.000000e+00> : vector<5x32xf32>
    %126 = tpu.matmul %6, %125, %cst_73 {dimension_numbers = #tpu.dot_dimension_numbers<[1], [0], [0], [1], [0, 0, 1, 1], [], []>} : vector<5x8xf32>, vector<8x32xf32>, vector<5x32xf32> -> vector<5x32xf32>
    %cst_74 = arith.constant dense<0.000000e+00> : vector<5x32xf32>
    %127 = tpu.matmul %7, %125, %cst_74 {dimension_numbers = #tpu.dot_dimension_numbers<[1], [0], [0], [1], [0, 0, 1, 1], [], []>} : vector<5x8xf32>, vector<8x32xf32>, vector<5x32xf32> -> vector<5x32xf32>
    %128 = arith.mulf %126, %110 : vector<5x32xf32>
    %129 = arith.mulf %127, %112 : vector<5x32xf32>
    %130 = arith.subf %128, %129 : vector<5x32xf32>
    %131 = arith.mulf %126, %112 : vector<5x32xf32>
    %132 = arith.mulf %127, %110 : vector<5x32xf32>
    %133 = arith.addf %131, %132 : vector<5x32xf32>
    %cst_75 = arith.constant dense<0.000000e+00> : vector<8x32xf32>
    %134 = tpu.matmul %8, %130, %cst_75 {dimension_numbers = #tpu.dot_dimension_numbers<[1], [0], [0], [1], [0, 0, 1, 1], [], []>} : vector<8x5xf32>, vector<5x32xf32>, vector<8x32xf32> -> vector<8x32xf32>
    %cst_76 = arith.constant dense<0.000000e+00> : vector<8x32xf32>
    %135 = tpu.matmul %9, %133, %cst_76 {dimension_numbers = #tpu.dot_dimension_numbers<[1], [0], [0], [1], [0, 0, 1, 1], [], []>} : vector<8x5xf32>, vector<5x32xf32>, vector<8x32xf32> -> vector<8x32xf32>
    %136 = arith.addf %134, %135 : vector<8x32xf32>
    %137 = tpu.concatenate %124, %136 in 0 : vector<8x32xf32>, vector<8x32xf32> -> vector<16x32xf32>
    %138 = arith.addf %137, %108 : vector<16x32xf32>
    %c1_77 = arith.constant 1 : index
    %c0_78 = arith.constant 0 : index
    %c0_79 = arith.constant 0 : index
    %139 = vector.load %arg9[%c1_77, %c0_78, %c0_79] : memref<2x1x32xf32, #tpu.memory_space<vmem>>, vector<1x1x32xf32>
    %140 = vector.shape_cast %139 : vector<1x1x32xf32> to vector<1x32xf32>
    %c1_80 = arith.constant 1 : index
    %c0_81 = arith.constant 0 : index
    %c0_82 = arith.constant 0 : index
    %141 = vector.load %arg10[%c1_80, %c0_81, %c0_82] : memref<2x1x32xf32, #tpu.memory_space<vmem>>, vector<1x1x32xf32>
    %142 = vector.shape_cast %141 : vector<1x1x32xf32> to vector<1x32xf32>
    %cst_83 = arith.constant dense<0.000000e+00> : vector<16xf32>
    %143 = vector.multi_reduction <add>, %138, %cst_83 [1] : vector<16x32xf32> to vector<16xf32>
    %144 = vector.shape_cast %143 : vector<16xf32> to vector<16x1xf32>
    %cst_84 = arith.constant 3.200000e+01 : f32
    %145 = vector.broadcast %cst_84 : f32 to vector<16x1xf32>
    %146 = arith.divf %144, %145 : vector<16x1xf32>
    %147 = vector.broadcast %146 : vector<16x1xf32> to vector<16x32xf32>
    %148 = arith.subf %138, %147 : vector<16x32xf32>
    %149 = arith.mulf %148, %148 : vector<16x32xf32>
    %cst_85 = arith.constant dense<0.000000e+00> : vector<16xf32>
    %150 = vector.multi_reduction <add>, %149, %cst_85 [1] : vector<16x32xf32> to vector<16xf32>
    %151 = vector.shape_cast %150 : vector<16xf32> to vector<16x1xf32>
    %cst_86 = arith.constant 3.200000e+01 : f32
    %152 = vector.broadcast %cst_86 : f32 to vector<16x1xf32>
    %153 = arith.divf %151, %152 : vector<16x1xf32>
    %154 = vector.broadcast %146 : vector<16x1xf32> to vector<16x32xf32>
    %155 = arith.subf %138, %154 : vector<16x32xf32>
    %cst_87 = arith.constant 9.99999996E-13 : f32
    %156 = vector.broadcast %cst_87 : f32 to vector<16x1xf32>
    %157 = arith.addf %153, %156 : vector<16x1xf32>
    %158 = math.rsqrt %157 : vector<16x1xf32>
    %159 = vector.broadcast %158 : vector<16x1xf32> to vector<16x32xf32>
    %160 = arith.mulf %155, %159 : vector<16x32xf32>
    %161 = vector.broadcast %140 : vector<1x32xf32> to vector<16x32xf32>
    %162 = arith.mulf %160, %161 : vector<16x32xf32>
    %163 = vector.broadcast %142 : vector<1x32xf32> to vector<16x32xf32>
    %164 = arith.addf %162, %163 : vector<16x32xf32>
    %c1_88 = arith.constant 1 : index
    %c0_89 = arith.constant 0 : index
    %c0_90 = arith.constant 0 : index
    %165 = vector.load %arg11[%c1_88, %c0_89, %c0_90] : memref<2x32x32xf32, #tpu.memory_space<vmem>>, vector<1x32x32xf32>
    %166 = vector.shape_cast %165 : vector<1x32x32xf32> to vector<32x32xf32>
    %cst_91 = arith.constant dense<0.000000e+00> : vector<16x32xf32>
    %167 = tpu.matmul %164, %166, %cst_91 {dimension_numbers = #tpu.dot_dimension_numbers<[1], [0], [0], [1], [0, 0, 1, 1], [], []>} : vector<16x32xf32>, vector<32x32xf32>, vector<16x32xf32> -> vector<16x32xf32>
    %c1_92 = arith.constant 1 : index
    %c0_93 = arith.constant 0 : index
    %c0_94 = arith.constant 0 : index
    %168 = vector.load %arg12[%c1_92, %c0_93, %c0_94] : memref<2x1x32xf32, #tpu.memory_space<vmem>>, vector<1x1x32xf32>
    %169 = vector.shape_cast %168 : vector<1x1x32xf32> to vector<1x32xf32>
    %170 = vector.broadcast %169 : vector<1x32xf32> to vector<16x32xf32>
    %171 = arith.addf %167, %170 : vector<16x32xf32>
    %cst_95 = arith.constant 0.000000e+00 : f32
    %172 = vector.broadcast %cst_95 : f32 to vector<16x32xf32>
    %173 = arith.maximumf %171, %172 : vector<16x32xf32>
    %c1_96 = arith.constant 1 : index
    %c0_97 = arith.constant 0 : index
    %c0_98 = arith.constant 0 : index
    %174 = vector.load %arg13[%c1_96, %c0_97, %c0_98] : memref<2x32x32xf32, #tpu.memory_space<vmem>>, vector<1x32x32xf32>
    %175 = vector.shape_cast %174 : vector<1x32x32xf32> to vector<32x32xf32>
    %cst_99 = arith.constant dense<0.000000e+00> : vector<16x32xf32>
    %176 = tpu.matmul %173, %175, %cst_99 {dimension_numbers = #tpu.dot_dimension_numbers<[1], [0], [0], [1], [0, 0, 1, 1], [], []>} : vector<16x32xf32>, vector<32x32xf32>, vector<16x32xf32> -> vector<16x32xf32>
    %c1_100 = arith.constant 1 : index
    %c0_101 = arith.constant 0 : index
    %c0_102 = arith.constant 0 : index
    %177 = vector.load %arg14[%c1_100, %c0_101, %c0_102] : memref<2x1x32xf32, #tpu.memory_space<vmem>>, vector<1x1x32xf32>
    %178 = vector.shape_cast %177 : vector<1x1x32xf32> to vector<1x32xf32>
    %179 = vector.broadcast %178 : vector<1x32xf32> to vector<16x32xf32>
    %180 = arith.addf %176, %179 : vector<16x32xf32>
    %181 = arith.addf %180, %164 : vector<16x32xf32>
    %c1_103 = arith.constant 1 : index
    %c0_104 = arith.constant 0 : index
    %c0_105 = arith.constant 0 : index
    %182 = vector.load %arg15[%c1_103, %c0_104, %c0_105] : memref<2x1x32xf32, #tpu.memory_space<vmem>>, vector<1x1x32xf32>
    %183 = vector.shape_cast %182 : vector<1x1x32xf32> to vector<1x32xf32>
    %c1_106 = arith.constant 1 : index
    %c0_107 = arith.constant 0 : index
    %c0_108 = arith.constant 0 : index
    %184 = vector.load %arg16[%c1_106, %c0_107, %c0_108] : memref<2x1x32xf32, #tpu.memory_space<vmem>>, vector<1x1x32xf32>
    %185 = vector.shape_cast %184 : vector<1x1x32xf32> to vector<1x32xf32>
    %cst_109 = arith.constant dense<0.000000e+00> : vector<16xf32>
    %186 = vector.multi_reduction <add>, %181, %cst_109 [1] : vector<16x32xf32> to vector<16xf32>
    %187 = vector.shape_cast %186 : vector<16xf32> to vector<16x1xf32>
    %cst_110 = arith.constant 3.200000e+01 : f32
    %188 = vector.broadcast %cst_110 : f32 to vector<16x1xf32>
    %189 = arith.divf %187, %188 : vector<16x1xf32>
    %190 = vector.broadcast %189 : vector<16x1xf32> to vector<16x32xf32>
    %191 = arith.subf %181, %190 : vector<16x32xf32>
    %192 = arith.mulf %191, %191 : vector<16x32xf32>
    %cst_111 = arith.constant dense<0.000000e+00> : vector<16xf32>
    %193 = vector.multi_reduction <add>, %192, %cst_111 [1] : vector<16x32xf32> to vector<16xf32>
    %194 = vector.shape_cast %193 : vector<16xf32> to vector<16x1xf32>
    %cst_112 = arith.constant 3.200000e+01 : f32
    %195 = vector.broadcast %cst_112 : f32 to vector<16x1xf32>
    %196 = arith.divf %194, %195 : vector<16x1xf32>
    %197 = vector.broadcast %189 : vector<16x1xf32> to vector<16x32xf32>
    %198 = arith.subf %181, %197 : vector<16x32xf32>
    %cst_113 = arith.constant 9.99999974E-6 : f32
    %199 = vector.broadcast %cst_113 : f32 to vector<16x1xf32>
    %200 = arith.addf %196, %199 : vector<16x1xf32>
    %201 = math.rsqrt %200 : vector<16x1xf32>
    %202 = vector.broadcast %201 : vector<16x1xf32> to vector<16x32xf32>
    %203 = arith.mulf %198, %202 : vector<16x32xf32>
    %204 = vector.broadcast %183 : vector<1x32xf32> to vector<16x32xf32>
    %205 = arith.mulf %203, %204 : vector<16x32xf32>
    %206 = vector.broadcast %185 : vector<1x32xf32> to vector<16x32xf32>
    %207 = arith.addf %205, %206 : vector<16x32xf32>
    %c0_114 = arith.constant 0 : index
    %c0_115 = arith.constant 0 : index
    %c0_116 = arith.constant 0 : index
    %208 = vector.load %arg17[%c0_114, %c0_115, %c0_116] : memref<2x32x32xf32, #tpu.memory_space<vmem>>, vector<1x32x32xf32>
    %209 = vector.shape_cast %208 : vector<1x32x32xf32> to vector<32x32xf32>
    %c1_117 = arith.constant 1 : index
    %c0_118 = arith.constant 0 : index
    %c0_119 = arith.constant 0 : index
    %210 = vector.load %arg17[%c1_117, %c0_118, %c0_119] : memref<2x32x32xf32, #tpu.memory_space<vmem>>, vector<1x32x32xf32>
    %211 = vector.shape_cast %210 : vector<1x32x32xf32> to vector<32x32xf32>
    %c0_120 = arith.constant 0 : index
    %c0_121 = arith.constant 0 : index
    %c0_122 = arith.constant 0 : index
    %212 = vector.load %arg18[%c0_120, %c0_121, %c0_122] : memref<2x32x32xf32, #tpu.memory_space<vmem>>, vector<1x32x32xf32>
    %213 = vector.shape_cast %212 : vector<1x32x32xf32> to vector<32x32xf32>
    %c1_123 = arith.constant 1 : index
    %c0_124 = arith.constant 0 : index
    %c0_125 = arith.constant 0 : index
    %214 = vector.load %arg18[%c1_123, %c0_124, %c0_125] : memref<2x32x32xf32, #tpu.memory_space<vmem>>, vector<1x32x32xf32>
    %215 = vector.shape_cast %214 : vector<1x32x32xf32> to vector<32x32xf32>
    %c0_126 = arith.constant 0 : index
    %c0_127 = arith.constant 0 : index
    %c0_128 = arith.constant 0 : index
    %216 = vector.load %arg19[%c0_126, %c0_127, %c0_128] : memref<2x32x32xf32, #tpu.memory_space<vmem>>, vector<1x32x32xf32>
    %217 = vector.shape_cast %216 : vector<1x32x32xf32> to vector<32x32xf32>
    %c1_129 = arith.constant 1 : index
    %c0_130 = arith.constant 0 : index
    %c0_131 = arith.constant 0 : index
    %218 = vector.load %arg19[%c1_129, %c0_130, %c0_131] : memref<2x32x32xf32, #tpu.memory_space<vmem>>, vector<1x32x32xf32>
    %219 = vector.shape_cast %218 : vector<1x32x32xf32> to vector<32x32xf32>
    %c0_132 = arith.constant 0 : index
    %c0_133 = arith.constant 0 : index
    %c0_134 = arith.constant 0 : index
    %220 = vector.load %arg20[%c0_132, %c0_133, %c0_134] : memref<2x32x32xf32, #tpu.memory_space<vmem>>, vector<1x32x32xf32>
    %221 = vector.shape_cast %220 : vector<1x32x32xf32> to vector<32x32xf32>
    %c1_135 = arith.constant 1 : index
    %c0_136 = arith.constant 0 : index
    %c0_137 = arith.constant 0 : index
    %222 = vector.load %arg20[%c1_135, %c0_136, %c0_137] : memref<2x32x32xf32, #tpu.memory_space<vmem>>, vector<1x32x32xf32>
    %223 = vector.shape_cast %222 : vector<1x32x32xf32> to vector<32x32xf32>
    %c0_138 = arith.constant 0 : index
    %c0_139 = arith.constant 0 : index
    %c0_140 = arith.constant 0 : index
    %224 = vector.load %arg21[%c0_138, %c0_139, %c0_140] : memref<2x32x32xf32, #tpu.memory_space<vmem>>, vector<1x32x32xf32>
    %225 = vector.shape_cast %224 : vector<1x32x32xf32> to vector<32x32xf32>
    %c1_141 = arith.constant 1 : index
    %c0_142 = arith.constant 0 : index
    %c0_143 = arith.constant 0 : index
    %226 = vector.load %arg21[%c1_141, %c0_142, %c0_143] : memref<2x32x32xf32, #tpu.memory_space<vmem>>, vector<1x32x32xf32>
    %227 = vector.shape_cast %226 : vector<1x32x32xf32> to vector<32x32xf32>
    %c0_144 = arith.constant 0 : index
    %c0_145 = arith.constant 0 : index
    %c0_146 = arith.constant 0 : index
    %228 = vector.load %arg22[%c0_144, %c0_145, %c0_146] : memref<2x32x32xf32, #tpu.memory_space<vmem>>, vector<1x32x32xf32>
    %229 = vector.shape_cast %228 : vector<1x32x32xf32> to vector<32x32xf32>
    %c1_147 = arith.constant 1 : index
    %c0_148 = arith.constant 0 : index
    %c0_149 = arith.constant 0 : index
    %230 = vector.load %arg22[%c1_147, %c0_148, %c0_149] : memref<2x32x32xf32, #tpu.memory_space<vmem>>, vector<1x32x32xf32>
    %231 = vector.shape_cast %230 : vector<1x32x32xf32> to vector<32x32xf32>
    %c0_150 = arith.constant 0 : index
    %c0_151 = arith.constant 0 : index
    %c0_152 = arith.constant 0 : index
    %232 = vector.load %arg23[%c0_150, %c0_151, %c0_152] : memref<2x1x32xf32, #tpu.memory_space<vmem>>, vector<1x1x32xf32>
    %233 = vector.shape_cast %232 : vector<1x1x32xf32> to vector<1x32xf32>
    %c1_153 = arith.constant 1 : index
    %c0_154 = arith.constant 0 : index
    %c0_155 = arith.constant 0 : index
    %234 = vector.load %arg23[%c1_153, %c0_154, %c0_155] : memref<2x1x32xf32, #tpu.memory_space<vmem>>, vector<1x1x32xf32>
    %235 = vector.shape_cast %234 : vector<1x1x32xf32> to vector<1x32xf32>
    %c0_156 = arith.constant 0 : index
    %c0_157 = arith.constant 0 : index
    %c0_158 = arith.constant 0 : index
    %236 = vector.load %arg24[%c0_156, %c0_157, %c0_158] : memref<2x1x32xf32, #tpu.memory_space<vmem>>, vector<1x1x32xf32>
    %237 = vector.shape_cast %236 : vector<1x1x32xf32> to vector<1x32xf32>
    %c1_159 = arith.constant 1 : index
    %c0_160 = arith.constant 0 : index
    %c0_161 = arith.constant 0 : index
    %238 = vector.load %arg24[%c1_159, %c0_160, %c0_161] : memref<2x1x32xf32, #tpu.memory_space<vmem>>, vector<1x1x32xf32>
    %239 = vector.shape_cast %238 : vector<1x1x32xf32> to vector<1x32xf32>
    %c0_162 = arith.constant 0 : index
    %c0_163 = arith.constant 0 : index
    %c0_164 = arith.constant 0 : index
    %240 = vector.load %arg25[%c0_162, %c0_163, %c0_164] : memref<2x1x32xf32, #tpu.memory_space<vmem>>, vector<1x1x32xf32>
    %241 = vector.shape_cast %240 : vector<1x1x32xf32> to vector<1x32xf32>
    %c1_165 = arith.constant 1 : index
    %c0_166 = arith.constant 0 : index
    %c0_167 = arith.constant 0 : index
    %242 = vector.load %arg25[%c1_165, %c0_166, %c0_167] : memref<2x1x32xf32, #tpu.memory_space<vmem>>, vector<1x1x32xf32>
    %243 = vector.shape_cast %242 : vector<1x1x32xf32> to vector<1x32xf32>
    %c0_168 = arith.constant 0 : index
    %c0_169 = arith.constant 0 : index
    %c0_170 = arith.constant 0 : index
    %244 = vector.load %arg26[%c0_168, %c0_169, %c0_170] : memref<2x1x32xf32, #tpu.memory_space<vmem>>, vector<1x1x32xf32>
    %245 = vector.shape_cast %244 : vector<1x1x32xf32> to vector<1x32xf32>
    %c1_171 = arith.constant 1 : index
    %c0_172 = arith.constant 0 : index
    %c0_173 = arith.constant 0 : index
    %246 = vector.load %arg26[%c1_171, %c0_172, %c0_173] : memref<2x1x32xf32, #tpu.memory_space<vmem>>, vector<1x1x32xf32>
    %247 = vector.shape_cast %246 : vector<1x1x32xf32> to vector<1x32xf32>
    %cst_174 = arith.constant dense<0.000000e+00> : vector<16x32xf32>
    %248 = tpu.matmul %207, %209, %cst_174 {dimension_numbers = #tpu.dot_dimension_numbers<[1], [0], [0], [1], [0, 0, 1, 1], [], []>} : vector<16x32xf32>, vector<32x32xf32>, vector<16x32xf32> -> vector<16x32xf32>
    %249 = vector.broadcast %233 : vector<1x32xf32> to vector<16x32xf32>
    %250 = arith.addf %248, %249 : vector<16x32xf32>
    %cst_175 = arith.constant dense<0.000000e+00> : vector<16x32xf32>
    %251 = tpu.matmul %207, %213, %cst_175 {dimension_numbers = #tpu.dot_dimension_numbers<[1], [0], [0], [1], [0, 0, 1, 1], [], []>} : vector<16x32xf32>, vector<32x32xf32>, vector<16x32xf32> -> vector<16x32xf32>
    %252 = vector.broadcast %237 : vector<1x32xf32> to vector<16x32xf32>
    %253 = arith.addf %251, %252 : vector<16x32xf32>
    %cst_176 = arith.constant dense<0.000000e+00> : vector<16x32xf32>
    %254 = tpu.matmul %207, %217, %cst_176 {dimension_numbers = #tpu.dot_dimension_numbers<[1], [0], [0], [1], [0, 0, 1, 1], [], []>} : vector<16x32xf32>, vector<32x32xf32>, vector<16x32xf32> -> vector<16x32xf32>
    %255 = vector.broadcast %241 : vector<1x32xf32> to vector<16x32xf32>
    %256 = arith.addf %254, %255 : vector<16x32xf32>
    %257 = vector.extract_strided_slice %250 {offsets = [0, 0], sizes = [1, 32], strides = [1, 1]} : vector<16x32xf32> to vector<1x32xf32>
    %258 = vector.extract_strided_slice %250 {offsets = [8, 0], sizes = [1, 32], strides = [1, 1]} : vector<16x32xf32> to vector<1x32xf32>
    %259 = tpu.concatenate %257, %258 in 0 : vector<1x32xf32>, vector<1x32xf32> -> vector<2x32xf32>
    %260 = vector.extract_strided_slice %253 {offsets = [0, 0], sizes = [1, 32], strides = [1, 1]} : vector<16x32xf32> to vector<1x32xf32>
    %261 = vector.extract_strided_slice %253 {offsets = [8, 0], sizes = [1, 32], strides = [1, 1]} : vector<16x32xf32> to vector<1x32xf32>
    %262 = tpu.concatenate %260, %261 in 0 : vector<1x32xf32>, vector<1x32xf32> -> vector<2x32xf32>
    %263 = vector.extract_strided_slice %256 {offsets = [0, 0], sizes = [1, 32], strides = [1, 1]} : vector<16x32xf32> to vector<1x32xf32>
    %264 = vector.extract_strided_slice %256 {offsets = [8, 0], sizes = [1, 32], strides = [1, 1]} : vector<16x32xf32> to vector<1x32xf32>
    %265 = tpu.concatenate %263, %264 in 0 : vector<1x32xf32>, vector<1x32xf32> -> vector<2x32xf32>
    %266 = vector.extract_strided_slice %250 {offsets = [1, 0], sizes = [1, 32], strides = [1, 1]} : vector<16x32xf32> to vector<1x32xf32>
    %267 = vector.extract_strided_slice %250 {offsets = [9, 0], sizes = [1, 32], strides = [1, 1]} : vector<16x32xf32> to vector<1x32xf32>
    %268 = tpu.concatenate %266, %267 in 0 : vector<1x32xf32>, vector<1x32xf32> -> vector<2x32xf32>
    %269 = vector.extract_strided_slice %253 {offsets = [1, 0], sizes = [1, 32], strides = [1, 1]} : vector<16x32xf32> to vector<1x32xf32>
    %270 = vector.extract_strided_slice %253 {offsets = [9, 0], sizes = [1, 32], strides = [1, 1]} : vector<16x32xf32> to vector<1x32xf32>
    %271 = tpu.concatenate %269, %270 in 0 : vector<1x32xf32>, vector<1x32xf32> -> vector<2x32xf32>
    %272 = vector.extract_strided_slice %256 {offsets = [1, 0], sizes = [1, 32], strides = [1, 1]} : vector<16x32xf32> to vector<1x32xf32>
    %273 = vector.extract_strided_slice %256 {offsets = [9, 0], sizes = [1, 32], strides = [1, 1]} : vector<16x32xf32> to vector<1x32xf32>
    %274 = tpu.concatenate %272, %273 in 0 : vector<1x32xf32>, vector<1x32xf32> -> vector<2x32xf32>
    %275 = vector.extract_strided_slice %250 {offsets = [2, 0], sizes = [1, 32], strides = [1, 1]} : vector<16x32xf32> to vector<1x32xf32>
    %276 = vector.extract_strided_slice %250 {offsets = [10, 0], sizes = [1, 32], strides = [1, 1]} : vector<16x32xf32> to vector<1x32xf32>
    %277 = tpu.concatenate %275, %276 in 0 : vector<1x32xf32>, vector<1x32xf32> -> vector<2x32xf32>
    %278 = vector.extract_strided_slice %253 {offsets = [2, 0], sizes = [1, 32], strides = [1, 1]} : vector<16x32xf32> to vector<1x32xf32>
    %279 = vector.extract_strided_slice %253 {offsets = [10, 0], sizes = [1, 32], strides = [1, 1]} : vector<16x32xf32> to vector<1x32xf32>
    %280 = tpu.concatenate %278, %279 in 0 : vector<1x32xf32>, vector<1x32xf32> -> vector<2x32xf32>
    %281 = vector.extract_strided_slice %256 {offsets = [2, 0], sizes = [1, 32], strides = [1, 1]} : vector<16x32xf32> to vector<1x32xf32>
    %282 = vector.extract_strided_slice %256 {offsets = [10, 0], sizes = [1, 32], strides = [1, 1]} : vector<16x32xf32> to vector<1x32xf32>
    %283 = tpu.concatenate %281, %282 in 0 : vector<1x32xf32>, vector<1x32xf32> -> vector<2x32xf32>
    %284 = vector.extract_strided_slice %250 {offsets = [3, 0], sizes = [1, 32], strides = [1, 1]} : vector<16x32xf32> to vector<1x32xf32>
    %285 = vector.extract_strided_slice %250 {offsets = [11, 0], sizes = [1, 32], strides = [1, 1]} : vector<16x32xf32> to vector<1x32xf32>
    %286 = tpu.concatenate %284, %285 in 0 : vector<1x32xf32>, vector<1x32xf32> -> vector<2x32xf32>
    %287 = vector.extract_strided_slice %253 {offsets = [3, 0], sizes = [1, 32], strides = [1, 1]} : vector<16x32xf32> to vector<1x32xf32>
    %288 = vector.extract_strided_slice %253 {offsets = [11, 0], sizes = [1, 32], strides = [1, 1]} : vector<16x32xf32> to vector<1x32xf32>
    %289 = tpu.concatenate %287, %288 in 0 : vector<1x32xf32>, vector<1x32xf32> -> vector<2x32xf32>
    %290 = vector.extract_strided_slice %256 {offsets = [3, 0], sizes = [1, 32], strides = [1, 1]} : vector<16x32xf32> to vector<1x32xf32>
    %291 = vector.extract_strided_slice %256 {offsets = [11, 0], sizes = [1, 32], strides = [1, 1]} : vector<16x32xf32> to vector<1x32xf32>
    %292 = tpu.concatenate %290, %291 in 0 : vector<1x32xf32>, vector<1x32xf32> -> vector<2x32xf32>
    %293 = vector.extract_strided_slice %250 {offsets = [4, 0], sizes = [1, 32], strides = [1, 1]} : vector<16x32xf32> to vector<1x32xf32>
    %294 = vector.extract_strided_slice %250 {offsets = [12, 0], sizes = [1, 32], strides = [1, 1]} : vector<16x32xf32> to vector<1x32xf32>
    %295 = tpu.concatenate %293, %294 in 0 : vector<1x32xf32>, vector<1x32xf32> -> vector<2x32xf32>
    %296 = vector.extract_strided_slice %253 {offsets = [4, 0], sizes = [1, 32], strides = [1, 1]} : vector<16x32xf32> to vector<1x32xf32>
    %297 = vector.extract_strided_slice %253 {offsets = [12, 0], sizes = [1, 32], strides = [1, 1]} : vector<16x32xf32> to vector<1x32xf32>
    %298 = tpu.concatenate %296, %297 in 0 : vector<1x32xf32>, vector<1x32xf32> -> vector<2x32xf32>
    %299 = vector.extract_strided_slice %256 {offsets = [4, 0], sizes = [1, 32], strides = [1, 1]} : vector<16x32xf32> to vector<1x32xf32>
    %300 = vector.extract_strided_slice %256 {offsets = [12, 0], sizes = [1, 32], strides = [1, 1]} : vector<16x32xf32> to vector<1x32xf32>
    %301 = tpu.concatenate %299, %300 in 0 : vector<1x32xf32>, vector<1x32xf32> -> vector<2x32xf32>
    %302 = vector.extract_strided_slice %250 {offsets = [5, 0], sizes = [1, 32], strides = [1, 1]} : vector<16x32xf32> to vector<1x32xf32>
    %303 = vector.extract_strided_slice %250 {offsets = [13, 0], sizes = [1, 32], strides = [1, 1]} : vector<16x32xf32> to vector<1x32xf32>
    %304 = tpu.concatenate %302, %303 in 0 : vector<1x32xf32>, vector<1x32xf32> -> vector<2x32xf32>
    %305 = vector.extract_strided_slice %253 {offsets = [5, 0], sizes = [1, 32], strides = [1, 1]} : vector<16x32xf32> to vector<1x32xf32>
    %306 = vector.extract_strided_slice %253 {offsets = [13, 0], sizes = [1, 32], strides = [1, 1]} : vector<16x32xf32> to vector<1x32xf32>
    %307 = tpu.concatenate %305, %306 in 0 : vector<1x32xf32>, vector<1x32xf32> -> vector<2x32xf32>
    %308 = vector.extract_strided_slice %256 {offsets = [5, 0], sizes = [1, 32], strides = [1, 1]} : vector<16x32xf32> to vector<1x32xf32>
    %309 = vector.extract_strided_slice %256 {offsets = [13, 0], sizes = [1, 32], strides = [1, 1]} : vector<16x32xf32> to vector<1x32xf32>
    %310 = tpu.concatenate %308, %309 in 0 : vector<1x32xf32>, vector<1x32xf32> -> vector<2x32xf32>
    %311 = vector.extract_strided_slice %250 {offsets = [6, 0], sizes = [1, 32], strides = [1, 1]} : vector<16x32xf32> to vector<1x32xf32>
    %312 = vector.extract_strided_slice %250 {offsets = [14, 0], sizes = [1, 32], strides = [1, 1]} : vector<16x32xf32> to vector<1x32xf32>
    %313 = tpu.concatenate %311, %312 in 0 : vector<1x32xf32>, vector<1x32xf32> -> vector<2x32xf32>
    %314 = vector.extract_strided_slice %253 {offsets = [6, 0], sizes = [1, 32], strides = [1, 1]} : vector<16x32xf32> to vector<1x32xf32>
    %315 = vector.extract_strided_slice %253 {offsets = [14, 0], sizes = [1, 32], strides = [1, 1]} : vector<16x32xf32> to vector<1x32xf32>
    %316 = tpu.concatenate %314, %315 in 0 : vector<1x32xf32>, vector<1x32xf32> -> vector<2x32xf32>
    %317 = vector.extract_strided_slice %256 {offsets = [6, 0], sizes = [1, 32], strides = [1, 1]} : vector<16x32xf32> to vector<1x32xf32>
    %318 = vector.extract_strided_slice %256 {offsets = [14, 0], sizes = [1, 32], strides = [1, 1]} : vector<16x32xf32> to vector<1x32xf32>
    %319 = tpu.concatenate %317, %318 in 0 : vector<1x32xf32>, vector<1x32xf32> -> vector<2x32xf32>
    %320 = vector.extract_strided_slice %250 {offsets = [7, 0], sizes = [1, 32], strides = [1, 1]} : vector<16x32xf32> to vector<1x32xf32>
    %321 = vector.extract_strided_slice %250 {offsets = [15, 0], sizes = [1, 32], strides = [1, 1]} : vector<16x32xf32> to vector<1x32xf32>
    %322 = tpu.concatenate %320, %321 in 0 : vector<1x32xf32>, vector<1x32xf32> -> vector<2x32xf32>
    %323 = vector.extract_strided_slice %253 {offsets = [7, 0], sizes = [1, 32], strides = [1, 1]} : vector<16x32xf32> to vector<1x32xf32>
    %324 = vector.extract_strided_slice %253 {offsets = [15, 0], sizes = [1, 32], strides = [1, 1]} : vector<16x32xf32> to vector<1x32xf32>
    %325 = tpu.concatenate %323, %324 in 0 : vector<1x32xf32>, vector<1x32xf32> -> vector<2x32xf32>
    %326 = vector.extract_strided_slice %256 {offsets = [7, 0], sizes = [1, 32], strides = [1, 1]} : vector<16x32xf32> to vector<1x32xf32>
    %327 = vector.extract_strided_slice %256 {offsets = [15, 0], sizes = [1, 32], strides = [1, 1]} : vector<16x32xf32> to vector<1x32xf32>
    %328 = tpu.concatenate %326, %327 in 0 : vector<1x32xf32>, vector<1x32xf32> -> vector<2x32xf32>
    %cst_177 = arith.constant 0.000000e+00 : f32
    %329 = vector.broadcast %cst_177 : f32 to vector<2x32xf32>
    %cst_178 = arith.constant 0.000000e+00 : f32
    %330 = vector.broadcast %cst_178 : f32 to vector<2x32xf32>
    %cst_179 = arith.constant dense<0.000000e+00> : vector<2x32xf32>
    %331 = tpu.matmul %329, %221, %cst_179 {dimension_numbers = #tpu.dot_dimension_numbers<[1], [0], [0], [1], [0, 0, 1, 1], [], []>} : vector<2x32xf32>, vector<32x32xf32>, vector<2x32xf32> -> vector<2x32xf32>
    %cst_180 = arith.constant dense<0.000000e+00> : vector<2x32xf32>
    %332 = tpu.matmul %329, %225, %cst_180 {dimension_numbers = #tpu.dot_dimension_numbers<[1], [0], [0], [1], [0, 0, 1, 1], [], []>} : vector<2x32xf32>, vector<32x32xf32>, vector<2x32xf32> -> vector<2x32xf32>
    %cst_181 = arith.constant dense<0.000000e+00> : vector<2x32xf32>
    %333 = tpu.matmul %329, %229, %cst_181 {dimension_numbers = #tpu.dot_dimension_numbers<[1], [0], [0], [1], [0, 0, 1, 1], [], []>} : vector<2x32xf32>, vector<32x32xf32>, vector<2x32xf32> -> vector<2x32xf32>
    %334 = vector.broadcast %245 : vector<1x32xf32> to vector<2x32xf32>
    %335 = arith.addf %333, %334 : vector<2x32xf32>
    %336 = arith.addf %259, %331 : vector<2x32xf32>
    %337 = arith.negf %336 : vector<2x32xf32>
    %338 = math.exp %337 : vector<2x32xf32>
    %cst_182 = arith.constant 1.000000e+00 : f32
    %339 = vector.broadcast %cst_182 : f32 to vector<2x32xf32>
    %340 = arith.addf %339, %338 : vector<2x32xf32>
    %341 = arith.divf %339, %340 : vector<2x32xf32>
    %342 = arith.addf %262, %332 : vector<2x32xf32>
    %343 = arith.negf %342 : vector<2x32xf32>
    %344 = math.exp %343 : vector<2x32xf32>
    %cst_183 = arith.constant 1.000000e+00 : f32
    %345 = vector.broadcast %cst_183 : f32 to vector<2x32xf32>
    %346 = arith.addf %345, %344 : vector<2x32xf32>
    %347 = arith.divf %345, %346 : vector<2x32xf32>
    %348 = arith.mulf %341, %335 : vector<2x32xf32>
    %349 = arith.addf %265, %348 : vector<2x32xf32>
    %350 = math.tanh %349 : vector<2x32xf32>
    %cst_184 = arith.constant 1.000000e+00 : f32
    %351 = vector.broadcast %cst_184 : f32 to vector<2x32xf32>
    %352 = arith.subf %351, %347 : vector<2x32xf32>
    %353 = arith.mulf %352, %350 : vector<2x32xf32>
    %354 = arith.mulf %347, %329 : vector<2x32xf32>
    %355 = arith.addf %353, %354 : vector<2x32xf32>
    %cst_185 = arith.constant dense<0.000000e+00> : vector<2x32xf32>
    %356 = tpu.matmul %355, %221, %cst_185 {dimension_numbers = #tpu.dot_dimension_numbers<[1], [0], [0], [1], [0, 0, 1, 1], [], []>} : vector<2x32xf32>, vector<32x32xf32>, vector<2x32xf32> -> vector<2x32xf32>
    %cst_186 = arith.constant dense<0.000000e+00> : vector<2x32xf32>
    %357 = tpu.matmul %355, %225, %cst_186 {dimension_numbers = #tpu.dot_dimension_numbers<[1], [0], [0], [1], [0, 0, 1, 1], [], []>} : vector<2x32xf32>, vector<32x32xf32>, vector<2x32xf32> -> vector<2x32xf32>
    %cst_187 = arith.constant dense<0.000000e+00> : vector<2x32xf32>
    %358 = tpu.matmul %355, %229, %cst_187 {dimension_numbers = #tpu.dot_dimension_numbers<[1], [0], [0], [1], [0, 0, 1, 1], [], []>} : vector<2x32xf32>, vector<32x32xf32>, vector<2x32xf32> -> vector<2x32xf32>
    %359 = vector.broadcast %245 : vector<1x32xf32> to vector<2x32xf32>
    %360 = arith.addf %358, %359 : vector<2x32xf32>
    %361 = arith.addf %268, %356 : vector<2x32xf32>
    %362 = arith.negf %361 : vector<2x32xf32>
    %363 = math.exp %362 : vector<2x32xf32>
    %cst_188 = arith.constant 1.000000e+00 : f32
    %364 = vector.broadcast %cst_188 : f32 to vector<2x32xf32>
    %365 = arith.addf %364, %363 : vector<2x32xf32>
    %366 = arith.divf %364, %365 : vector<2x32xf32>
    %367 = arith.addf %271, %357 : vector<2x32xf32>
    %368 = arith.negf %367 : vector<2x32xf32>
    %369 = math.exp %368 : vector<2x32xf32>
    %cst_189 = arith.constant 1.000000e+00 : f32
    %370 = vector.broadcast %cst_189 : f32 to vector<2x32xf32>
    %371 = arith.addf %370, %369 : vector<2x32xf32>
    %372 = arith.divf %370, %371 : vector<2x32xf32>
    %373 = arith.mulf %366, %360 : vector<2x32xf32>
    %374 = arith.addf %274, %373 : vector<2x32xf32>
    %375 = math.tanh %374 : vector<2x32xf32>
    %cst_190 = arith.constant 1.000000e+00 : f32
    %376 = vector.broadcast %cst_190 : f32 to vector<2x32xf32>
    %377 = arith.subf %376, %372 : vector<2x32xf32>
    %378 = arith.mulf %377, %375 : vector<2x32xf32>
    %379 = arith.mulf %372, %355 : vector<2x32xf32>
    %380 = arith.addf %378, %379 : vector<2x32xf32>
    %cst_191 = arith.constant dense<0.000000e+00> : vector<2x32xf32>
    %381 = tpu.matmul %355, %211, %cst_191 {dimension_numbers = #tpu.dot_dimension_numbers<[1], [0], [0], [1], [0, 0, 1, 1], [], []>} : vector<2x32xf32>, vector<32x32xf32>, vector<2x32xf32> -> vector<2x32xf32>
    %382 = vector.broadcast %235 : vector<1x32xf32> to vector<2x32xf32>
    %383 = arith.addf %381, %382 : vector<2x32xf32>
    %cst_192 = arith.constant dense<0.000000e+00> : vector<2x32xf32>
    %384 = tpu.matmul %355, %215, %cst_192 {dimension_numbers = #tpu.dot_dimension_numbers<[1], [0], [0], [1], [0, 0, 1, 1], [], []>} : vector<2x32xf32>, vector<32x32xf32>, vector<2x32xf32> -> vector<2x32xf32>
    %385 = vector.broadcast %239 : vector<1x32xf32> to vector<2x32xf32>
    %386 = arith.addf %384, %385 : vector<2x32xf32>
    %cst_193 = arith.constant dense<0.000000e+00> : vector<2x32xf32>
    %387 = tpu.matmul %355, %219, %cst_193 {dimension_numbers = #tpu.dot_dimension_numbers<[1], [0], [0], [1], [0, 0, 1, 1], [], []>} : vector<2x32xf32>, vector<32x32xf32>, vector<2x32xf32> -> vector<2x32xf32>
    %388 = vector.broadcast %243 : vector<1x32xf32> to vector<2x32xf32>
    %389 = arith.addf %387, %388 : vector<2x32xf32>
    %cst_194 = arith.constant dense<0.000000e+00> : vector<2x32xf32>
    %390 = tpu.matmul %330, %223, %cst_194 {dimension_numbers = #tpu.dot_dimension_numbers<[1], [0], [0], [1], [0, 0, 1, 1], [], []>} : vector<2x32xf32>, vector<32x32xf32>, vector<2x32xf32> -> vector<2x32xf32>
    %cst_195 = arith.constant dense<0.000000e+00> : vector<2x32xf32>
    %391 = tpu.matmul %330, %227, %cst_195 {dimension_numbers = #tpu.dot_dimension_numbers<[1], [0], [0], [1], [0, 0, 1, 1], [], []>} : vector<2x32xf32>, vector<32x32xf32>, vector<2x32xf32> -> vector<2x32xf32>
    %cst_196 = arith.constant dense<0.000000e+00> : vector<2x32xf32>
    %392 = tpu.matmul %330, %231, %cst_196 {dimension_numbers = #tpu.dot_dimension_numbers<[1], [0], [0], [1], [0, 0, 1, 1], [], []>} : vector<2x32xf32>, vector<32x32xf32>, vector<2x32xf32> -> vector<2x32xf32>
    %393 = vector.broadcast %247 : vector<1x32xf32> to vector<2x32xf32>
    %394 = arith.addf %392, %393 : vector<2x32xf32>
    %395 = arith.addf %383, %390 : vector<2x32xf32>
    %396 = arith.negf %395 : vector<2x32xf32>
    %397 = math.exp %396 : vector<2x32xf32>
    %cst_197 = arith.constant 1.000000e+00 : f32
    %398 = vector.broadcast %cst_197 : f32 to vector<2x32xf32>
    %399 = arith.addf %398, %397 : vector<2x32xf32>
    %400 = arith.divf %398, %399 : vector<2x32xf32>
    %401 = arith.addf %386, %391 : vector<2x32xf32>
    %402 = arith.negf %401 : vector<2x32xf32>
    %403 = math.exp %402 : vector<2x32xf32>
    %cst_198 = arith.constant 1.000000e+00 : f32
    %404 = vector.broadcast %cst_198 : f32 to vector<2x32xf32>
    %405 = arith.addf %404, %403 : vector<2x32xf32>
    %406 = arith.divf %404, %405 : vector<2x32xf32>
    %407 = arith.mulf %400, %394 : vector<2x32xf32>
    %408 = arith.addf %389, %407 : vector<2x32xf32>
    %409 = math.tanh %408 : vector<2x32xf32>
    %cst_199 = arith.constant 1.000000e+00 : f32
    %410 = vector.broadcast %cst_199 : f32 to vector<2x32xf32>
    %411 = arith.subf %410, %406 : vector<2x32xf32>
    %412 = arith.mulf %411, %409 : vector<2x32xf32>
    %413 = arith.mulf %406, %330 : vector<2x32xf32>
    %414 = arith.addf %412, %413 : vector<2x32xf32>
    %cst_200 = arith.constant dense<0.000000e+00> : vector<2x32xf32>
    %415 = tpu.matmul %380, %221, %cst_200 {dimension_numbers = #tpu.dot_dimension_numbers<[1], [0], [0], [1], [0, 0, 1, 1], [], []>} : vector<2x32xf32>, vector<32x32xf32>, vector<2x32xf32> -> vector<2x32xf32>
    %cst_201 = arith.constant dense<0.000000e+00> : vector<2x32xf32>
    %416 = tpu.matmul %380, %225, %cst_201 {dimension_numbers = #tpu.dot_dimension_numbers<[1], [0], [0], [1], [0, 0, 1, 1], [], []>} : vector<2x32xf32>, vector<32x32xf32>, vector<2x32xf32> -> vector<2x32xf32>
    %cst_202 = arith.constant dense<0.000000e+00> : vector<2x32xf32>
    %417 = tpu.matmul %380, %229, %cst_202 {dimension_numbers = #tpu.dot_dimension_numbers<[1], [0], [0], [1], [0, 0, 1, 1], [], []>} : vector<2x32xf32>, vector<32x32xf32>, vector<2x32xf32> -> vector<2x32xf32>
    %418 = vector.broadcast %245 : vector<1x32xf32> to vector<2x32xf32>
    %419 = arith.addf %417, %418 : vector<2x32xf32>
    %420 = arith.addf %277, %415 : vector<2x32xf32>
    %421 = arith.negf %420 : vector<2x32xf32>
    %422 = math.exp %421 : vector<2x32xf32>
    %cst_203 = arith.constant 1.000000e+00 : f32
    %423 = vector.broadcast %cst_203 : f32 to vector<2x32xf32>
    %424 = arith.addf %423, %422 : vector<2x32xf32>
    %425 = arith.divf %423, %424 : vector<2x32xf32>
    %426 = arith.addf %280, %416 : vector<2x32xf32>
    %427 = arith.negf %426 : vector<2x32xf32>
    %428 = math.exp %427 : vector<2x32xf32>
    %cst_204 = arith.constant 1.000000e+00 : f32
    %429 = vector.broadcast %cst_204 : f32 to vector<2x32xf32>
    %430 = arith.addf %429, %428 : vector<2x32xf32>
    %431 = arith.divf %429, %430 : vector<2x32xf32>
    %432 = arith.mulf %425, %419 : vector<2x32xf32>
    %433 = arith.addf %283, %432 : vector<2x32xf32>
    %434 = math.tanh %433 : vector<2x32xf32>
    %cst_205 = arith.constant 1.000000e+00 : f32
    %435 = vector.broadcast %cst_205 : f32 to vector<2x32xf32>
    %436 = arith.subf %435, %431 : vector<2x32xf32>
    %437 = arith.mulf %436, %434 : vector<2x32xf32>
    %438 = arith.mulf %431, %380 : vector<2x32xf32>
    %439 = arith.addf %437, %438 : vector<2x32xf32>
    %cst_206 = arith.constant dense<0.000000e+00> : vector<2x32xf32>
    %440 = tpu.matmul %380, %211, %cst_206 {dimension_numbers = #tpu.dot_dimension_numbers<[1], [0], [0], [1], [0, 0, 1, 1], [], []>} : vector<2x32xf32>, vector<32x32xf32>, vector<2x32xf32> -> vector<2x32xf32>
    %441 = vector.broadcast %235 : vector<1x32xf32> to vector<2x32xf32>
    %442 = arith.addf %440, %441 : vector<2x32xf32>
    %cst_207 = arith.constant dense<0.000000e+00> : vector<2x32xf32>
    %443 = tpu.matmul %380, %215, %cst_207 {dimension_numbers = #tpu.dot_dimension_numbers<[1], [0], [0], [1], [0, 0, 1, 1], [], []>} : vector<2x32xf32>, vector<32x32xf32>, vector<2x32xf32> -> vector<2x32xf32>
    %444 = vector.broadcast %239 : vector<1x32xf32> to vector<2x32xf32>
    %445 = arith.addf %443, %444 : vector<2x32xf32>
    %cst_208 = arith.constant dense<0.000000e+00> : vector<2x32xf32>
    %446 = tpu.matmul %380, %219, %cst_208 {dimension_numbers = #tpu.dot_dimension_numbers<[1], [0], [0], [1], [0, 0, 1, 1], [], []>} : vector<2x32xf32>, vector<32x32xf32>, vector<2x32xf32> -> vector<2x32xf32>
    %447 = vector.broadcast %243 : vector<1x32xf32> to vector<2x32xf32>
    %448 = arith.addf %446, %447 : vector<2x32xf32>
    %cst_209 = arith.constant dense<0.000000e+00> : vector<2x32xf32>
    %449 = tpu.matmul %414, %223, %cst_209 {dimension_numbers = #tpu.dot_dimension_numbers<[1], [0], [0], [1], [0, 0, 1, 1], [], []>} : vector<2x32xf32>, vector<32x32xf32>, vector<2x32xf32> -> vector<2x32xf32>
    %cst_210 = arith.constant dense<0.000000e+00> : vector<2x32xf32>
    %450 = tpu.matmul %414, %227, %cst_210 {dimension_numbers = #tpu.dot_dimension_numbers<[1], [0], [0], [1], [0, 0, 1, 1], [], []>} : vector<2x32xf32>, vector<32x32xf32>, vector<2x32xf32> -> vector<2x32xf32>
    %cst_211 = arith.constant dense<0.000000e+00> : vector<2x32xf32>
    %451 = tpu.matmul %414, %231, %cst_211 {dimension_numbers = #tpu.dot_dimension_numbers<[1], [0], [0], [1], [0, 0, 1, 1], [], []>} : vector<2x32xf32>, vector<32x32xf32>, vector<2x32xf32> -> vector<2x32xf32>
    %452 = vector.broadcast %247 : vector<1x32xf32> to vector<2x32xf32>
    %453 = arith.addf %451, %452 : vector<2x32xf32>
    %454 = arith.addf %442, %449 : vector<2x32xf32>
    %455 = arith.negf %454 : vector<2x32xf32>
    %456 = math.exp %455 : vector<2x32xf32>
    %cst_212 = arith.constant 1.000000e+00 : f32
    %457 = vector.broadcast %cst_212 : f32 to vector<2x32xf32>
    %458 = arith.addf %457, %456 : vector<2x32xf32>
    %459 = arith.divf %457, %458 : vector<2x32xf32>
    %460 = arith.addf %445, %450 : vector<2x32xf32>
    %461 = arith.negf %460 : vector<2x32xf32>
    %462 = math.exp %461 : vector<2x32xf32>
    %cst_213 = arith.constant 1.000000e+00 : f32
    %463 = vector.broadcast %cst_213 : f32 to vector<2x32xf32>
    %464 = arith.addf %463, %462 : vector<2x32xf32>
    %465 = arith.divf %463, %464 : vector<2x32xf32>
    %466 = arith.mulf %459, %453 : vector<2x32xf32>
    %467 = arith.addf %448, %466 : vector<2x32xf32>
    %468 = math.tanh %467 : vector<2x32xf32>
    %cst_214 = arith.constant 1.000000e+00 : f32
    %469 = vector.broadcast %cst_214 : f32 to vector<2x32xf32>
    %470 = arith.subf %469, %465 : vector<2x32xf32>
    %471 = arith.mulf %470, %468 : vector<2x32xf32>
    %472 = arith.mulf %465, %414 : vector<2x32xf32>
    %473 = arith.addf %471, %472 : vector<2x32xf32>
    %cst_215 = arith.constant dense<0.000000e+00> : vector<2x32xf32>
    %474 = tpu.matmul %439, %221, %cst_215 {dimension_numbers = #tpu.dot_dimension_numbers<[1], [0], [0], [1], [0, 0, 1, 1], [], []>} : vector<2x32xf32>, vector<32x32xf32>, vector<2x32xf32> -> vector<2x32xf32>
    %cst_216 = arith.constant dense<0.000000e+00> : vector<2x32xf32>
    %475 = tpu.matmul %439, %225, %cst_216 {dimension_numbers = #tpu.dot_dimension_numbers<[1], [0], [0], [1], [0, 0, 1, 1], [], []>} : vector<2x32xf32>, vector<32x32xf32>, vector<2x32xf32> -> vector<2x32xf32>
    %cst_217 = arith.constant dense<0.000000e+00> : vector<2x32xf32>
    %476 = tpu.matmul %439, %229, %cst_217 {dimension_numbers = #tpu.dot_dimension_numbers<[1], [0], [0], [1], [0, 0, 1, 1], [], []>} : vector<2x32xf32>, vector<32x32xf32>, vector<2x32xf32> -> vector<2x32xf32>
    %477 = vector.broadcast %245 : vector<1x32xf32> to vector<2x32xf32>
    %478 = arith.addf %476, %477 : vector<2x32xf32>
    %479 = arith.addf %286, %474 : vector<2x32xf32>
    %480 = arith.negf %479 : vector<2x32xf32>
    %481 = math.exp %480 : vector<2x32xf32>
    %cst_218 = arith.constant 1.000000e+00 : f32
    %482 = vector.broadcast %cst_218 : f32 to vector<2x32xf32>
    %483 = arith.addf %482, %481 : vector<2x32xf32>
    %484 = arith.divf %482, %483 : vector<2x32xf32>
    %485 = arith.addf %289, %475 : vector<2x32xf32>
    %486 = arith.negf %485 : vector<2x32xf32>
    %487 = math.exp %486 : vector<2x32xf32>
    %cst_219 = arith.constant 1.000000e+00 : f32
    %488 = vector.broadcast %cst_219 : f32 to vector<2x32xf32>
    %489 = arith.addf %488, %487 : vector<2x32xf32>
    %490 = arith.divf %488, %489 : vector<2x32xf32>
    %491 = arith.mulf %484, %478 : vector<2x32xf32>
    %492 = arith.addf %292, %491 : vector<2x32xf32>
    %493 = math.tanh %492 : vector<2x32xf32>
    %cst_220 = arith.constant 1.000000e+00 : f32
    %494 = vector.broadcast %cst_220 : f32 to vector<2x32xf32>
    %495 = arith.subf %494, %490 : vector<2x32xf32>
    %496 = arith.mulf %495, %493 : vector<2x32xf32>
    %497 = arith.mulf %490, %439 : vector<2x32xf32>
    %498 = arith.addf %496, %497 : vector<2x32xf32>
    %cst_221 = arith.constant dense<0.000000e+00> : vector<2x32xf32>
    %499 = tpu.matmul %439, %211, %cst_221 {dimension_numbers = #tpu.dot_dimension_numbers<[1], [0], [0], [1], [0, 0, 1, 1], [], []>} : vector<2x32xf32>, vector<32x32xf32>, vector<2x32xf32> -> vector<2x32xf32>
    %500 = vector.broadcast %235 : vector<1x32xf32> to vector<2x32xf32>
    %501 = arith.addf %499, %500 : vector<2x32xf32>
    %cst_222 = arith.constant dense<0.000000e+00> : vector<2x32xf32>
    %502 = tpu.matmul %439, %215, %cst_222 {dimension_numbers = #tpu.dot_dimension_numbers<[1], [0], [0], [1], [0, 0, 1, 1], [], []>} : vector<2x32xf32>, vector<32x32xf32>, vector<2x32xf32> -> vector<2x32xf32>
    %503 = vector.broadcast %239 : vector<1x32xf32> to vector<2x32xf32>
    %504 = arith.addf %502, %503 : vector<2x32xf32>
    %cst_223 = arith.constant dense<0.000000e+00> : vector<2x32xf32>
    %505 = tpu.matmul %439, %219, %cst_223 {dimension_numbers = #tpu.dot_dimension_numbers<[1], [0], [0], [1], [0, 0, 1, 1], [], []>} : vector<2x32xf32>, vector<32x32xf32>, vector<2x32xf32> -> vector<2x32xf32>
    %506 = vector.broadcast %243 : vector<1x32xf32> to vector<2x32xf32>
    %507 = arith.addf %505, %506 : vector<2x32xf32>
    %cst_224 = arith.constant dense<0.000000e+00> : vector<2x32xf32>
    %508 = tpu.matmul %473, %223, %cst_224 {dimension_numbers = #tpu.dot_dimension_numbers<[1], [0], [0], [1], [0, 0, 1, 1], [], []>} : vector<2x32xf32>, vector<32x32xf32>, vector<2x32xf32> -> vector<2x32xf32>
    %cst_225 = arith.constant dense<0.000000e+00> : vector<2x32xf32>
    %509 = tpu.matmul %473, %227, %cst_225 {dimension_numbers = #tpu.dot_dimension_numbers<[1], [0], [0], [1], [0, 0, 1, 1], [], []>} : vector<2x32xf32>, vector<32x32xf32>, vector<2x32xf32> -> vector<2x32xf32>
    %cst_226 = arith.constant dense<0.000000e+00> : vector<2x32xf32>
    %510 = tpu.matmul %473, %231, %cst_226 {dimension_numbers = #tpu.dot_dimension_numbers<[1], [0], [0], [1], [0, 0, 1, 1], [], []>} : vector<2x32xf32>, vector<32x32xf32>, vector<2x32xf32> -> vector<2x32xf32>
    %511 = vector.broadcast %247 : vector<1x32xf32> to vector<2x32xf32>
    %512 = arith.addf %510, %511 : vector<2x32xf32>
    %513 = arith.addf %501, %508 : vector<2x32xf32>
    %514 = arith.negf %513 : vector<2x32xf32>
    %515 = math.exp %514 : vector<2x32xf32>
    %cst_227 = arith.constant 1.000000e+00 : f32
    %516 = vector.broadcast %cst_227 : f32 to vector<2x32xf32>
    %517 = arith.addf %516, %515 : vector<2x32xf32>
    %518 = arith.divf %516, %517 : vector<2x32xf32>
    %519 = arith.addf %504, %509 : vector<2x32xf32>
    %520 = arith.negf %519 : vector<2x32xf32>
    %521 = math.exp %520 : vector<2x32xf32>
    %cst_228 = arith.constant 1.000000e+00 : f32
    %522 = vector.broadcast %cst_228 : f32 to vector<2x32xf32>
    %523 = arith.addf %522, %521 : vector<2x32xf32>
    %524 = arith.divf %522, %523 : vector<2x32xf32>
    %525 = arith.mulf %518, %512 : vector<2x32xf32>
    %526 = arith.addf %507, %525 : vector<2x32xf32>
    %527 = math.tanh %526 : vector<2x32xf32>
    %cst_229 = arith.constant 1.000000e+00 : f32
    %528 = vector.broadcast %cst_229 : f32 to vector<2x32xf32>
    %529 = arith.subf %528, %524 : vector<2x32xf32>
    %530 = arith.mulf %529, %527 : vector<2x32xf32>
    %531 = arith.mulf %524, %473 : vector<2x32xf32>
    %532 = arith.addf %530, %531 : vector<2x32xf32>
    %cst_230 = arith.constant dense<0.000000e+00> : vector<2x32xf32>
    %533 = tpu.matmul %498, %221, %cst_230 {dimension_numbers = #tpu.dot_dimension_numbers<[1], [0], [0], [1], [0, 0, 1, 1], [], []>} : vector<2x32xf32>, vector<32x32xf32>, vector<2x32xf32> -> vector<2x32xf32>
    %cst_231 = arith.constant dense<0.000000e+00> : vector<2x32xf32>
    %534 = tpu.matmul %498, %225, %cst_231 {dimension_numbers = #tpu.dot_dimension_numbers<[1], [0], [0], [1], [0, 0, 1, 1], [], []>} : vector<2x32xf32>, vector<32x32xf32>, vector<2x32xf32> -> vector<2x32xf32>
    %cst_232 = arith.constant dense<0.000000e+00> : vector<2x32xf32>
    %535 = tpu.matmul %498, %229, %cst_232 {dimension_numbers = #tpu.dot_dimension_numbers<[1], [0], [0], [1], [0, 0, 1, 1], [], []>} : vector<2x32xf32>, vector<32x32xf32>, vector<2x32xf32> -> vector<2x32xf32>
    %536 = vector.broadcast %245 : vector<1x32xf32> to vector<2x32xf32>
    %537 = arith.addf %535, %536 : vector<2x32xf32>
    %538 = arith.addf %295, %533 : vector<2x32xf32>
    %539 = arith.negf %538 : vector<2x32xf32>
    %540 = math.exp %539 : vector<2x32xf32>
    %cst_233 = arith.constant 1.000000e+00 : f32
    %541 = vector.broadcast %cst_233 : f32 to vector<2x32xf32>
    %542 = arith.addf %541, %540 : vector<2x32xf32>
    %543 = arith.divf %541, %542 : vector<2x32xf32>
    %544 = arith.addf %298, %534 : vector<2x32xf32>
    %545 = arith.negf %544 : vector<2x32xf32>
    %546 = math.exp %545 : vector<2x32xf32>
    %cst_234 = arith.constant 1.000000e+00 : f32
    %547 = vector.broadcast %cst_234 : f32 to vector<2x32xf32>
    %548 = arith.addf %547, %546 : vector<2x32xf32>
    %549 = arith.divf %547, %548 : vector<2x32xf32>
    %550 = arith.mulf %543, %537 : vector<2x32xf32>
    %551 = arith.addf %301, %550 : vector<2x32xf32>
    %552 = math.tanh %551 : vector<2x32xf32>
    %cst_235 = arith.constant 1.000000e+00 : f32
    %553 = vector.broadcast %cst_235 : f32 to vector<2x32xf32>
    %554 = arith.subf %553, %549 : vector<2x32xf32>
    %555 = arith.mulf %554, %552 : vector<2x32xf32>
    %556 = arith.mulf %549, %498 : vector<2x32xf32>
    %557 = arith.addf %555, %556 : vector<2x32xf32>
    %cst_236 = arith.constant dense<0.000000e+00> : vector<2x32xf32>
    %558 = tpu.matmul %498, %211, %cst_236 {dimension_numbers = #tpu.dot_dimension_numbers<[1], [0], [0], [1], [0, 0, 1, 1], [], []>} : vector<2x32xf32>, vector<32x32xf32>, vector<2x32xf32> -> vector<2x32xf32>
    %559 = vector.broadcast %235 : vector<1x32xf32> to vector<2x32xf32>
    %560 = arith.addf %558, %559 : vector<2x32xf32>
    %cst_237 = arith.constant dense<0.000000e+00> : vector<2x32xf32>
    %561 = tpu.matmul %498, %215, %cst_237 {dimension_numbers = #tpu.dot_dimension_numbers<[1], [0], [0], [1], [0, 0, 1, 1], [], []>} : vector<2x32xf32>, vector<32x32xf32>, vector<2x32xf32> -> vector<2x32xf32>
    %562 = vector.broadcast %239 : vector<1x32xf32> to vector<2x32xf32>
    %563 = arith.addf %561, %562 : vector<2x32xf32>
    %cst_238 = arith.constant dense<0.000000e+00> : vector<2x32xf32>
    %564 = tpu.matmul %498, %219, %cst_238 {dimension_numbers = #tpu.dot_dimension_numbers<[1], [0], [0], [1], [0, 0, 1, 1], [], []>} : vector<2x32xf32>, vector<32x32xf32>, vector<2x32xf32> -> vector<2x32xf32>
    %565 = vector.broadcast %243 : vector<1x32xf32> to vector<2x32xf32>
    %566 = arith.addf %564, %565 : vector<2x32xf32>
    %cst_239 = arith.constant dense<0.000000e+00> : vector<2x32xf32>
    %567 = tpu.matmul %532, %223, %cst_239 {dimension_numbers = #tpu.dot_dimension_numbers<[1], [0], [0], [1], [0, 0, 1, 1], [], []>} : vector<2x32xf32>, vector<32x32xf32>, vector<2x32xf32> -> vector<2x32xf32>
    %cst_240 = arith.constant dense<0.000000e+00> : vector<2x32xf32>
    %568 = tpu.matmul %532, %227, %cst_240 {dimension_numbers = #tpu.dot_dimension_numbers<[1], [0], [0], [1], [0, 0, 1, 1], [], []>} : vector<2x32xf32>, vector<32x32xf32>, vector<2x32xf32> -> vector<2x32xf32>
    %cst_241 = arith.constant dense<0.000000e+00> : vector<2x32xf32>
    %569 = tpu.matmul %532, %231, %cst_241 {dimension_numbers = #tpu.dot_dimension_numbers<[1], [0], [0], [1], [0, 0, 1, 1], [], []>} : vector<2x32xf32>, vector<32x32xf32>, vector<2x32xf32> -> vector<2x32xf32>
    %570 = vector.broadcast %247 : vector<1x32xf32> to vector<2x32xf32>
    %571 = arith.addf %569, %570 : vector<2x32xf32>
    %572 = arith.addf %560, %567 : vector<2x32xf32>
    %573 = arith.negf %572 : vector<2x32xf32>
    %574 = math.exp %573 : vector<2x32xf32>
    %cst_242 = arith.constant 1.000000e+00 : f32
    %575 = vector.broadcast %cst_242 : f32 to vector<2x32xf32>
    %576 = arith.addf %575, %574 : vector<2x32xf32>
    %577 = arith.divf %575, %576 : vector<2x32xf32>
    %578 = arith.addf %563, %568 : vector<2x32xf32>
    %579 = arith.negf %578 : vector<2x32xf32>
    %580 = math.exp %579 : vector<2x32xf32>
    %cst_243 = arith.constant 1.000000e+00 : f32
    %581 = vector.broadcast %cst_243 : f32 to vector<2x32xf32>
    %582 = arith.addf %581, %580 : vector<2x32xf32>
    %583 = arith.divf %581, %582 : vector<2x32xf32>
    %584 = arith.mulf %577, %571 : vector<2x32xf32>
    %585 = arith.addf %566, %584 : vector<2x32xf32>
    %586 = math.tanh %585 : vector<2x32xf32>
    %cst_244 = arith.constant 1.000000e+00 : f32
    %587 = vector.broadcast %cst_244 : f32 to vector<2x32xf32>
    %588 = arith.subf %587, %583 : vector<2x32xf32>
    %589 = arith.mulf %588, %586 : vector<2x32xf32>
    %590 = arith.mulf %583, %532 : vector<2x32xf32>
    %591 = arith.addf %589, %590 : vector<2x32xf32>
    %cst_245 = arith.constant dense<0.000000e+00> : vector<2x32xf32>
    %592 = tpu.matmul %557, %221, %cst_245 {dimension_numbers = #tpu.dot_dimension_numbers<[1], [0], [0], [1], [0, 0, 1, 1], [], []>} : vector<2x32xf32>, vector<32x32xf32>, vector<2x32xf32> -> vector<2x32xf32>
    %cst_246 = arith.constant dense<0.000000e+00> : vector<2x32xf32>
    %593 = tpu.matmul %557, %225, %cst_246 {dimension_numbers = #tpu.dot_dimension_numbers<[1], [0], [0], [1], [0, 0, 1, 1], [], []>} : vector<2x32xf32>, vector<32x32xf32>, vector<2x32xf32> -> vector<2x32xf32>
    %cst_247 = arith.constant dense<0.000000e+00> : vector<2x32xf32>
    %594 = tpu.matmul %557, %229, %cst_247 {dimension_numbers = #tpu.dot_dimension_numbers<[1], [0], [0], [1], [0, 0, 1, 1], [], []>} : vector<2x32xf32>, vector<32x32xf32>, vector<2x32xf32> -> vector<2x32xf32>
    %595 = vector.broadcast %245 : vector<1x32xf32> to vector<2x32xf32>
    %596 = arith.addf %594, %595 : vector<2x32xf32>
    %597 = arith.addf %304, %592 : vector<2x32xf32>
    %598 = arith.negf %597 : vector<2x32xf32>
    %599 = math.exp %598 : vector<2x32xf32>
    %cst_248 = arith.constant 1.000000e+00 : f32
    %600 = vector.broadcast %cst_248 : f32 to vector<2x32xf32>
    %601 = arith.addf %600, %599 : vector<2x32xf32>
    %602 = arith.divf %600, %601 : vector<2x32xf32>
    %603 = arith.addf %307, %593 : vector<2x32xf32>
    %604 = arith.negf %603 : vector<2x32xf32>
    %605 = math.exp %604 : vector<2x32xf32>
    %cst_249 = arith.constant 1.000000e+00 : f32
    %606 = vector.broadcast %cst_249 : f32 to vector<2x32xf32>
    %607 = arith.addf %606, %605 : vector<2x32xf32>
    %608 = arith.divf %606, %607 : vector<2x32xf32>
    %609 = arith.mulf %602, %596 : vector<2x32xf32>
    %610 = arith.addf %310, %609 : vector<2x32xf32>
    %611 = math.tanh %610 : vector<2x32xf32>
    %cst_250 = arith.constant 1.000000e+00 : f32
    %612 = vector.broadcast %cst_250 : f32 to vector<2x32xf32>
    %613 = arith.subf %612, %608 : vector<2x32xf32>
    %614 = arith.mulf %613, %611 : vector<2x32xf32>
    %615 = arith.mulf %608, %557 : vector<2x32xf32>
    %616 = arith.addf %614, %615 : vector<2x32xf32>
    %cst_251 = arith.constant dense<0.000000e+00> : vector<2x32xf32>
    %617 = tpu.matmul %557, %211, %cst_251 {dimension_numbers = #tpu.dot_dimension_numbers<[1], [0], [0], [1], [0, 0, 1, 1], [], []>} : vector<2x32xf32>, vector<32x32xf32>, vector<2x32xf32> -> vector<2x32xf32>
    %618 = vector.broadcast %235 : vector<1x32xf32> to vector<2x32xf32>
    %619 = arith.addf %617, %618 : vector<2x32xf32>
    %cst_252 = arith.constant dense<0.000000e+00> : vector<2x32xf32>
    %620 = tpu.matmul %557, %215, %cst_252 {dimension_numbers = #tpu.dot_dimension_numbers<[1], [0], [0], [1], [0, 0, 1, 1], [], []>} : vector<2x32xf32>, vector<32x32xf32>, vector<2x32xf32> -> vector<2x32xf32>
    %621 = vector.broadcast %239 : vector<1x32xf32> to vector<2x32xf32>
    %622 = arith.addf %620, %621 : vector<2x32xf32>
    %cst_253 = arith.constant dense<0.000000e+00> : vector<2x32xf32>
    %623 = tpu.matmul %557, %219, %cst_253 {dimension_numbers = #tpu.dot_dimension_numbers<[1], [0], [0], [1], [0, 0, 1, 1], [], []>} : vector<2x32xf32>, vector<32x32xf32>, vector<2x32xf32> -> vector<2x32xf32>
    %624 = vector.broadcast %243 : vector<1x32xf32> to vector<2x32xf32>
    %625 = arith.addf %623, %624 : vector<2x32xf32>
    %cst_254 = arith.constant dense<0.000000e+00> : vector<2x32xf32>
    %626 = tpu.matmul %591, %223, %cst_254 {dimension_numbers = #tpu.dot_dimension_numbers<[1], [0], [0], [1], [0, 0, 1, 1], [], []>} : vector<2x32xf32>, vector<32x32xf32>, vector<2x32xf32> -> vector<2x32xf32>
    %cst_255 = arith.constant dense<0.000000e+00> : vector<2x32xf32>
    %627 = tpu.matmul %591, %227, %cst_255 {dimension_numbers = #tpu.dot_dimension_numbers<[1], [0], [0], [1], [0, 0, 1, 1], [], []>} : vector<2x32xf32>, vector<32x32xf32>, vector<2x32xf32> -> vector<2x32xf32>
    %cst_256 = arith.constant dense<0.000000e+00> : vector<2x32xf32>
    %628 = tpu.matmul %591, %231, %cst_256 {dimension_numbers = #tpu.dot_dimension_numbers<[1], [0], [0], [1], [0, 0, 1, 1], [], []>} : vector<2x32xf32>, vector<32x32xf32>, vector<2x32xf32> -> vector<2x32xf32>
    %629 = vector.broadcast %247 : vector<1x32xf32> to vector<2x32xf32>
    %630 = arith.addf %628, %629 : vector<2x32xf32>
    %631 = arith.addf %619, %626 : vector<2x32xf32>
    %632 = arith.negf %631 : vector<2x32xf32>
    %633 = math.exp %632 : vector<2x32xf32>
    %cst_257 = arith.constant 1.000000e+00 : f32
    %634 = vector.broadcast %cst_257 : f32 to vector<2x32xf32>
    %635 = arith.addf %634, %633 : vector<2x32xf32>
    %636 = arith.divf %634, %635 : vector<2x32xf32>
    %637 = arith.addf %622, %627 : vector<2x32xf32>
    %638 = arith.negf %637 : vector<2x32xf32>
    %639 = math.exp %638 : vector<2x32xf32>
    %cst_258 = arith.constant 1.000000e+00 : f32
    %640 = vector.broadcast %cst_258 : f32 to vector<2x32xf32>
    %641 = arith.addf %640, %639 : vector<2x32xf32>
    %642 = arith.divf %640, %641 : vector<2x32xf32>
    %643 = arith.mulf %636, %630 : vector<2x32xf32>
    %644 = arith.addf %625, %643 : vector<2x32xf32>
    %645 = math.tanh %644 : vector<2x32xf32>
    %cst_259 = arith.constant 1.000000e+00 : f32
    %646 = vector.broadcast %cst_259 : f32 to vector<2x32xf32>
    %647 = arith.subf %646, %642 : vector<2x32xf32>
    %648 = arith.mulf %647, %645 : vector<2x32xf32>
    %649 = arith.mulf %642, %591 : vector<2x32xf32>
    %650 = arith.addf %648, %649 : vector<2x32xf32>
    %cst_260 = arith.constant dense<0.000000e+00> : vector<2x32xf32>
    %651 = tpu.matmul %616, %221, %cst_260 {dimension_numbers = #tpu.dot_dimension_numbers<[1], [0], [0], [1], [0, 0, 1, 1], [], []>} : vector<2x32xf32>, vector<32x32xf32>, vector<2x32xf32> -> vector<2x32xf32>
    %cst_261 = arith.constant dense<0.000000e+00> : vector<2x32xf32>
    %652 = tpu.matmul %616, %225, %cst_261 {dimension_numbers = #tpu.dot_dimension_numbers<[1], [0], [0], [1], [0, 0, 1, 1], [], []>} : vector<2x32xf32>, vector<32x32xf32>, vector<2x32xf32> -> vector<2x32xf32>
    %cst_262 = arith.constant dense<0.000000e+00> : vector<2x32xf32>
    %653 = tpu.matmul %616, %229, %cst_262 {dimension_numbers = #tpu.dot_dimension_numbers<[1], [0], [0], [1], [0, 0, 1, 1], [], []>} : vector<2x32xf32>, vector<32x32xf32>, vector<2x32xf32> -> vector<2x32xf32>
    %654 = vector.broadcast %245 : vector<1x32xf32> to vector<2x32xf32>
    %655 = arith.addf %653, %654 : vector<2x32xf32>
    %656 = arith.addf %313, %651 : vector<2x32xf32>
    %657 = arith.negf %656 : vector<2x32xf32>
    %658 = math.exp %657 : vector<2x32xf32>
    %cst_263 = arith.constant 1.000000e+00 : f32
    %659 = vector.broadcast %cst_263 : f32 to vector<2x32xf32>
    %660 = arith.addf %659, %658 : vector<2x32xf32>
    %661 = arith.divf %659, %660 : vector<2x32xf32>
    %662 = arith.addf %316, %652 : vector<2x32xf32>
    %663 = arith.negf %662 : vector<2x32xf32>
    %664 = math.exp %663 : vector<2x32xf32>
    %cst_264 = arith.constant 1.000000e+00 : f32
    %665 = vector.broadcast %cst_264 : f32 to vector<2x32xf32>
    %666 = arith.addf %665, %664 : vector<2x32xf32>
    %667 = arith.divf %665, %666 : vector<2x32xf32>
    %668 = arith.mulf %661, %655 : vector<2x32xf32>
    %669 = arith.addf %319, %668 : vector<2x32xf32>
    %670 = math.tanh %669 : vector<2x32xf32>
    %cst_265 = arith.constant 1.000000e+00 : f32
    %671 = vector.broadcast %cst_265 : f32 to vector<2x32xf32>
    %672 = arith.subf %671, %667 : vector<2x32xf32>
    %673 = arith.mulf %672, %670 : vector<2x32xf32>
    %674 = arith.mulf %667, %616 : vector<2x32xf32>
    %675 = arith.addf %673, %674 : vector<2x32xf32>
    %cst_266 = arith.constant dense<0.000000e+00> : vector<2x32xf32>
    %676 = tpu.matmul %616, %211, %cst_266 {dimension_numbers = #tpu.dot_dimension_numbers<[1], [0], [0], [1], [0, 0, 1, 1], [], []>} : vector<2x32xf32>, vector<32x32xf32>, vector<2x32xf32> -> vector<2x32xf32>
    %677 = vector.broadcast %235 : vector<1x32xf32> to vector<2x32xf32>
    %678 = arith.addf %676, %677 : vector<2x32xf32>
    %cst_267 = arith.constant dense<0.000000e+00> : vector<2x32xf32>
    %679 = tpu.matmul %616, %215, %cst_267 {dimension_numbers = #tpu.dot_dimension_numbers<[1], [0], [0], [1], [0, 0, 1, 1], [], []>} : vector<2x32xf32>, vector<32x32xf32>, vector<2x32xf32> -> vector<2x32xf32>
    %680 = vector.broadcast %239 : vector<1x32xf32> to vector<2x32xf32>
    %681 = arith.addf %679, %680 : vector<2x32xf32>
    %cst_268 = arith.constant dense<0.000000e+00> : vector<2x32xf32>
    %682 = tpu.matmul %616, %219, %cst_268 {dimension_numbers = #tpu.dot_dimension_numbers<[1], [0], [0], [1], [0, 0, 1, 1], [], []>} : vector<2x32xf32>, vector<32x32xf32>, vector<2x32xf32> -> vector<2x32xf32>
    %683 = vector.broadcast %243 : vector<1x32xf32> to vector<2x32xf32>
    %684 = arith.addf %682, %683 : vector<2x32xf32>
    %cst_269 = arith.constant dense<0.000000e+00> : vector<2x32xf32>
    %685 = tpu.matmul %650, %223, %cst_269 {dimension_numbers = #tpu.dot_dimension_numbers<[1], [0], [0], [1], [0, 0, 1, 1], [], []>} : vector<2x32xf32>, vector<32x32xf32>, vector<2x32xf32> -> vector<2x32xf32>
    %cst_270 = arith.constant dense<0.000000e+00> : vector<2x32xf32>
    %686 = tpu.matmul %650, %227, %cst_270 {dimension_numbers = #tpu.dot_dimension_numbers<[1], [0], [0], [1], [0, 0, 1, 1], [], []>} : vector<2x32xf32>, vector<32x32xf32>, vector<2x32xf32> -> vector<2x32xf32>
    %cst_271 = arith.constant dense<0.000000e+00> : vector<2x32xf32>
    %687 = tpu.matmul %650, %231, %cst_271 {dimension_numbers = #tpu.dot_dimension_numbers<[1], [0], [0], [1], [0, 0, 1, 1], [], []>} : vector<2x32xf32>, vector<32x32xf32>, vector<2x32xf32> -> vector<2x32xf32>
    %688 = vector.broadcast %247 : vector<1x32xf32> to vector<2x32xf32>
    %689 = arith.addf %687, %688 : vector<2x32xf32>
    %690 = arith.addf %678, %685 : vector<2x32xf32>
    %691 = arith.negf %690 : vector<2x32xf32>
    %692 = math.exp %691 : vector<2x32xf32>
    %cst_272 = arith.constant 1.000000e+00 : f32
    %693 = vector.broadcast %cst_272 : f32 to vector<2x32xf32>
    %694 = arith.addf %693, %692 : vector<2x32xf32>
    %695 = arith.divf %693, %694 : vector<2x32xf32>
    %696 = arith.addf %681, %686 : vector<2x32xf32>
    %697 = arith.negf %696 : vector<2x32xf32>
    %698 = math.exp %697 : vector<2x32xf32>
    %cst_273 = arith.constant 1.000000e+00 : f32
    %699 = vector.broadcast %cst_273 : f32 to vector<2x32xf32>
    %700 = arith.addf %699, %698 : vector<2x32xf32>
    %701 = arith.divf %699, %700 : vector<2x32xf32>
    %702 = arith.mulf %695, %689 : vector<2x32xf32>
    %703 = arith.addf %684, %702 : vector<2x32xf32>
    %704 = math.tanh %703 : vector<2x32xf32>
    %cst_274 = arith.constant 1.000000e+00 : f32
    %705 = vector.broadcast %cst_274 : f32 to vector<2x32xf32>
    %706 = arith.subf %705, %701 : vector<2x32xf32>
    %707 = arith.mulf %706, %704 : vector<2x32xf32>
    %708 = arith.mulf %701, %650 : vector<2x32xf32>
    %709 = arith.addf %707, %708 : vector<2x32xf32>
    %cst_275 = arith.constant dense<0.000000e+00> : vector<2x32xf32>
    %710 = tpu.matmul %675, %221, %cst_275 {dimension_numbers = #tpu.dot_dimension_numbers<[1], [0], [0], [1], [0, 0, 1, 1], [], []>} : vector<2x32xf32>, vector<32x32xf32>, vector<2x32xf32> -> vector<2x32xf32>
    %cst_276 = arith.constant dense<0.000000e+00> : vector<2x32xf32>
    %711 = tpu.matmul %675, %225, %cst_276 {dimension_numbers = #tpu.dot_dimension_numbers<[1], [0], [0], [1], [0, 0, 1, 1], [], []>} : vector<2x32xf32>, vector<32x32xf32>, vector<2x32xf32> -> vector<2x32xf32>
    %cst_277 = arith.constant dense<0.000000e+00> : vector<2x32xf32>
    %712 = tpu.matmul %675, %229, %cst_277 {dimension_numbers = #tpu.dot_dimension_numbers<[1], [0], [0], [1], [0, 0, 1, 1], [], []>} : vector<2x32xf32>, vector<32x32xf32>, vector<2x32xf32> -> vector<2x32xf32>
    %713 = vector.broadcast %245 : vector<1x32xf32> to vector<2x32xf32>
    %714 = arith.addf %712, %713 : vector<2x32xf32>
    %715 = arith.addf %322, %710 : vector<2x32xf32>
    %716 = arith.negf %715 : vector<2x32xf32>
    %717 = math.exp %716 : vector<2x32xf32>
    %cst_278 = arith.constant 1.000000e+00 : f32
    %718 = vector.broadcast %cst_278 : f32 to vector<2x32xf32>
    %719 = arith.addf %718, %717 : vector<2x32xf32>
    %720 = arith.divf %718, %719 : vector<2x32xf32>
    %721 = arith.addf %325, %711 : vector<2x32xf32>
    %722 = arith.negf %721 : vector<2x32xf32>
    %723 = math.exp %722 : vector<2x32xf32>
    %cst_279 = arith.constant 1.000000e+00 : f32
    %724 = vector.broadcast %cst_279 : f32 to vector<2x32xf32>
    %725 = arith.addf %724, %723 : vector<2x32xf32>
    %726 = arith.divf %724, %725 : vector<2x32xf32>
    %727 = arith.mulf %720, %714 : vector<2x32xf32>
    %728 = arith.addf %328, %727 : vector<2x32xf32>
    %729 = math.tanh %728 : vector<2x32xf32>
    %cst_280 = arith.constant 1.000000e+00 : f32
    %730 = vector.broadcast %cst_280 : f32 to vector<2x32xf32>
    %731 = arith.subf %730, %726 : vector<2x32xf32>
    %732 = arith.mulf %731, %729 : vector<2x32xf32>
    %733 = arith.mulf %726, %675 : vector<2x32xf32>
    %734 = arith.addf %732, %733 : vector<2x32xf32>
    %cst_281 = arith.constant dense<0.000000e+00> : vector<2x32xf32>
    %735 = tpu.matmul %675, %211, %cst_281 {dimension_numbers = #tpu.dot_dimension_numbers<[1], [0], [0], [1], [0, 0, 1, 1], [], []>} : vector<2x32xf32>, vector<32x32xf32>, vector<2x32xf32> -> vector<2x32xf32>
    %736 = vector.broadcast %235 : vector<1x32xf32> to vector<2x32xf32>
    %737 = arith.addf %735, %736 : vector<2x32xf32>
    %cst_282 = arith.constant dense<0.000000e+00> : vector<2x32xf32>
    %738 = tpu.matmul %675, %215, %cst_282 {dimension_numbers = #tpu.dot_dimension_numbers<[1], [0], [0], [1], [0, 0, 1, 1], [], []>} : vector<2x32xf32>, vector<32x32xf32>, vector<2x32xf32> -> vector<2x32xf32>
    %739 = vector.broadcast %239 : vector<1x32xf32> to vector<2x32xf32>
    %740 = arith.addf %738, %739 : vector<2x32xf32>
    %cst_283 = arith.constant dense<0.000000e+00> : vector<2x32xf32>
    %741 = tpu.matmul %675, %219, %cst_283 {dimension_numbers = #tpu.dot_dimension_numbers<[1], [0], [0], [1], [0, 0, 1, 1], [], []>} : vector<2x32xf32>, vector<32x32xf32>, vector<2x32xf32> -> vector<2x32xf32>
    %742 = vector.broadcast %243 : vector<1x32xf32> to vector<2x32xf32>
    %743 = arith.addf %741, %742 : vector<2x32xf32>
    %cst_284 = arith.constant dense<0.000000e+00> : vector<2x32xf32>
    %744 = tpu.matmul %709, %223, %cst_284 {dimension_numbers = #tpu.dot_dimension_numbers<[1], [0], [0], [1], [0, 0, 1, 1], [], []>} : vector<2x32xf32>, vector<32x32xf32>, vector<2x32xf32> -> vector<2x32xf32>
    %cst_285 = arith.constant dense<0.000000e+00> : vector<2x32xf32>
    %745 = tpu.matmul %709, %227, %cst_285 {dimension_numbers = #tpu.dot_dimension_numbers<[1], [0], [0], [1], [0, 0, 1, 1], [], []>} : vector<2x32xf32>, vector<32x32xf32>, vector<2x32xf32> -> vector<2x32xf32>
    %cst_286 = arith.constant dense<0.000000e+00> : vector<2x32xf32>
    %746 = tpu.matmul %709, %231, %cst_286 {dimension_numbers = #tpu.dot_dimension_numbers<[1], [0], [0], [1], [0, 0, 1, 1], [], []>} : vector<2x32xf32>, vector<32x32xf32>, vector<2x32xf32> -> vector<2x32xf32>
    %747 = vector.broadcast %247 : vector<1x32xf32> to vector<2x32xf32>
    %748 = arith.addf %746, %747 : vector<2x32xf32>
    %749 = arith.addf %737, %744 : vector<2x32xf32>
    %750 = arith.negf %749 : vector<2x32xf32>
    %751 = math.exp %750 : vector<2x32xf32>
    %cst_287 = arith.constant 1.000000e+00 : f32
    %752 = vector.broadcast %cst_287 : f32 to vector<2x32xf32>
    %753 = arith.addf %752, %751 : vector<2x32xf32>
    %754 = arith.divf %752, %753 : vector<2x32xf32>
    %755 = arith.addf %740, %745 : vector<2x32xf32>
    %756 = arith.negf %755 : vector<2x32xf32>
    %757 = math.exp %756 : vector<2x32xf32>
    %cst_288 = arith.constant 1.000000e+00 : f32
    %758 = vector.broadcast %cst_288 : f32 to vector<2x32xf32>
    %759 = arith.addf %758, %757 : vector<2x32xf32>
    %760 = arith.divf %758, %759 : vector<2x32xf32>
    %761 = arith.mulf %754, %748 : vector<2x32xf32>
    %762 = arith.addf %743, %761 : vector<2x32xf32>
    %763 = math.tanh %762 : vector<2x32xf32>
    %cst_289 = arith.constant 1.000000e+00 : f32
    %764 = vector.broadcast %cst_289 : f32 to vector<2x32xf32>
    %765 = arith.subf %764, %760 : vector<2x32xf32>
    %766 = arith.mulf %765, %763 : vector<2x32xf32>
    %767 = arith.mulf %760, %709 : vector<2x32xf32>
    %768 = arith.addf %766, %767 : vector<2x32xf32>
    %cst_290 = arith.constant dense<0.000000e+00> : vector<2x32xf32>
    %769 = tpu.matmul %734, %211, %cst_290 {dimension_numbers = #tpu.dot_dimension_numbers<[1], [0], [0], [1], [0, 0, 1, 1], [], []>} : vector<2x32xf32>, vector<32x32xf32>, vector<2x32xf32> -> vector<2x32xf32>
    %770 = vector.broadcast %235 : vector<1x32xf32> to vector<2x32xf32>
    %771 = arith.addf %769, %770 : vector<2x32xf32>
    %cst_291 = arith.constant dense<0.000000e+00> : vector<2x32xf32>
    %772 = tpu.matmul %734, %215, %cst_291 {dimension_numbers = #tpu.dot_dimension_numbers<[1], [0], [0], [1], [0, 0, 1, 1], [], []>} : vector<2x32xf32>, vector<32x32xf32>, vector<2x32xf32> -> vector<2x32xf32>
    %773 = vector.broadcast %239 : vector<1x32xf32> to vector<2x32xf32>
    %774 = arith.addf %772, %773 : vector<2x32xf32>
    %cst_292 = arith.constant dense<0.000000e+00> : vector<2x32xf32>
    %775 = tpu.matmul %734, %219, %cst_292 {dimension_numbers = #tpu.dot_dimension_numbers<[1], [0], [0], [1], [0, 0, 1, 1], [], []>} : vector<2x32xf32>, vector<32x32xf32>, vector<2x32xf32> -> vector<2x32xf32>
    %776 = vector.broadcast %243 : vector<1x32xf32> to vector<2x32xf32>
    %777 = arith.addf %775, %776 : vector<2x32xf32>
    %cst_293 = arith.constant dense<0.000000e+00> : vector<2x32xf32>
    %778 = tpu.matmul %768, %223, %cst_293 {dimension_numbers = #tpu.dot_dimension_numbers<[1], [0], [0], [1], [0, 0, 1, 1], [], []>} : vector<2x32xf32>, vector<32x32xf32>, vector<2x32xf32> -> vector<2x32xf32>
    %cst_294 = arith.constant dense<0.000000e+00> : vector<2x32xf32>
    %779 = tpu.matmul %768, %227, %cst_294 {dimension_numbers = #tpu.dot_dimension_numbers<[1], [0], [0], [1], [0, 0, 1, 1], [], []>} : vector<2x32xf32>, vector<32x32xf32>, vector<2x32xf32> -> vector<2x32xf32>
    %cst_295 = arith.constant dense<0.000000e+00> : vector<2x32xf32>
    %780 = tpu.matmul %768, %231, %cst_295 {dimension_numbers = #tpu.dot_dimension_numbers<[1], [0], [0], [1], [0, 0, 1, 1], [], []>} : vector<2x32xf32>, vector<32x32xf32>, vector<2x32xf32> -> vector<2x32xf32>
    %781 = vector.broadcast %247 : vector<1x32xf32> to vector<2x32xf32>
    %782 = arith.addf %780, %781 : vector<2x32xf32>
    %783 = arith.addf %771, %778 : vector<2x32xf32>
    %784 = arith.negf %783 : vector<2x32xf32>
    %785 = math.exp %784 : vector<2x32xf32>
    %cst_296 = arith.constant 1.000000e+00 : f32
    %786 = vector.broadcast %cst_296 : f32 to vector<2x32xf32>
    %787 = arith.addf %786, %785 : vector<2x32xf32>
    %788 = arith.divf %786, %787 : vector<2x32xf32>
    %789 = arith.addf %774, %779 : vector<2x32xf32>
    %790 = arith.negf %789 : vector<2x32xf32>
    %791 = math.exp %790 : vector<2x32xf32>
    %cst_297 = arith.constant 1.000000e+00 : f32
    %792 = vector.broadcast %cst_297 : f32 to vector<2x32xf32>
    %793 = arith.addf %792, %791 : vector<2x32xf32>
    %794 = arith.divf %792, %793 : vector<2x32xf32>
    %795 = arith.mulf %788, %782 : vector<2x32xf32>
    %796 = arith.addf %777, %795 : vector<2x32xf32>
    %797 = math.tanh %796 : vector<2x32xf32>
    %cst_298 = arith.constant 1.000000e+00 : f32
    %798 = vector.broadcast %cst_298 : f32 to vector<2x32xf32>
    %799 = arith.subf %798, %794 : vector<2x32xf32>
    %800 = arith.mulf %799, %797 : vector<2x32xf32>
    %801 = arith.mulf %794, %768 : vector<2x32xf32>
    %802 = arith.addf %800, %801 : vector<2x32xf32>
    %c0_299 = arith.constant 0 : index
    %c0_300 = arith.constant 0 : index
    %803 = vector.load %arg27[%c0_299, %c0_300] : memref<32x4xf32, #tpu.memory_space<vmem>>, vector<32x4xf32>
    %cst_301 = arith.constant dense<0.000000e+00> : vector<2x4xf32>
    %804 = tpu.matmul %802, %803, %cst_301 {dimension_numbers = #tpu.dot_dimension_numbers<[1], [0], [0], [1], [0, 0, 1, 1], [], []>} : vector<2x32xf32>, vector<32x4xf32>, vector<2x4xf32> -> vector<2x4xf32>
    %c0_302 = arith.constant 0 : index
    %c0_303 = arith.constant 0 : index
    %805 = vector.load %arg28[%c0_302, %c0_303] : memref<1x4xf32, #tpu.memory_space<vmem>>, vector<1x4xf32>
    %806 = vector.broadcast %805 : vector<1x4xf32> to vector<2x4xf32>
    %807 = arith.addf %804, %806 : vector<2x4xf32>
    %c0_304 = arith.constant 0 : index
    %c0_305 = arith.constant 0 : index
    %808 = vector.load %arg29[%c0_304, %c0_305] : memref<2x4xf32, #tpu.memory_space<vmem>>, vector<2x4xf32>
    tpu.vector_store %arg29[%c0_304, %c0_305], %807 {strides = array<i32>} : memref<2x4xf32, #tpu.memory_space<vmem>>, vector<2x4xf32>,
    return
  }
}

</mosaic_0001>

<bundles_post_ra>
// kernel: tpu_custom_call.1
= control target key start
LH: loop header
LB: loop body
LE: loop exit
PB: predicated region body
PF: predicated region fallthrough
CT: control target
= control target key end

     0   :  { %s10847_s6 = smov 1   ;;  %s10848_s10 = smov 2   ;;  %s12171_s0 = inlined_call_operand.smem [shape: u32[30], index: -1, kind: input, shape index: {}] }
   0x1   :  { %s10905_s5 = sld [smem:[%s12171_s0]]   ;;  %s10849_s14 = smov 3  }
   0x2   :  { %s10910_s9 = sld [smem:[%s12171_s0 + %s10847_s6]]   ;;  %s10850_s18 = smov 4  }
   0x3   :  { %s10915_s13 = sld [smem:[%s12171_s0 + %s10848_s10]]   ;;  %s10851_s22 = smov 5  }
   0x4   :  { %s10920_s17 = sld [smem:[%s12171_s0 + %s10849_s14]]   ;;  %s10852_s26 = smov 6  }
   0x5   :  { %s10925_s21 = sld [smem:[%s12171_s0 + %s10850_s18]]   ;;  %s10853_s30 = smov 7  }
   0x6   :  { %s10930_s25 = sld [smem:[%s12171_s0 + %s10851_s22]]   ;;  %s10854_s4 = smov 8  }
   0x7   :  { %s10935_s29 = sld [smem:[%s12171_s0 + %s10852_s26]]   ;;  %s10855_s10 = smov 9  }
   0x8   :  { %s10940_s3 = sld [smem:[%s12171_s0 + %s10853_s30]]   ;;  %s10856_s15 = smov 10  }
   0x9   :  { %s10945_s8 = sld [smem:[%s12171_s0 + %s10854_s4]]   ;;  %s10857_s20 = smov 11  }
   0xa   :  { %s10950_s14 = sld [smem:[%s12171_s0 + %s10855_s10]]   ;;  %s10858_s26 = smov 12  }
   0xb   :  { %s10955_s19 = sld [smem:[%s12171_s0 + %s10856_s15]]   ;;  %s10859_s1 = smov 13  }
   0xc   :  { %s10960_s24 = sld [smem:[%s12171_s0 + %s10857_s20]]   ;;  %s10860_s7 = smov 14  }
   0xd   :  { %s10965_s30 = sld [smem:[%s12171_s0 + %s10858_s26]]   ;;  %s10861_s15 = smov 15  }
   0xe   :  { %12184 = sst [smem:[#allocation32_spill]] %s10940_s3  ;;  %s10862_s22 = smov 16  }
   0xf   :  { %12185 = sst [smem:[#allocation33_spill]] %s10945_s8  ;;  %s10863_s28 = smov 17  }
  0x10   :  { %s10970_s6 = sld [smem:[%s12171_s0 + %s10859_s1]]  }
  0x11   :  { %12186 = sst [smem:[#allocation34_spill]] %s10955_s19 }
  0x12   :  { %12187 = sst [smem:[#allocation35_spill]] %s10960_s24 }
  0x13   :  { %12188 = sst [smem:[#allocation36_spill]] %s10965_s30 }
  0x14   :  { %s10975_s12 = sld [smem:[%s12171_s0 + %s10860_s7]]   ;;  %s10864_s7 = smov 18  }
  0x15   :  { %s10980_s20 = sld [smem:[%s12171_s0 + %s10861_s15]]   ;;  %s10865_s15 = smov 19  }
  0x16   :  { %12189 = sst [smem:[#allocation37_spill]] %s10970_s6 }
  0x17   :  { %s10985_s27 = sld [smem:[%s12171_s0 + %s10862_s22]]   ;;  %s10866_s22 = smov 20  }
  0x18   :  { %s10990_s4 = sld [smem:[%s12171_s0 + %s10863_s28]]   ;;  %s10867_s28 = smov 21  }
  0x19   :  { %s11010_s30 = sld [smem:[%s12171_s0 + %s10867_s28]]   ;;  %s10871_s28 = smov 25  }
  0x1a   :  { %12190 = sst [smem:[#allocation38_spill]] %s10975_s12 }
  0x1b   :  { %12191 = sst [smem:[#allocation39_spill]] %s10980_s20 }
  0x1c   :  { %s10995_s12 = sld [smem:[%s12171_s0 + %s10864_s7]]   ;;  %s10868_s7 = smov 22  }
  0x1d   :  { %12192 = sst [smem:[#allocation40_spill]] %s10985_s27 }
  0x1e   :  { %s11000_s20 = sld [smem:[%s12171_s0 + %s10865_s15]]   ;;  %s10869_s15 = smov 23  }
  0x1f   :  { %s11005_s27 = sld [smem:[%s12171_s0 + %s10866_s22]]   ;;  %s10870_s22 = smov 24  }
  0x20   :  { %s11015_s6 = sld [smem:[%s12171_s0 + %s10868_s7]]   ;;  %s10872_s7 = smov 26  }
  0x21   :  { %s11020_s24 = sld [smem:[%s12171_s0 + %s10869_s15]]   ;;  %s10873_s15 = smov 27  }
  0x22   :  { %s11025_s19 = sld [smem:[%s12171_s0 + %s10870_s22]]   ;;  %s10874_s22 = smov 28  }
  0x23   :  { %s11030_s8 = sld [smem:[%s12171_s0 + %s10871_s28]]   ;;  %s10875_s28 = smov 29  }
  0x24   :  { %s11035_s3 = sld [smem:[%s12171_s0 + %s10872_s7]]  }
  0x27   :  { %12193 = sst [smem:[#allocation41_spill]] %s11020_s24 }
  0x28   :  { %12194 = sst [smem:[#allocation42_spill]] %s11025_s19 }
  0x29   :  { %12195 = sst [smem:[#allocation43_spill]] %s11030_s8 }
  0x2a   :  { %s11040_s24 = sld [smem:[%s12171_s0 + %s10873_s15]]  }
  0x2b   :  { %s11045_s19 = sld [smem:[%s12171_s0 + %s10874_s22]]  }
  0x2c   :  { %s11050_s8 = sld [smem:[%s12171_s0 + %s10875_s28]]  }
  0x2d   :  { %64 = vsyncpa [#allocation3], 0 }
  0x2e   :  { %65 = vsyncpa [#allocation6], 0 }
  0x2f   :  { %66 = vsyncpa [#allocation9], 0 }
  0x30   :  { %67 = vsyncpa [#allocation12], 0 }
  0x31   :  { %68 = vsyncpa [#allocation15], 0 }
  0x32   :  { %69 = vsyncpa [#allocation18], 0 }
  0x33   :  { %70 = vsyncpa [#allocation21], 0 }
  0x34   :  { %71 = vsyncpa [#allocation4], 0  ;;  %s10876_s7 = smov [#allocation5]   ;;  %s10877_s11 = smov [#allocation8]  }
  0x35   :  { %s90_s10 = sshll.u32 %s10876_s7, 4  ;;  %s110_s15 = sshll.u32 %s10877_s11, 4  ;;  %s91_s10 = int_to_ptr.vmem [resolvable:$true] %s90_s10  ;;  %s111_s15 = int_to_ptr.vmem [resolvable:$true] %s110_s15 }
  0x36   :  { %s10523_s16 = scalar_lea.hbm %s10915_s13, 16 }
  0x37   :  { %p10524_p0 = scmp.ne.s32.totalorder %s10915_s13, %s10523_s16  ;;  %p10527_p1 = scmp.lt.u32.totalorder %s10523_s16, %s10915_s13 }
  0x39   :  { %p10529_p2 = pnand %p10527_p1, %p10524_p0 }
  0x3b   :  { %10532 = shalt.err (!%p10529_p2)
}
  0x3c   :  { %s10533_s0 = scalar_lea.vmem %s91_s10, 16  ;;  %s10537_s18 = scalar_lea.vmem %s91_s10, 32 }
  0x3d   :  { %p10534_p3 = scmp.ne.s32.totalorder %s91_s10, %s10533_s0  ;;  %p10538_p4 = scmp.lt.s32.totalorder %s91_s10, %s91_s10 }
  0x3e   :  { %p10539_p5 = scmp.lt.s32.totalorder %s10537_s18, %s10533_s0 }
  0x40   :  { %p10540_p6 = por %p10539_p5, %p10538_p4 }
  0x42   :  { %p10541_p7 = pnand %p10540_p6, %p10534_p3 }
  0x44   :  { %10544 = shalt.err (!%p10541_p7)
}
  0x45   :  { %93 = dma.hbm_to_vmem [thread:$0]  %s10915_s13, 16, %s91_s10, [#allocation6]  }
  0x46   :  { %s10545_s22 = scalar_lea.hbm %s10925_s21, 128 }
  0x47   :  { %p10546_p8 = scmp.ne.s32.totalorder %s10925_s21, %s10545_s22  ;;  %p10549_p9 = scmp.lt.u32.totalorder %s10545_s22, %s10925_s21 }
  0x49   :  { %p10551_p10 = pnand %p10549_p9, %p10546_p8 }
  0x4b   :  { %10554 = shalt.err (!%p10551_p10)
}
  0x4c   :  { %s10555_s23 = scalar_lea.vmem %s111_s15, 128  ;;  %p10560_p12 = scmp.lt.s32.totalorder %s111_s15, %s111_s15 }
  0x4d   :  { %p10556_p11 = scmp.ne.s32.totalorder %s111_s15, %s10555_s23  ;;  %p10561_p13 = scmp.lt.s32.totalorder %s10555_s23, %s10555_s23 }
  0x4f   :  { %p10562_p0 = por %p10561_p13, %p10560_p12 }
  0x51   :  { %p10563_p1 = pnand %p10562_p0, %p10556_p11 }
  0x53   :  { %10566 = shalt.err (!%p10563_p1)
}
  0x54   :  { %113 = dma.hbm_to_vmem [thread:$0]  %s10925_s21, 128, %s111_s15, [#allocation9]  }
  0x55   :  { %s10878_s26 = smov [#allocation11]   ;;  %s10879_s13 = smov [#allocation14]  }
  0x56   :  { %s130_s28 = sshll.u32 %s10878_s26, 4  ;;  %s169_s1 = sshll.u32 %s10879_s13, 4  ;;  %s131_s28 = int_to_ptr.vmem [resolvable:$true] %s130_s28  ;;  %s11060_s1 = int_to_ptr.vmem [resolvable:$true] %s169_s1 }
  0x57   :  { %s10567_s2 = scalar_lea.hbm %s10935_s29, 128 }
  0x58   :  { %p10568_p2 = scmp.ne.s32.totalorder %s10935_s29, %s10567_s2  ;;  %p10571_p3 = scmp.lt.u32.totalorder %s10567_s2, %s10935_s29 }
  0x5a   :  { %p10573_p4 = pnand %p10571_p3, %p10568_p2 }
  0x5c   :  { %10576 = shalt.err (!%p10573_p4)
}
  0x5d   :  { %s10577_s7 = scalar_lea.vmem %s131_s28, 128  ;;  %p10582_p6 = scmp.lt.s32.totalorder %s131_s28, %s131_s28 }
  0x5e   :  { %p10578_p5 = scmp.ne.s32.totalorder %s131_s28, %s10577_s7  ;;  %p10583_p7 = scmp.lt.s32.totalorder %s10577_s7, %s10577_s7 }
  0x60   :  { %p10584_p8 = por %p10583_p7, %p10582_p6 }
  0x62   :  { %p10585_p9 = pnand %p10584_p8, %p10578_p5 }
  0x64   :  { %10588 = shalt.err (!%p10585_p9)
}
  0x65   :  { %133 = dma.hbm_to_vmem [thread:$0]  %s10935_s29, 128, %s131_s28, [#allocation12]  }
  0x66   :  { %s10589_s21 = scalar_lea.hbm %s10990_s4, 1024 }
  0x67   :  { %p10590_p10 = scmp.ne.s32.totalorder %s10990_s4, %s10589_s21  ;;  %p10593_p11 = scmp.lt.u32.totalorder %s10589_s21, %s10990_s4 }
  0x69   :  { %p10595_p12 = pnand %p10593_p11, %p10590_p10 }
  0x6b   :  { %10598 = shalt.err (!%p10595_p12)
}
  0x6c   :  { %s10599_s10 = scalar_lea.vmem %s11060_s1, 1024  ;;  %p10604_p0 = scmp.lt.s32.totalorder %s11060_s1, %s11060_s1 }
  0x6d   :  { %p10600_p13 = scmp.ne.s32.totalorder %s11060_s1, %s10599_s10  ;;  %p10605_p1 = scmp.lt.s32.totalorder %s10599_s10, %s10599_s10 }
  0x6f   :  { %p10606_p2 = por %p10605_p1, %p10604_p0 }
  0x71   :  { %p10607_p3 = pnand %p10606_p2, %p10600_p13 }
  0x73   :  { %10610 = shalt.err (!%p10607_p3)
}
  0x74   :  { %s10880_s11 = smov 128   ;;  %s10881_s29 = smov 8  }
  0x75   :  { %175 = dma.hbm_to_vmem [thread:$0]  %s10990_s4, 1024, %s11060_s1, [#allocation15], %s10880_s11, %s10880_s11, %s10881_s29  }
  0x76   :  { %s10882_s15 = smov [#allocation17]   ;;  %s10883_s0 = smov [#allocation20]  }
  0x77   :  { %s193_s16 = sshll.u32 %s10882_s15, 4  ;;  %s217_s18 = sshll.u32 %s10883_s0, 4  ;;  %s194_s16 = int_to_ptr.vmem [resolvable:$true] %s193_s16  ;;  %s11078_s18 = int_to_ptr.vmem [resolvable:$true] %s217_s18 }
  0x78   :  { %s10611_s22 = scalar_lea.hbm %s11000_s20, 1024 }
  0x79   :  { %p10612_p4 = scmp.ne.s32.totalorder %s11000_s20, %s10611_s22  ;;  %p10615_p5 = scmp.lt.u32.totalorder %s10611_s22, %s11000_s20 }
  0x7b   :  { %p10617_p6 = pnand %p10615_p5, %p10612_p4 }
  0x7d   :  { %10620 = shalt.err (!%p10617_p6)
}
  0x7e   :  { %s10621_s23 = scalar_lea.vmem %s194_s16, 1024  ;;  %p10626_p8 = scmp.lt.s32.totalorder %s194_s16, %s194_s16 }
  0x7f   :  { %p10622_p7 = scmp.ne.s32.totalorder %s194_s16, %s10621_s23  ;;  %p10627_p9 = scmp.lt.s32.totalorder %s10621_s23, %s10621_s23 }
  0x81   :  { %p10628_p10 = por %p10627_p9, %p10626_p8 }
  0x83   :  { %p10629_p11 = pnand %p10628_p10, %p10622_p7 }
  0x85   :  { %10632 = shalt.err (!%p10629_p11)
}
  0x86   :  { %199 = dma.hbm_to_vmem [thread:$0]  %s11000_s20, 1024, %s194_s16, [#allocation18], %s10880_s11, %s10880_s11, %s10881_s29  }
  0x87   :  { %s10633_s4 = scalar_lea.hbm %s11010_s30, 1024 }
  0x88   :  { %p10634_p12 = scmp.ne.s32.totalorder %s11010_s30, %s10633_s4  ;;  %p10637_p13 = scmp.lt.u32.totalorder %s10633_s4, %s11010_s30 }
  0x8a   :  { %p10639_p0 = pnand %p10637_p13, %p10634_p12 }
  0x8c   :  { %10642 = shalt.err (!%p10639_p0)
}
  0x8d   :  { %s10643_s26 = scalar_lea.vmem %s11078_s18, 1024  ;;  %p10648_p2 = scmp.lt.s32.totalorder %s11078_s18, %s11078_s18 }
  0x8e   :  { %p10644_p1 = scmp.ne.s32.totalorder %s11078_s18, %s10643_s26  ;;  %p10649_p3 = scmp.lt.s32.totalorder %s10643_s26, %s10643_s26 }
  0x90   :  { %p10650_p4 = por %p10649_p3, %p10648_p2 }
  0x92   :  { %p10651_p5 = pnand %p10650_p4, %p10644_p1 }
  0x94   :  { %10654 = shalt.err (!%p10651_p5)
}
  0x95   :  { %223 = dma.hbm_to_vmem [thread:$0]  %s11010_s30, 1024, %s11078_s18, [#allocation21], %s10880_s11, %s10880_s11, %s10881_s29  }
  0x96   :  { %s10884_s20 = smov [#allocation2]   ;;  %s10885_s13 = smov [#allocation7]  }
  0x97   :  { %s80_s28 = sshll.u32 %s10884_s20, 4  ;;  %s100_s1 = sshll.u32 %s10885_s13, 4  ;;  %s81_s28 = int_to_ptr.vmem [resolvable:$true] %s80_s28  ;;  %s101_s1 = int_to_ptr.vmem [resolvable:$true] %s100_s1 }
  0x98   :  { %s10655_s2 = scalar_lea.hbm %s10910_s9, 64 }
  0x99   :  { %p10656_p6 = scmp.ne.s32.totalorder %s10910_s9, %s10655_s2  ;;  %p10659_p7 = scmp.lt.u32.totalorder %s10655_s2, %s10910_s9 }
  0x9b   :  { %p10661_p8 = pnand %p10659_p7, %p10656_p6 }
  0x9d   :  { %10664 = shalt.err (!%p10661_p8)
}
  0x9e   :  { %s10665_s7 = scalar_lea.vmem %s81_s28, 64  ;;  %p10670_p10 = scmp.lt.s32.totalorder %s81_s28, %s81_s28 }
  0x9f   :  { %p10666_p9 = scmp.ne.s32.totalorder %s81_s28, %s10665_s7  ;;  %p10671_p11 = scmp.lt.s32.totalorder %s10665_s7, %s10665_s7 }
  0xa1   :  { %p10672_p12 = por %p10671_p11, %p10670_p10 }
  0xa3   :  { %p10673_p13 = pnand %p10672_p12, %p10666_p9 }
  0xa5   :  { %10676 = shalt.err (!%p10673_p13)
}
  0xa6   :  { %83 = dma.hbm_to_vmem [thread:$0]  %s10910_s9, 64, %s81_s28, [#allocation3]  }
  0xa7   :  { %s10677_s30 = scalar_lea.hbm %s10920_s17, 128 }
  0xa8   :  { %p10678_p0 = scmp.ne.s32.totalorder %s10920_s17, %s10677_s30  ;;  %p10681_p1 = scmp.lt.u32.totalorder %s10677_s30, %s10920_s17 }
  0xaa   :  { %p10683_p2 = pnand %p10681_p1, %p10678_p0 }
  0xac   :  { %10686 = shalt.err (!%p10683_p2)
}
  0xad   :  { %s10687_s21 = scalar_lea.vmem %s101_s1, 128  ;;  %p10692_p4 = scmp.lt.s32.totalorder %s101_s1, %s101_s1 }
  0xae   :  { %p10688_p3 = scmp.ne.s32.totalorder %s101_s1, %s10687_s21  ;;  %p10693_p5 = scmp.lt.s32.totalorder %s10687_s21, %s10687_s21 }
  0xb0   :  { %p10694_p6 = por %p10693_p5, %p10692_p4 }
  0xb2   :  { %p10695_p7 = pnand %p10694_p6, %p10688_p3 }
  0xb4   :  { %10698 = shalt.err (!%p10695_p7)
}
  0xb5   :  { %103 = dma.hbm_to_vmem [thread:$0]  %s10920_s17, 128, %s101_s1, [#allocation6]  }
  0xb6   :  { %s10886_s10 = smov [#allocation10]   ;;  %s10887_s9 = smov [#allocation13]  }
  0xb7   :  { %s120_s15 = sshll.u32 %s10886_s10, 4  ;;  %s143_s16 = sshll.u32 %s10887_s9, 4  ;;  %s121_s15 = int_to_ptr.vmem [resolvable:$true] %s120_s15  ;;  %s11107_s16 = int_to_ptr.vmem [resolvable:$true] %s143_s16 }
  0xb8   :  { %s10699_s0 = scalar_lea.hbm %s10930_s25, 128 }
  0xb9   :  { %p10700_p8 = scmp.ne.s32.totalorder %s10930_s25, %s10699_s0  ;;  %p10703_p9 = scmp.lt.u32.totalorder %s10699_s0, %s10930_s25 }
  0xbb   :  { %p10705_p10 = pnand %p10703_p9, %p10700_p8 }
  0xbd   :  { %10708 = shalt.err (!%p10705_p10)
}
  0xbe   :  { %s10709_s18 = scalar_lea.vmem %s121_s15, 128  ;;  %p10714_p12 = scmp.lt.s32.totalorder %s121_s15, %s121_s15 }
  0xbf   :  { %p10710_p11 = scmp.ne.s32.totalorder %s121_s15, %s10709_s18  ;;  %p10715_p13 = scmp.lt.s32.totalorder %s10709_s18, %s10709_s18 }
  0xc1   :  { %p10716_p0 = por %p10715_p13, %p10714_p12 }
  0xc3   :  { %p10717_p1 = pnand %p10716_p0, %p10710_p11 }
  0xc5   :  { %10720 = shalt.err (!%p10717_p1)
}
  0xc6   :  { %123 = dma.hbm_to_vmem [thread:$0]  %s10930_s25, 128, %s121_s15, [#allocation9]  }
  0xc7   :  { %s10721_s17 = scalar_lea.hbm %s10950_s14, 32 }
  0xc8   :  { %p10722_p2 = scmp.ne.s32.totalorder %s10950_s14, %s10721_s17  ;;  %p10725_p3 = scmp.lt.u32.totalorder %s10721_s17, %s10950_s14 }
  0xca   :  { %p10727_p4 = pnand %p10725_p3, %p10722_p2 }
  0xcc   :  { %10730 = shalt.err (!%p10727_p4)
}
  0xcd   :  { %s10731_s22 = scalar_lea.vmem %s11107_s16, 32  ;;  %p10736_p6 = scmp.lt.s32.totalorder %s11107_s16, %s11107_s16 }
  0xce   :  { %p10732_p5 = scmp.ne.s32.totalorder %s11107_s16, %s10731_s22  ;;  %p10737_p7 = scmp.lt.s32.totalorder %s10731_s22, %s10731_s22 }
  0xd0   :  { %p10738_p8 = por %p10737_p7, %p10736_p6 }
  0xd2   :  { %p10739_p9 = pnand %p10738_p8, %p10732_p5 }
  0xd4   :  { %10742 = shalt.err (!%p10739_p9)
}
  0xd5   :  { %s10888_s23 = smov 16   ;;  %s10889_s25 = smov 1  }
  0xd6   :  { %149 = dma.hbm_to_vmem [thread:$0]  %s10950_s14, 32, %s11107_s16, [#allocation12], %s10888_s23, %s10888_s23, %s10889_s25  }
  0xd7   :  { %s10890_s4 = smov [#allocation16]   ;;  %s10891_s20 = smov [#allocation19]  }
  0xd8   :  { %s181_s26 = sshll.u32 %s10890_s4, 4  ;;  %s205_s28 = sshll.u32 %s10891_s20, 4  ;;  %s182_s26 = int_to_ptr.vmem [resolvable:$true] %s181_s26  ;;  %s11122_s28 = int_to_ptr.vmem [resolvable:$true] %s205_s28 }
  0xd9   :  { %s10743_s13 = scalar_lea.hbm %s10995_s12, 1024 }
  0xda   :  { %p10744_p10 = scmp.ne.s32.totalorder %s10995_s12, %s10743_s13  ;;  %p10747_p11 = scmp.lt.u32.totalorder %s10743_s13, %s10995_s12 }
  0xdc   :  { %p10749_p12 = pnand %p10747_p11, %p10744_p10 }
  0xde   :  { %10752 = shalt.err (!%p10749_p12)
}
  0xdf   :  { %s10753_s1 = scalar_lea.vmem %s182_s26, 1024  ;;  %p10758_p0 = scmp.lt.s32.totalorder %s182_s26, %s182_s26 }
  0xe0   :  { %p10754_p13 = scmp.ne.s32.totalorder %s182_s26, %s10753_s1  ;;  %p10759_p1 = scmp.lt.s32.totalorder %s10753_s1, %s10753_s1 }
  0xe2   :  { %p10760_p2 = por %p10759_p1, %p10758_p0 }
  0xe4   :  { %p10761_p3 = pnand %p10760_p2, %p10754_p13 }
  0xe6   :  { %10764 = shalt.err (!%p10761_p3)
}
  0xe7   :  { %187 = dma.hbm_to_vmem [thread:$0]  %s10995_s12, 1024, %s182_s26, [#allocation15], %s10880_s11, %s10880_s11, %s10881_s29  }
  0xe8   :  { %s10765_s14 = scalar_lea.hbm %s11005_s27, 1024 }
  0xe9   :  { %p10766_p4 = scmp.ne.s32.totalorder %s11005_s27, %s10765_s14  ;;  %p10769_p5 = scmp.lt.u32.totalorder %s10765_s14, %s11005_s27 }
  0xeb   :  { %p10771_p6 = pnand %p10769_p5, %p10766_p4 }
  0xed   :  { %10774 = shalt.err (!%p10771_p6)
}
  0xee   :  { %s10775_s2 = scalar_lea.vmem %s11122_s28, 1024  ;;  %p10780_p8 = scmp.lt.s32.totalorder %s11122_s28, %s11122_s28 }
  0xef   :  { %p10776_p7 = scmp.ne.s32.totalorder %s11122_s28, %s10775_s2  ;;  %p10781_p9 = scmp.lt.s32.totalorder %s10775_s2, %s10775_s2 }
  0xf1   :  { %p10782_p10 = por %p10781_p9, %p10780_p8 }
  0xf3   :  { %p10783_p11 = pnand %p10782_p10, %p10776_p7 }
  0xf5   :  { %10786 = shalt.err (!%p10783_p11)
}
  0xf6   :  { %211 = dma.hbm_to_vmem [thread:$0]  %s11005_s27, 1024, %s11122_s28, [#allocation18], %s10880_s11, %s10880_s11, %s10881_s29  }
  0xf7   :  { %s10892_s12 = smov [#allocation22]   ;;  %s10787_s30 = scalar_lea.hbm %s11015_s6, 1024 }
  0xf8   :  { %s229_s7 = sshll.u32 %s10892_s12, 4  ;;  %p10788_p12 = scmp.ne.s32.totalorder %s11015_s6, %s10787_s30  ;;  %s230_s7 = int_to_ptr.vmem [resolvable:$true] %s229_s7 }
  0xf9   :  { %p10791_p13 = scmp.lt.u32.totalorder %s10787_s30, %s11015_s6 }
  0xfb   :  { %p10793_p0 = pnand %p10791_p13, %p10788_p12 }
  0xfd   :  { %10796 = shalt.err (!%p10793_p0)
}
  0xfe   :  { %s10797_s21 = scalar_lea.vmem %s230_s7, 1024  ;;  %p10802_p2 = scmp.lt.s32.totalorder %s230_s7, %s230_s7 }
  0xff   :  { %p10798_p1 = scmp.ne.s32.totalorder %s230_s7, %s10797_s21  ;;  %p10803_p3 = scmp.lt.s32.totalorder %s10797_s21, %s10797_s21 }
 0x101   :  { %p10804_p4 = por %p10803_p3, %p10802_p2 }
 0x103   :  { %p10805_p5 = pnand %p10804_p4, %p10798_p1 }
 0x105   :  { %10808 = shalt.err (!%p10805_p5)
}
 0x106   :  { %235 = dma.hbm_to_vmem [thread:$0]  %s11015_s6, 1024, %s230_s7, [#allocation21], %s10880_s11, %s10880_s11, %s10881_s29  }
 0x107   :  { %10831 = dma.done.wait [#allocation3], 64  }
 0x108   :  { %10832 = vsyncadd [#allocation3], 4294967232 }
 0x109   :  { %10833 = dma.done.wait [#allocation6], 144  }
 0x10a   :  { %10834 = vsyncadd [#allocation6], 4294967152 }
 0x10b   :  { %10835 = dma.done.wait [#allocation9], 256  }
 0x10c   :  { %10836 = vsyncadd [#allocation9], 4294967040 }
 0x10d   :  { %10837 = dma.done.wait [#allocation12], 160  }
 0x10e   :  { %10838 = vsyncadd [#allocation12], 4294967136 }
 0x10f   :  { %10839 = dma.done.wait [#allocation15], 2048  }
 0x110   :  { %10840 = vsyncadd [#allocation15], 4294965248 }
 0x111   :  { %10841 = dma.done.wait [#allocation18], 2048  }
 0x112   :  { %10842 = vsyncadd [#allocation18], 4294965248 }
 0x113   :  { %10843 = dma.done.wait [#allocation21], 2048  }
 0x114   :  { %10844 = vsyncadd [#allocation21], 4294965248  ;;  %vm304_vm0 = vcmask 1043456   ;;  %vm297_vm1 = vcmask 31744   ;;  %v289_v0 = vld [vmem:[#allocation2] sm:$0xf] }
 0x115   :  { %v287_v1 = vld [vmem:[%s10905_s5] sm:$0xff]  ;;  %v288_v2 = vld [vmem:[%s10905_s5 + $0x8] sm:$0xff]  ;;  %8785 = vmatprep.subr.msk.mxu0 %vm304_vm0, %v289_v0  ;;  %v10893_v3 = vmov 0.0   ;;  %vm10894_vm2 = vmmov 0   ;;  %s12196_s6 = sld [smem:[#allocation32_spill]]  ;;  %s12197_s5 = sld [smem:[#allocation33_spill]] }
 0x116   :  { %8787 = vmatprep.mubr.msk.f32.mxu0 %vm297_vm1, %v287_v1  ;;  %8786 = vmatpush3.msk.msra.mxu0 %vm304_vm0, %v289_v0  ;;  %v8162_v4 = vld [vmem:[#allocation5] ss:$0 sm:$0xff]  ;;  %v11160_v9 = vld [vmem:[#allocation7] sm:$0x1f]  ;;  %vm389_vm3 = vcmask 64512   ;;  %vm546_vm4 = vcmask 1044480  }
 0x117   :  { %8788 = vmatmul.mubr.msk.f32.vlgmr.msra.gmra.mrb[0].mxu0 %vm297_vm1, %v288_v2  ;;  %8790 = vmatprep.subr.mxu1 %v10893_v3  ;;  %v11162_v10 = vld [vmem:[#allocation8] sm:$0x1f]  ;;  %v11176_v23 = vld [vmem:[#allocation11] sm:$0xff]  ;;  %vm542_vm5 = vcmask 39936   ;;  %v11178_v24 = vld [vmem:[#allocation10] sm:$0xff]  ;;  %vm992_vm6 = vcmask 261120  }
 0x118   :  { %8795 = vmatprep.subr.mxu0 %v10893_v3  ;;  %8792 = vmatprep.mubr.msk.f32.mxu1 %vm10894_vm2, %v10893_v3  ;;  %s12198_s27 = sld [smem:[#allocation34_spill]]  ;;  %s12199_s11 = sld [smem:[#allocation35_spill]]  ;;  %v8178_v58 = vld [vmem:[#allocation13] ss:$0 sm:$0xff]  ;;  %vm2460_vm7 = vcmask 1040384   ;;  %vm8110_vm8 = vcmask 25600  }
 0x119   :  { %8797 = vmatprep.mubr.msk.f32.mxu0 %vm10894_vm2, %v10893_v3  ;;  %s12200_s29 = sld [smem:[#allocation37_spill]]  ;;  %s12201_s10 = sld [smem:[#allocation36_spill]] }
 0x11a   :  { %s12202_s15 = sld [smem:[#allocation38_spill]]  ;;  %s12203_s9 = sld [smem:[#allocation39_spill]] }
 0x11b   :  { %v387_v11 = vld [vmem:[%s12196_s6] sm:$0x1f]  ;;  %s12204_s16 = sld [smem:[#allocation40_spill]]  ;;  %s12205_s0 = sld [smem:[#allocation41_spill]] }
 0x11c   :  { %v388_v12 = vld [vmem:[%s12197_s5] sm:$0x1f]  ;;  %s12206_s18 = sld [smem:[#allocation42_spill]]  ;;  %s12207_s17 = sld [smem:[#allocation43_spill]] }
 0x11e   :  { %v8179_v60 = vld [vmem:[%s12198_s27] ss:$0 sm:$0xff] }
 0x1ea   :  { %v8789_v5 = vpop.f32.mrb[0].mxu0 }
 0x1eb   :  { %v11158_v6 = vadd.f32 %v8789_v5, %v8162_v4  ;;  %v374_v7 = vpop.f32.mrb[1].mxu0  ;;  %v1036_v5 = vld [vmem:[%s12199_s11] sm:$0xff] }
 0x1ec   :  { %v375_v8 = vadd.f32 %v8162_v4, %v374_v7 }
 0x1ee   :  { %8791 = vmatpush3.msra.mxu1 %v375_v8  ;;  %8796 = vmatpush3.msra.mxu0 %v375_v8 }
 0x1ef   :  { %8793 = vmatmul.mubr.msk.f32.vlgmr.msra.gmra.mrb[0].mxu1 %vm389_vm3, %v11160_v9  ;;  %8798 = vmatmul.mubr.msk.f32.vlgmr.msra.gmra.mrb[2].mxu0 %vm389_vm3, %v11162_v10 }
 0x1f0   :  { %8800 = vmatprep.subr.mxu1 %v10893_v3  ;;  %8805 = vmatprep.subr.mxu0 %v10893_v3 }
 0x1f1   :  { %8802 = vmatprep.mubr.msk.f32.mxu1 %vm10894_vm2, %v10893_v3  ;;  %8807 = vmatprep.mubr.msk.f32.mxu0 %vm10894_vm2, %v10893_v3 }
 0x2c2   :  { %v459_v13 = vpop.f32.mrb[0].mxu1  ;;  %v532_v14 = vpop.f32.mrb[2].mxu0 }
 0x2c3   :  { %v536_v15 = vmul.f32 %v459_v13, %v387_v11  ;;  %v539_v16 = vmul.f32 %v459_v13, %v388_v12  ;;  %v537_v17 = vmul.f32 %v532_v14, %v388_v12  ;;  %v540_v18 = vmul.f32 %v532_v14, %v387_v11  ;;  %v8794_v19 = vpop.f32.mrb[1].mxu1  ;;  %v8799_v20 = vpop.f32.mrb[3].mxu0  ;;  %v1130_v13 = vld [vmem:[%s12200_s29] sm:$0xff]  ;;  %v1131_v14 = vld [vmem:[%s12200_s29 + $0x8] sm:$0xff] }
 0x2c5   :  { %v538_v21 = vsub.f32 %v536_v15, %v537_v17  ;;  %v541_v22 = vadd.f32 %v540_v18, %v539_v16  ;;  %v9758_v15 = vpack.c.bf16 %v1131_v14, %v1130_v13 }
 0x2c7   :  { %8801 = vmatpush3.msk.msra.mxu1 %vm546_vm4, %v541_v22  ;;  %8806 = vmatpush3.msk.msra.mxu0 %vm546_vm4, %v538_v21 }
 0x2c8   :  { %8803 = vmatmul.mubr.msk.f32.vlgmr.msra.gmra.mrb[2].mxu1 %vm542_vm5, %v11176_v23  ;;  %8808 = vmatmul.mubr.msk.f32.vlgmr.msra.gmra.mrb[4].mxu0 %vm542_vm5, %v11178_v24 }
 0x2c9   :  { %8810 = vmatprep.subr.mxu1 %v10893_v3  ;;  %8815 = vmatprep.subr.mxu0 %v10893_v3 }
 0x2ca   :  { %8811 = vmatpush3.msra.mxu1 %v11158_v6  ;;  %8816 = vmatpush3.msra.mxu0 %v11158_v6 }
 0x2cb   :  { %8812 = vmatprep.mubr.msk.f32.mxu1 %vm10894_vm2, %v10893_v3  ;;  %8817 = vmatprep.mubr.msk.f32.mxu0 %vm10894_vm2, %v10893_v3 }
 0x2cc   :  { %8813 = vmatmul.mubr.msk.f32.vlgmr.msra.gmra.mrb[4].mxu1 %vm389_vm3, %v11160_v9  ;;  %8818 = vmatmul.mubr.msk.f32.vlgmr.msra.gmra.mrb[6].mxu0 %vm389_vm3, %v11162_v10 }
 0x2cd   :  { %8820 = vmatprep.subr.mxu1 %v10893_v3  ;;  %8825 = vmatprep.subr.mxu0 %v10893_v3 }
 0x2ce   :  { %8822 = vmatprep.mubr.msk.f32.mxu1 %vm10894_vm2, %v10893_v3  ;;  %8827 = vmatprep.mubr.msk.f32.mxu0 %vm10894_vm2, %v10893_v3 }
 0x39b   :  { %v616_v25 = vpop.f32.mrb[2].mxu1  ;;  %v692_v26 = vpop.f32.mrb[4].mxu0 }
 0x39c   :  { %v693_v27 = vadd.f32 %v692_v26, %v616_v25  ;;  %v8804_v28 = vpop.f32.mrb[3].mxu1  ;;  %v8809_v29 = vpop.f32.mrb[5].mxu0  ;;  %v1132_v25 = vld [vmem:[%s12200_s29 + $0x10] sm:$0xff]  ;;  %v1133_v26 = vld [vmem:[%s12200_s29 + $0x18] sm:$0xff] }
 0x39d   :  { %v8180_v28 = vld [vmem:[%s12201_s10] ss:$0 sm:$0xff] }
 0x39e   :  { %v988_v30 = vadd.f32 %v693_v27, %v375_v8  ;;  %v1038_v8 = vld [vmem:[%s12199_s11 + $0x10] sm:$0xff]  ;;  %v9762_v27 = vpack.c.bf16 %v1133_v26, %v1132_v25 }
 0x39f   :  { %v762_v31 = vpop.f32.mrb[4].mxu1  ;;  %v832_v32 = vpop.f32.mrb[6].mxu0 }
 0x3a0   :  { %v836_v33 = vmul.f32 %v762_v31, %v387_v11  ;;  %v839_v34 = vmul.f32 %v762_v31, %v388_v12  ;;  %v837_v35 = vmul.f32 %v832_v32, %v388_v12  ;;  %v840_v36 = vmul.f32 %v832_v32, %v387_v11  ;;  %v8814_v37 = vpop.f32.mrb[5].mxu1  ;;  %v8819_v38 = vpop.f32.mrb[7].mxu0  ;;  %v1039_v11 = vld [vmem:[%s12199_s11 + $0x18] sm:$0xff] }
 0x3a1   :  { %v993_v39 = vsel %vm992_vm6, %v988_v30, 0.0  ;;  %v9754_v12 = vpack.c.bf16 %v1039_v11, %v1038_v8  ;;  %v8189_v8 = vld [vmem:[%s12197_s5 + $0x8] sm:$0x1f] }
 0x3a2   :  { %v838_v40 = vsub.f32 %v836_v33, %v837_v35  ;;  %v841_v41 = vadd.f32 %v840_v36, %v839_v34  ;;  %994 = vadd.xlane.f32.xlu0 %v993_v39  ;;  %v8183_v35 = vld [vmem:[%s12202_s15] ss:$0 sm:$0xff] }
 0x3a4   :  { %8821 = vmatpush3.msk.msra.mxu1 %vm546_vm4, %v841_v41  ;;  %8826 = vmatpush3.msk.msra.mxu0 %vm546_vm4, %v838_v40 }
 0x3a5   :  { %8823 = vmatmul.mubr.msk.f32.vlgmr.msra.gmra.mrb[6].mxu1 %vm542_vm5, %v11176_v23  ;;  %8828 = vmatmul.mubr.msk.f32.vlgmr.msra.gmra.mrb[8].mxu0 %vm542_vm5, %v11178_v24 }
 0x3a6   :  { %9759 = vmatprep.subr.bf16.mxu0 %v9758_v15 }
 0x3a7   :  { %9761 = vmatpush3.bf16.msra.mxu0 %v9758_v15 }
 0x3a8   :  { %9763 = vmatprep.subr.bf16.mxu0 %v9762_v27 }
 0x3ab   :  { %9765 = vmatpush3.bf16.msra.mxu0 %v9762_v27 }
 0x3ac   :  { %8857 = vmatprep.subr.mxu0 %v10893_v3 }
 0x42f   :  { %v995_v42 = vpop.xlane.xlu0 %994 }
 0x430   :  { %v1000_v43 = vmul.f32 0.03125, %v995_v42 }
 0x432   :  { %v1002_v44 = vsub.f32 %v988_v30, %v1000_v43 }
 0x434   :  { %v1004_v45 = vmul.f32 %v1002_v44, %v1002_v44 }
 0x436   :  { %v1006_v46 = vsel %vm992_vm6, %v1004_v45, 0.0 }
 0x437   :  { %1007 = vadd.xlane.f32.xlu1 %v1006_v46 }
 0x478   :  { %v911_v47 = vpop.f32.mrb[6].mxu1  ;;  %v984_v48 = vpop.f32.mrb[8].mxu0 }
 0x479   :  { %v985_v49 = vadd.f32 %v984_v48, %v911_v47  ;;  %v8824_v50 = vpop.f32.mrb[7].mxu1  ;;  %v8829_v51 = vpop.f32.mrb[9].mxu0 }
 0x47b   :  { %v989_v52 = vadd.f32 %v985_v49, %v11158_v6  ;;  %v1037_v6 = vld [vmem:[%s12199_s11 + $0x8] sm:$0xff] }
 0x47c   :  { %v9750_v7 = vpack.c.bf16 %v1037_v6, %v1036_v5 }
 0x47d   :  { %v996_v53 = vsel %vm992_vm6, %v989_v52, 0.0 }
 0x47e   :  { %997 = vadd.xlane.f32.xlu0 %v996_v53  ;;  %9751 = vmatprep.subr.bf16.mxu1 %v9750_v7 }
 0x47f   :  { %9753 = vmatpush3.bf16.msra.mxu1 %v9750_v7  ;;  %v8188_v7 = vld [vmem:[%s12196_s6 + $0x8] sm:$0x1f] }
 0x480   :  { %9755 = vmatprep.subr.bf16.mxu1 %v9754_v12 }
 0x483   :  { %9757 = vmatpush3.bf16.msra.mxu1 %v9754_v12 }
 0x484   :  { %8852 = vmatprep.subr.mxu1 %v10893_v3 }
 0x4c4   :  { %v1008_v54 = vpop.xlane.xlu1 %1007 }
 0x4c5   :  { %v1012_v55 = vmul.f32 0.03125, %v1008_v54 }
 0x4c7   :  { %v1014_v56 = vadd.f32 1e-12, %v1012_v55 }
 0x4c9   :  { %10342 = vrsqrt.f32 %v1014_v56 }
 0x4d3   :  { %v10343_v57 = vpop.eup %10342 }
 0x4d4   :  { %v1018_v59 = vmul.f32 %v10343_v57, %v1002_v44 }
 0x4d6   :  { %v1026_v61 = vmul.f32 %v8178_v58, %v1018_v59 }
 0x4d8   :  { %v1034_v62 = vadd.f32 %v8179_v60, %v1026_v61  ;;  %v8186_v61 = vld [vmem:[%s12203_s9] ss:$0 sm:$0xff] }
 0x4da   :  { %8838 = vmatprep.mubr.msk.f32.mxu1 %vm992_vm6, %v1034_v62 }
 0x50b   :  { %v998_v63 = vpop.xlane.xlu0 %997 }
 0x50c   :  { %v1001_v0 = vmul.f32 0.03125, %v998_v63  ;;  %v8187_v63 = vld [vmem:[%s12204_s16] ss:$0 sm:$0xff] }
 0x50e   :  { %v1003_v1 = vsub.f32 %v989_v52, %v1001_v0 }
 0x510   :  { %v1005_v2 = vmul.f32 %v1003_v1, %v1003_v1 }
 0x512   :  { %v1009_v4 = vsel %vm992_vm6, %v1005_v2, 0.0 }
 0x513   :  { %1010 = vadd.xlane.f32.xlu1 %v1009_v4 }
 0x5a0   :  { %v1011_v16 = vpop.xlane.xlu1 %1010 }
 0x5a1   :  { %v1013_v17 = vmul.f32 0.03125, %v1011_v16 }
 0x5a3   :  { %v1015_v18 = vadd.f32 1e-12, %v1013_v17 }
 0x5a5   :  { %10344 = vrsqrt.f32 %v1015_v18 }
 0x5af   :  { %v10345_v19 = vpop.eup %10344 }
 0x5b0   :  { %v1019_v20 = vmul.f32 %v10345_v19, %v1003_v1 }
 0x5b2   :  { %v1027_v21 = vmul.f32 %v8178_v58, %v1019_v20 }
 0x5b4   :  { %v1035_v22 = vadd.f32 %v8179_v60, %v1027_v21 }
 0x5b6   :  { %8839 = vmatmul.mubr.msk.f32.vlgmr.msra.gmra.mrb[8].mxu1 %vm992_vm6, %v1035_v22 }
 0x5b7   :  { %8854 = vmatprep.mubr.msk.f32.mxu1 %vm10894_vm2, %v10893_v3 }
 0x689   :  { %v8840_v29 = vpop.f32.mrb[8].mxu1 }
 0x68a   :  { %v1125_v30 = vadd.f32 %v8840_v29, %v8180_v28  ;;  %v1119_v31 = vpop.f32.mrb[9].mxu1 }
 0x68b   :  { %v1120_v32 = vadd.f32 %v8180_v28, %v1119_v31 }
 0x68c   :  { %v1129_v34 = vmax.f32 %v1125_v30, 0.0 }
 0x68d   :  { %v1128_v33 = vmax.f32 %v1120_v32, 0.0 }
 0x68f   :  { %8849 = vmatprep.mubr.msk.f32.mxu0 %vm992_vm6, %v1128_v33 }
 0x690   :  { %8850 = vmatmul.mubr.msk.f32.vlgmr.msra.gmra.mrb[10].mxu0 %vm992_vm6, %v1129_v34 }
 0x691   :  { %8859 = vmatprep.mubr.msk.f32.mxu0 %vm10894_vm2, %v10893_v3 }
 0x763   :  { %v8851_v36 = vpop.f32.mrb[10].mxu0 }
 0x764   :  { %v1213_v37 = vpop.f32.mrb[11].mxu0  ;;  %v1219_v38 = vadd.f32 %v8851_v36, %v8183_v35 }
 0x765   :  { %v1214_v39 = vadd.f32 %v8183_v35, %v1213_v37 }
 0x766   :  { %v1223_v42 = vadd.f32 %v1219_v38, %v1035_v22 }
 0x767   :  { %v1222_v40 = vadd.f32 %v1214_v39, %v1034_v62 }
 0x768   :  { %v1229_v43 = vsel %vm992_vm6, %v1223_v42, 0.0 }
 0x769   :  { %v1226_v41 = vsel %vm992_vm6, %v1222_v40, 0.0 }
 0x76a   :  { %1227 = vadd.xlane.f32.xlu0 %v1226_v41 }
 0x76e   :  { %1230 = vadd.xlane.f32.xlu0 %v1229_v43 }
 0x7f7   :  { %v1228_v44 = vpop.xlane.xlu0 %1227 }
 0x7f8   :  { %v1232_v45 = vmul.f32 0.03125, %v1228_v44 }
 0x7fa   :  { %v1234_v46 = vsub.f32 %v1222_v40, %v1232_v45 }
 0x7fb   :  { %v1231_v47 = vpop.xlane.xlu0 %1230 }
 0x7fc   :  { %v1233_v48 = vmul.f32 0.03125, %v1231_v47  ;;  %v1236_v49 = vmul.f32 %v1234_v46, %v1234_v46 }
 0x7fe   :  { %v1235_v50 = vsub.f32 %v1223_v42, %v1233_v48  ;;  %v1238_v51 = vsel %vm992_vm6, %v1236_v49, 0.0 }
 0x7ff   :  { %1239 = vadd.xlane.f32.xlu1 %v1238_v51 }
 0x800   :  { %v1237_v52 = vmul.f32 %v1235_v50, %v1235_v50 }
 0x802   :  { %v1241_v53 = vsel %vm992_vm6, %v1237_v52, 0.0  ;;  %v8203_v52 = vld [vmem:[#allocation13 + $0x1] ss:$0 sm:$0xff] }
 0x803   :  { %1242 = vadd.xlane.f32.xlu1 %v1241_v53 }
 0x88c   :  { %v1240_v54 = vpop.xlane.xlu1 %1239 }
 0x88d   :  { %v1244_v55 = vmul.f32 0.03125, %v1240_v54  ;;  %v8204_v54 = vld [vmem:[%s12198_s27 + $0x1] ss:$0 sm:$0xff] }
 0x88f   :  { %v1246_v56 = vadd.f32 1e-05, %v1244_v55 }
 0x890   :  { %v1243_v57 = vpop.xlane.xlu1 %1242 }
 0x891   :  { %10346 = vrsqrt.f32 %v1246_v56  ;;  %v1245_v58 = vmul.f32 0.03125, %v1243_v57 }
 0x893   :  { %v1247_v59 = vadd.f32 1e-05, %v1245_v58 }
 0x895   :  { %10348 = vrsqrt.f32 %v1247_v59 }
 0x89b   :  { %v10347_v60 = vpop.eup %10346 }
 0x89c   :  { %v1250_v62 = vmul.f32 %v10347_v60, %v1234_v46 }
 0x89e   :  { %v1258_v0 = vmul.f32 %v8186_v61, %v1250_v62  ;;  %v8205_v62 = vld [vmem:[%s12199_s11 + $0x20] sm:$0xff] }
 0x89f   :  { %v10349_v1 = vpop.eup %10348 }
 0x8a0   :  { %v1266_v2 = vadd.f32 %v8187_v63, %v1258_v0  ;;  %v1251_v4 = vmul.f32 %v10349_v1, %v1235_v50  ;;  %v8207_v1 = vld [vmem:[%s12199_s11 + $0x30] sm:$0xff] }
 0x8a2   :  { %8853 = vmatpush3.msra.mxu1 %v1266_v2  ;;  %8858 = vmatpush3.msra.mxu0 %v1266_v2  ;;  %v1259_v5 = vmul.f32 %v8186_v61, %v1251_v4 }
 0x8a3   :  { %8855 = vmatmul.mubr.msk.f32.vlgmr.msra.gmra.mrb[10].mxu1 %vm389_vm3, %v11160_v9  ;;  %8860 = vmatmul.mubr.msk.f32.vlgmr.msra.gmra.mrb[12].mxu0 %vm389_vm3, %v11162_v10 }
 0x8a4   :  { %8862 = vmatprep.subr.mxu1 %v10893_v3  ;;  %8867 = vmatprep.subr.mxu0 %v10893_v3  ;;  %v11248_v6 = vadd.f32 %v8187_v63, %v1259_v5  ;;  %v8206_v63 = vld [vmem:[%s12199_s11 + $0x28] sm:$0xff]  ;;  %v8213_v5 = vld [vmem:[%s12200_s29 + $0x20] sm:$0xff] }
 0x8a5   :  { %8864 = vmatprep.mubr.msk.f32.mxu1 %vm10894_vm2, %v10893_v3  ;;  %8869 = vmatprep.mubr.msk.f32.mxu0 %vm10894_vm2, %v10893_v3  ;;  %v9766_v0 = vpack.c.bf16 %v8206_v63, %v8205_v62 }
 0x976   :  { %v1338_v11 = vpop.f32.mrb[10].mxu1  ;;  %v1408_v12 = vpop.f32.mrb[12].mxu0 }
 0x977   :  { %v1412_v13 = vmul.f32 %v8188_v7, %v1338_v11  ;;  %v1415_v14 = vmul.f32 %v8189_v8, %v1338_v11  ;;  %v1413_v15 = vmul.f32 %v8189_v8, %v1408_v12  ;;  %v1416_v16 = vmul.f32 %v8188_v7, %v1408_v12  ;;  %v8856_v17 = vpop.f32.mrb[11].mxu1  ;;  %v8861_v18 = vpop.f32.mrb[13].mxu0 }
 0x978   :  { %v8215_v17 = vld [vmem:[%s12200_s29 + $0x30] sm:$0xff]  ;;  %v8216_v18 = vld [vmem:[%s12200_s29 + $0x38] sm:$0xff] }
 0x979   :  { %v1414_v19 = vsub.f32 %v1412_v13, %v1413_v15  ;;  %v1417_v20 = vadd.f32 %v1416_v16, %v1415_v14 }
 0x97b   :  { %8863 = vmatpush3.msk.msra.mxu1 %vm546_vm4, %v1417_v20  ;;  %8868 = vmatpush3.msk.msra.mxu0 %vm546_vm4, %v1414_v19  ;;  %v9778_v19 = vpack.c.bf16 %v8216_v18, %v8215_v17  ;;  %v8210_v20 = vld [vmem:[%s12201_s10 + $0x1] ss:$0 sm:$0xff] }
 0x97c   :  { %8865 = vmatmul.mubr.msk.f32.vlgmr.msra.gmra.mrb[12].mxu1 %vm542_vm5, %v11176_v23  ;;  %8870 = vmatmul.mubr.msk.f32.vlgmr.msra.gmra.mrb[14].mxu0 %vm542_vm5, %v11178_v24 }
 0x97d   :  { %8872 = vmatprep.subr.mxu1 %v10893_v3  ;;  %8877 = vmatprep.subr.mxu0 %v10893_v3 }
 0x97e   :  { %8873 = vmatpush3.msra.mxu1 %v11248_v6  ;;  %8878 = vmatpush3.msra.mxu0 %v11248_v6 }
 0x97f   :  { %8874 = vmatprep.mubr.msk.f32.mxu1 %vm10894_vm2, %v10893_v3  ;;  %8879 = vmatprep.mubr.msk.f32.mxu0 %vm10894_vm2, %v10893_v3 }
 0x980   :  { %8875 = vmatmul.mubr.msk.f32.vlgmr.msra.gmra.mrb[14].mxu1 %vm389_vm3, %v11160_v9  ;;  %8880 = vmatmul.mubr.msk.f32.vlgmr.msra.gmra.mrb[16].mxu0 %vm389_vm3, %v11162_v10 }
 0x981   :  { %8882 = vmatprep.subr.mxu1 %v10893_v3  ;;  %8887 = vmatprep.subr.mxu0 %v10893_v3 }
 0x982   :  { %8884 = vmatprep.mubr.msk.f32.mxu1 %vm10894_vm2, %v10893_v3  ;;  %8889 = vmatprep.mubr.msk.f32.mxu0 %vm10894_vm2, %v10893_v3 }
 0xa4f   :  { %v1487_v21 = vpop.f32.mrb[12].mxu1  ;;  %v1560_v22 = vpop.f32.mrb[14].mxu0 }
 0xa50   :  { %v1561_v25 = vadd.f32 %v1560_v22, %v1487_v21  ;;  %v8866_v26 = vpop.f32.mrb[13].mxu1  ;;  %v8871_v27 = vpop.f32.mrb[15].mxu0 }
 0xa52   :  { %v1856_v28 = vadd.f32 %v1561_v25, %v1266_v2  ;;  %v8208_v2 = vld [vmem:[%s12199_s11 + $0x38] sm:$0xff] }
 0xa53   :  { %v1630_v9 = vpop.f32.mrb[14].mxu1  ;;  %v1700_v29 = vpop.f32.mrb[16].mxu0  ;;  %v9770_v4 = vpack.c.bf16 %v8208_v2, %v8207_v1 }
 0xa54   :  { %v1704_v30 = vmul.f32 %v8188_v7, %v1630_v9  ;;  %v1707_v10 = vmul.f32 %v8189_v8, %v1630_v9  ;;  %v1705_v31 = vmul.f32 %v8189_v8, %v1700_v29  ;;  %v1708_v32 = vmul.f32 %v8188_v7, %v1700_v29  ;;  %v8876_v33 = vpop.f32.mrb[15].mxu1  ;;  %v8881_v34 = vpop.f32.mrb[17].mxu0  ;;  %v8218_v9 = vld [vmem:[%s12202_s15 + $0x1] ss:$0 sm:$0xff] }
 0xa55   :  { %v1862_v35 = vsel %vm992_vm6, %v1856_v28, 0.0 }
 0xa56   :  { %v1706_v36 = vsub.f32 %v1704_v30, %v1705_v31  ;;  %v1709_v37 = vadd.f32 %v1708_v32, %v1707_v10  ;;  %1863 = vadd.xlane.f32.xlu0 %v1862_v35 }
 0xa58   :  { %8883 = vmatpush3.msk.msra.mxu1 %vm546_vm4, %v1709_v37  ;;  %8888 = vmatpush3.msk.msra.mxu0 %vm546_vm4, %v1706_v36 }
 0xa59   :  { %8885 = vmatmul.mubr.msk.f32.vlgmr.msra.gmra.mrb[16].mxu1 %vm542_vm5, %v11176_v23  ;;  %8890 = vmatmul.mubr.msk.f32.vlgmr.msra.gmra.mrb[18].mxu0 %vm542_vm5, %v11178_v24 }
 0xa5a   :  { %9767 = vmatprep.subr.bf16.mxu1 %v9766_v0 }
 0xa5b   :  { %9769 = vmatpush3.bf16.msra.mxu1 %v9766_v0 }
 0xa5c   :  { %9771 = vmatprep.subr.bf16.mxu1 %v9770_v4 }
 0xa5f   :  { %9773 = vmatpush3.bf16.msra.mxu1 %v9770_v4  ;;  %v8223_v4 = vld [vmem:[%s12203_s9 + $0x1] ss:$0 sm:$0xff] }
 0xae3   :  { %v1864_v38 = vpop.xlane.xlu0 %1863 }
 0xae4   :  { %v1868_v39 = vmul.f32 0.03125, %v1864_v38 }
 0xae6   :  { %v1870_v40 = vsub.f32 %v1856_v28, %v1868_v39 }
 0xae8   :  { %v1872_v41 = vmul.f32 %v1870_v40, %v1870_v40 }
 0xaea   :  { %v1874_v42 = vsel %vm992_vm6, %v1872_v41, 0.0 }
 0xaeb   :  { %1875 = vadd.xlane.f32.xlu0 %v1874_v42 }
 0xb2c   :  { %v1779_v43 = vpop.f32.mrb[16].mxu1  ;;  %v1852_v44 = vpop.f32.mrb[18].mxu0 }
 0xb2d   :  { %v1853_v45 = vadd.f32 %v1852_v44, %v1779_v43  ;;  %v8886_v46 = vpop.f32.mrb[17].mxu1  ;;  %v8891_v47 = vpop.f32.mrb[19].mxu0 }
 0xb2e   :  { %v2142_v46 = vld [vmem:[#allocation14] sm:$0xff]  ;;  %v2143_v47 = vld [vmem:[#allocation14 + $0x8] sm:$0xff] }
 0xb2f   :  { %v1857_v48 = vadd.f32 %v1853_v45, %v11248_v6  ;;  %v8214_v6 = vld [vmem:[%s12200_s29 + $0x28] sm:$0xff] }
 0xb30   :  { %v9774_v7 = vpack.c.bf16 %v8214_v6, %v8213_v5 }
 0xb31   :  { %v1865_v23 = vsel %vm992_vm6, %v1857_v48, 0.0 }
 0xb32   :  { %1866 = vadd.xlane.f32.xlu1 %v1865_v23  ;;  %9775 = vmatprep.subr.bf16.mxu0 %v9774_v7  ;;  %v9782_v23 = vpack.c.bf16 %v2143_v47, %v2142_v46 }
 0xb33   :  { %9777 = vmatpush3.bf16.msra.mxu0 %v9774_v7 }
 0xb34   :  { %9779 = vmatprep.subr.bf16.mxu0 %v9778_v19  ;;  %9783 = vmatprep.subr.bf16.mxu1 %v9782_v23 }
 0xb37   :  { %9781 = vmatpush3.bf16.msra.mxu0 %v9778_v19 }
 0xb78   :  { %v1876_v49 = vpop.xlane.xlu0 %1875 }
 0xb79   :  { %v1880_v24 = vmul.f32 0.03125, %v1876_v49  ;;  %v2152_v49 = vld [vmem:[#allocation16 + $0x8] sm:$0xff] }
 0xb7b   :  { %v1882_v50 = vadd.f32 1e-12, %v1880_v24 }
 0xb7d   :  { %10350 = vrsqrt.f32 %v1882_v50  ;;  %v2144_v50 = vld [vmem:[#allocation14 + $0x10] sm:$0xff] }
 0xb87   :  { %v10351_v51 = vpop.eup %10350 }
 0xb88   :  { %v1886_v53 = vmul.f32 %v10351_v51, %v1870_v40  ;;  %v2145_v51 = vld [vmem:[#allocation14 + $0x18] sm:$0xff] }
 0xb8a   :  { %v1894_v55 = vmul.f32 %v8203_v52, %v1886_v53  ;;  %v9786_v53 = vpack.c.bf16 %v2145_v51, %v2144_v50 }
 0xb8c   :  { %v1902_v56 = vadd.f32 %v8204_v54, %v1894_v55 }
 0xb8e   :  { %8900 = vmatprep.mubr.msk.f32.mxu1 %vm992_vm6, %v1902_v56 }
 0xbbf   :  { %v1867_v57 = vpop.xlane.xlu1 %1866 }
 0xbc0   :  { %v1869_v58 = vmul.f32 0.03125, %v1867_v57  ;;  %v2161_v57 = vld [vmem:[#allocation17 + $0x8] sm:$0xff] }
 0xbc2   :  { %v1871_v59 = vsub.f32 %v1857_v48, %v1869_v58  ;;  %v2151_v48 = vld [vmem:[#allocation16] sm:$0xff] }
 0xbc3   :  { %v9790_v24 = vpack.c.bf16 %v2152_v49, %v2151_v48 }
 0xbc4   :  { %v1873_v60 = vmul.f32 %v1871_v59, %v1871_v59 }
 0xbc5   :  { %9791 = vmatprep.subr.bf16.mxu0 %v9790_v24 }
 0xbc6   :  { %v1877_v61 = vsel %vm992_vm6, %v1873_v60, 0.0 }
 0xbc7   :  { %1878 = vadd.xlane.f32.xlu1 %v1877_v61 }
 0xc54   :  { %v1879_v8 = vpop.xlane.xlu1 %1878 }
 0xc55   :  { %v1881_v11 = vmul.f32 0.03125, %v1879_v8  ;;  %v8224_v8 = vld [vmem:[%s12204_s16 + $0x1] ss:$0 sm:$0xff] }
 0xc57   :  { %v1883_v12 = vadd.f32 1e-12, %v1881_v11 }
 0xc59   :  { %10352 = vrsqrt.f32 %v1883_v12  ;;  %v2169_v12 = vld [vmem:[#allocation19] sm:$0xff] }
 0xc63   :  { %v10353_v13 = vpop.eup %10352 }
 0xc64   :  { %v1887_v14 = vmul.f32 %v10353_v13, %v1871_v59  ;;  %v10895_v59 = vmov 0.0|0.0   ;;  %v2170_v13 = vld [vmem:[#allocation19 + $0x8] sm:$0xff] }
 0xc65   :  { %v11313_v18 = vpack.c.bf16 %v2170_v13, %v2169_v12 }
 0xc66   :  { %v1895_v15 = vmul.f32 %v8203_v52, %v1887_v14  ;;  %v2153_v52 = vld [vmem:[#allocation16 + $0x10] sm:$0xff] }
 0xc68   :  { %v1903_v16 = vadd.f32 %v8204_v54, %v1895_v15  ;;  %v2154_v54 = vld [vmem:[#allocation16 + $0x18] sm:$0xff]  ;;  %v2162_v15 = vld [vmem:[#allocation17 + $0x10] sm:$0xff] }
 0xc69   :  { %v9794_v55 = vpack.c.bf16 %v2154_v54, %v2153_v52 }
 0xc6a   :  { %8901 = vmatmul.mubr.msk.f32.vlgmr.msra.gmra.mrb[18].mxu1 %vm992_vm6, %v1903_v16 }
 0xc6b   :  { %9785 = vmatpush3.bf16.msra.mxu1 %v9782_v23 }
 0xc6c   :  { %9787 = vmatprep.subr.bf16.mxu1 %v9786_v53 }
 0xc6f   :  { %9789 = vmatpush3.bf16.msra.mxu1 %v9786_v53 }
 0xd3d   :  { %v8902_v21 = vpop.f32.mrb[18].mxu1 }
 0xd3e   :  { %v1995_v22 = vadd.f32 %v8902_v21, %v8210_v20  ;;  %v1989_v25 = vpop.f32.mrb[19].mxu1  ;;  %v2171_v21 = vld [vmem:[#allocation19 + $0x10] sm:$0xff] }
 0xd3f   :  { %v1990_v26 = vadd.f32 %v8210_v20, %v1989_v25 }
 0xd40   :  { %v1999_v28 = vmax.f32 %v1995_v22, 0.0  ;;  %v2172_v22 = vld [vmem:[#allocation19 + $0x18] sm:$0xff] }
 0xd41   :  { %v1998_v27 = vmax.f32 %v1990_v26, 0.0  ;;  %v11320_v25 = vpack.c.bf16 %v2172_v22, %v2171_v21  ;;  %v2178_v26 = vld [vmem:[#allocation20] sm:$0xff] }
 0xd43   :  { %8911 = vmatprep.mubr.msk.f32.mxu0 %vm992_vm6, %v1998_v27  ;;  %v2179_v27 = vld [vmem:[#allocation20 + $0x8] sm:$0xff] }
 0xd44   :  { %8912 = vmatmul.mubr.msk.f32.vlgmr.msra.gmra.mrb[20].mxu0 %vm992_vm6, %v1999_v28  ;;  %v2187_v28 = vld [vmem:[#allocation22] sm:$0xff] }
 0xd45   :  { %9793 = vmatpush3.bf16.msra.mxu0 %v9790_v24 }
 0xd46   :  { %9795 = vmatprep.subr.bf16.mxu0 %v9794_v55 }
 0xd49   :  { %9797 = vmatpush3.bf16.msra.mxu0 %v9794_v55 }
 0xd4a   :  { %9806 = vmatprep.subr.bf16.mxu0 %v10895_v59 }
 0xe17   :  { %v8913_v29 = vpop.f32.mrb[20].mxu0 }
 0xe18   :  { %v2091_v30 = vadd.f32 %v8913_v29, %v8218_v9  ;;  %v2085_v10 = vpop.f32.mrb[21].mxu0  ;;  %v11327_v29 = vpack.c.bf16 %v2179_v27, %v2178_v26 }
 0xe19   :  { %v2086_v31 = vadd.f32 %v8218_v9, %v2085_v10  ;;  %v2188_v9 = vld [vmem:[#allocation22 + $0x8] sm:$0xff]  ;;  %v2181_v10 = vld [vmem:[#allocation20 + $0x18] sm:$0xff] }
 0xe1a   :  { %v2095_v32 = vadd.f32 %v2091_v30, %v1903_v16  ;;  %v2163_v16 = vld [vmem:[#allocation17 + $0x18] sm:$0xff]  ;;  %v2180_v30 = vld [vmem:[#allocation20 + $0x10] sm:$0xff] }
 0xe1b   :  { %v2094_v33 = vadd.f32 %v2086_v31, %v1902_v56  ;;  %v2160_v56 = vld [vmem:[#allocation17] sm:$0xff]  ;;  %v9802_v20 = vpack.c.bf16 %v2163_v16, %v2162_v15  ;;  %v11331_v31 = vpack.c.bf16 %v2188_v9, %v2187_v28 }
 0xe1c   :  { %v2103_v34 = vsel %vm992_vm6, %v2095_v32, 0.0  ;;  %v9798_v58 = vpack.c.bf16 %v2161_v57, %v2160_v56  ;;  %v8235_v56 = vld [vmem:[%s12207_s17] ss:$0 sm:$0xff] }
 0xe1d   :  { %2104 = vadd.xlane.f32.xlu1 %v2103_v34  ;;  %v2100_v35 = vsel %vm992_vm6, %v2094_v33, 0.0  ;;  %v11336_v34 = vpack.c.bf16 %v2181_v10, %v2180_v30 }
 0xe1e   :  { %2101 = vadd.xlane.f32.xlu0 %v2100_v35  ;;  %9799 = vmatprep.subr.bf16.mxu1 %v9798_v58 }
 0xeaa   :  { %v2105_v36 = vpop.xlane.xlu1 %2104 }
 0xeab   :  { %v2107_v37 = vmul.f32 0.03125, %v2105_v36  ;;  %v2102_v38 = vpop.xlane.xlu0 %2101  ;;  %v8229_v36 = vld [vmem:[%s12205_s0] ss:$0 sm:$0xff] }
 0xeac   :  { %v2106_v39 = vmul.f32 0.03125, %v2102_v38 }
 0xead   :  { %v2109_v40 = vsub.f32 %v2095_v32, %v2107_v37  ;;  %v2189_v32 = vld [vmem:[#allocation22 + $0x10] sm:$0xff]  ;;  %v8232_v37 = vld [vmem:[%s12206_s18] ss:$0 sm:$0xff] }
 0xeae   :  { %v2108_v41 = vsub.f32 %v2094_v33, %v2106_v39  ;;  %v2190_v33 = vld [vmem:[#allocation22 + $0x18] sm:$0xff] }
 0xeaf   :  { %v2111_v42 = vmul.f32 %v2109_v40, %v2109_v40  ;;  %v11342_v35 = vpack.c.bf16 %v2190_v33, %v2189_v32 }
 0xeb0   :  { %v2110_v43 = vmul.f32 %v2108_v41, %v2108_v41 }
 0xeb1   :  { %v2115_v44 = vsel %vm992_vm6, %v2111_v42, 0.0 }
 0xeb2   :  { %2116 = vadd.xlane.f32.xlu1 %v2115_v44  ;;  %v2112_v45 = vsel %vm992_vm6, %v2110_v43, 0.0 }
 0xeb3   :  { %2113 = vadd.xlane.f32.xlu0 %v2112_v45 }
 0xf3f   :  { %v2117_v60 = vpop.xlane.xlu1 %2116 }
 0xf40   :  { %v2119_v61 = vmul.f32 0.03125, %v2117_v60  ;;  %v2114_v62 = vpop.xlane.xlu0 %2113 }
 0xf41   :  { %v2118_v63 = vmul.f32 0.03125, %v2114_v62 }
 0xf42   :  { %v2121_v0 = vadd.f32 1e-05, %v2119_v61 }
 0xf43   :  { %v2120_v1 = vadd.f32 1e-05, %v2118_v63 }
 0xf44   :  { %10354 = vrsqrt.f32 %v2121_v0 }
 0xf45   :  { %10356 = vrsqrt.f32 %v2120_v1 }
 0xf4e   :  { %v10355_v2 = vpop.eup %10354 }
 0xf4f   :  { %v10357_v5 = vpop.eup %10356  ;;  %v2125_v6 = vmul.f32 %v10355_v2, %v2109_v40 }
 0xf50   :  { %v2124_v7 = vmul.f32 %v10357_v5, %v2108_v41 }
 0xf51   :  { %v2133_v11 = vmul.f32 %v8223_v4, %v2125_v6 }
 0xf52   :  { %v2132_v14 = vmul.f32 %v8223_v4, %v2124_v7 }
 0xf53   :  { %v2141_v19 = vadd.f32 %v8224_v8, %v2133_v11 }
 0xf54   :  { %v2140_v17 = vadd.f32 %v8224_v8, %v2132_v14 }
 0xf56   :  { %8922 = vmatprep.mubr.msk.f32.mxu1 %vm992_vm6, %v2140_v17  ;;  %8933 = vmatprep.mubr.msk.f32.mxu0 %vm992_vm6, %v2140_v17 }
 0xf57   :  { %8923 = vmatmul.mubr.msk.f32.vlgmr.msra.gmra.mrb[20].mxu1 %vm992_vm6, %v2141_v19  ;;  %8934 = vmatmul.mubr.msk.f32.vlgmr.msra.gmra.mrb[22].mxu0 %vm992_vm6, %v2141_v19 }
 0xf58   :  { %9801 = vmatpush3.bf16.msra.mxu1 %v9798_v58  ;;  %9808 = vmatpush3.bf16.msra.mxu0 %v11313_v18 }
 0xf59   :  { %8944 = vmatprep.mubr.msk.f32.mxu1 %vm992_vm6, %v2140_v17  ;;  %9803 = vmatprep.subr.bf16.mxu1 %v9802_v20 }
 0xf5a   :  { %9809 = vmatprep.subr.bf16.mxu0 %v10895_v59  ;;  %8955 = vmatprep.mubr.msk.f32.mxu0 %vm10894_vm2, %v10893_v3 }
 0xf5c   :  { %9805 = vmatpush3.bf16.msra.mxu1 %v9802_v20  ;;  %9811 = vmatpush3.bf16.msra.mxu0 %v11320_v25 }
 0xf5d   :  { %9812 = vmatprep.subr.bf16.mxu1 %v10895_v59  ;;  %9818 = vmatprep.subr.bf16.mxu0 %v10895_v59 }
 0xf5f   :  { %8945 = vmatmul.mubr.msk.f32.vlgmr.msra.gmra.mrb[22].mxu1 %vm992_vm6, %v2141_v19  ;;  %8956 = vmatmul.mubr.f32.vlgmr.msra.gmra.mrb[24].mxu0 %v10893_v3 }
 0xf60   :  { %9814 = vmatpush3.bf16.msra.mxu1 %v11327_v29  ;;  %8966 = vmatprep.mubr.msk.f32.mxu1 %vm10894_vm2, %v10893_v3 }
 0xf61   :  { %9815 = vmatprep.subr.bf16.mxu1 %v10895_v59  ;;  %9820 = vmatpush3.bf16.msra.mxu0 %v11331_v31 }
 0xf62   :  { %9821 = vmatprep.subr.bf16.mxu0 %v10895_v59  ;;  %8977 = vmatprep.mubr.msk.f32.mxu0 %vm10894_vm2, %v10893_v3 }
 0xf64   :  { %9817 = vmatpush3.bf16.msra.mxu1 %v11336_v34 }
 0xf65   :  { %9823 = vmatpush3.bf16.msra.mxu0 %v11342_v35  ;;  %9824 = vmatprep.subr.bf16.mxu1 %v10895_v59 }
 0xf66   :  { %9830 = vmatprep.subr.bf16.mxu0 %v10895_v59 }
 0xf67   :  { %8967 = vmatmul.mubr.f32.vlgmr.msra.gmra.mrb[24].mxu1 %v10893_v3 }
 0xf68   :  { %8978 = vmatmul.mubr.f32.vlgmr.msra.gmra.mrb[26].mxu0 %v10893_v3  ;;  %9826 = vmatpush3.bf16.msra.mxu1 %v11313_v18 }
 0xf69   :  { %9832 = vmatpush3.bf16.msra.mxu0 %v11327_v29  ;;  %9827 = vmatprep.subr.bf16.mxu1 %v10895_v59 }
 0xf6a   :  { %9833 = vmatprep.subr.bf16.mxu0 %v10895_v59  ;;  %8988 = vmatprep.mubr.msk.f32.mxu1 %vm10894_vm2, %v10893_v3 }
 0xf6b   :  { %8999 = vmatprep.mubr.msk.f32.mxu0 %vm10894_vm2, %v10893_v3 }
 0xf6c   :  { %9829 = vmatpush3.bf16.msra.mxu1 %v11320_v25 }
 0xf6d   :  { %9835 = vmatpush3.bf16.msra.mxu0 %v11336_v34  ;;  %9836 = vmatprep.subr.bf16.mxu1 %v10895_v59 }
 0xf6e   :  { %9842 = vmatprep.subr.bf16.mxu0 %v10895_v59 }
0x102a   :  { %v8924_v38 = vpop.f32.mrb[20].mxu1  ;;  %v8935_v39 = vpop.f32.mrb[22].mxu0 }
0x102b   :  { %v11367_v40 = vadd.f32 %v8924_v38, %v8229_v36  ;;  %v11369_v41 = vadd.f32 %v8935_v39, %v8232_v37  ;;  %v2286_v42 = vpop.f32.mrb[21].mxu1  ;;  %v2367_v43 = vpop.f32.mrb[23].mxu0 }
0x102c   :  { %v11371_v44 = vadd.f32 %v8229_v36, %v2286_v42  ;;  %v11373_v45 = vadd.f32 %v8232_v37, %v2367_v43 }
0x102d   :  { %v2458_v46 = vrot.slane %v11367_v40, 7  ;;  %v2463_v47 = vrot.slane %v11369_v41, 7  ;;  %v2484_v48 = vrot.slane %v11367_v40, 1  ;;  %v2489_v23 = vrot.slane %v11369_v41, 1 }
0x102e   :  { %v2471_v49 = vrot.slane %v11371_v44, 1  ;;  %v2475_v24 = vrot.slane %v11373_v45, 1  ;;  %v2482_v50 = vrot.slane %v11371_v44, 2  ;;  %v2487_v51 = vrot.slane %v11373_v45, 2 }
0x102f   :  { %v2461_v52 = vsel %vm2460_vm7, %v11371_v44, %v2458_v46  ;;  %v2465_v53 = vsel %vm2460_vm7, %v11373_v45, %v2463_v47  ;;  %v2497_v54 = vrot.slane %v11371_v44, 3  ;;  %v2499_v55 = vrot.slane %v11367_v40, 2 }
0x1030   :  { %v11392_v57 = vsel %vm2460_vm7, %v2471_v49, %v11367_v40  ;;  %v11396_v58 = vsel %vm2460_vm7, %v2475_v24, %v11369_v41  ;;  %v11399_v60 = vsel %vm2460_vm7, %v2482_v50, %v2484_v48  ;;  %v11402_v61 = vsel %vm2460_vm7, %v2487_v51, %v2489_v23 }
0x1031   :  { %v11405_v62 = vsel %vm2460_vm7, %v2497_v54, %v2499_v55  ;;  %v2502_v63 = vrot.slane %v11373_v45, 3  ;;  %v2504_v0 = vrot.slane %v11369_v41, 2  ;;  %v2512_v1 = vrot.slane %v11371_v44, 4 }
0x1032   :  { %v8946_v2 = vpop.f32.mrb[22].mxu1  ;;  %v2641_v4 = vpop.f32.mrb[24].mxu0  ;;  %v2514_v5 = vrot.slane %v11367_v40, 3  ;;  %v2517_v6 = vrot.slane %v11373_v45, 4  ;;  %v2519_v7 = vrot.slane %v11369_v41, 3  ;;  %v2527_v8 = vrot.slane %v11371_v44, 5 }
0x1033   :  { %v2454_v11 = vadd.f32 %v8946_v2, %v8235_v56  ;;  %v2791_v12 = vadd.f32 %v2641_v4, %v2461_v52  ;;  %v2448_v13 = vpop.f32.mrb[23].mxu1  ;;  %v8957_v14 = vpop.f32.mrb[25].mxu0  ;;  %v11415_v15 = vsel %vm2460_vm7, %v2502_v63, %v2504_v0  ;;  %v2529_v16 = vrot.slane %v11367_v40, 4 }
0x1034   :  { %v2449_v17 = vadd.f32 %v8235_v56, %v2448_v13  ;;  %v11419_v19 = vsel %vm2460_vm7, %v2512_v1, %v2514_v5  ;;  %v11422_v20 = vsel %vm2460_vm7, %v2517_v6, %v2519_v7  ;;  %v2532_v21 = vrot.slane %v11373_v45, 5 }
0x1035   :  { %v8239_v22 = vmul.f32 -1.442695, %v2791_v12  ;;  %v2467_v26 = vrot.slane %v2454_v11, 7  ;;  %v2494_v27 = vrot.slane %v2454_v11, 1  ;;  %v2509_v28 = vrot.slane %v2454_v11, 2 }
0x1036   :  { %v2479_v9 = vrot.slane %v2449_v17, 1  ;;  %v2492_v30 = vrot.slane %v2449_v17, 2  ;;  %v2507_v10 = vrot.slane %v2449_v17, 3  ;;  %v2522_v32 = vrot.slane %v2449_v17, 4 }
0x1037   :  { %10358 = vpow2.f32 %v8239_v22  ;;  %v2469_v33 = vsel %vm2460_vm7, %v2449_v17, %v2467_v26  ;;  %v2524_v36 = vrot.slane %v2454_v11, 3  ;;  %v11427_v37 = vsel %vm2460_vm7, %v2527_v8, %v2529_v16 }
0x1038   :  { %v11430_v38 = vsel %vm2460_vm7, %v2479_v9, %v2454_v11  ;;  %v11433_v39 = vsel %vm2460_vm7, %v2492_v30, %v2494_v27  ;;  %v11436_v42 = vsel %vm2460_vm7, %v2507_v10, %v2509_v28  ;;  %v2534_v43 = vrot.slane %v11369_v41, 4 }
0x1039   :  { %v11440_v46 = vsel %vm2460_vm7, %v2522_v32, %v2524_v36  ;;  %v2537_v47 = vrot.slane %v2449_v17, 5  ;;  %v2539_v48 = vrot.slane %v2454_v11, 4  ;;  %v2542_v23 = vrot.slane %v11371_v44, 6  ;;  %v2147_v32 = vld [vmem:[#allocation14 + $0x20] sm:$0xff]  ;;  %v2148_v36 = vld [vmem:[#allocation14 + $0x28] sm:$0xff] }
0x103a   :  { %v2711_v49 = vpop.f32.mrb[24].mxu1  ;;  %v11444_v24 = vsel %vm2460_vm7, %v2532_v21, %v2534_v43  ;;  %v2544_v50 = vrot.slane %v11367_v40, 5  ;;  %v2547_v51 = vrot.slane %v11373_v45, 6  ;;  %v2549_v52 = vrot.slane %v11369_v41, 5 }
0x103b   :  { %v2798_v54 = vadd.f32 %v2711_v49, %v2465_v53  ;;  %v8968_v55 = vpop.f32.mrb[25].mxu1  ;;  %v2787_v56 = vpop.f32.mrb[26].mxu0  ;;  %v11450_v63 = vsel %vm2460_vm7, %v2537_v47, %v2539_v48  ;;  %v2552_v0 = vrot.slane %v2449_v17, 6  ;;  %v2554_v1 = vrot.slane %v2454_v11, 5 }
0x103c   :  { %v8979_v2 = vpop.f32.mrb[27].mxu0  ;;  %v11453_v4 = vsel %vm2460_vm7, %v2542_v23, %v2544_v50  ;;  %v11456_v5 = vsel %vm2460_vm7, %v2547_v51, %v2549_v52  ;;  %v2557_v6 = vrot.slane %v11371_v44, 7  ;;  %v2559_v8 = vrot.slane %v11367_v40, 6  ;;  %v11475_v40 = vld [vmem:[%s11035_s3] ss:$0 sm:$0xff]  ;;  %v2149_v50 = vld [vmem:[#allocation14 + $0x30] sm:$0xff] }
0x103d   :  { %v8240_v7 = vmul.f32 -1.442695, %v2798_v54  ;;  %v11460_v53 = vsel %vm2460_vm7, %v2552_v0, %v2554_v1  ;;  %v2562_v12 = vrot.slane %v11373_v45, 7  ;;  %v2564_v13 = vrot.slane %v11369_v41, 6  ;;  %v2150_v51 = vld [vmem:[#allocation14 + $0x38] sm:$0xff]  ;;  %v2156_v52 = vld [vmem:[#allocation16 + $0x20] sm:$0xff] }
0x103e   :  { %v2567_v14 = vrot.slane %v2449_v17, 7  ;;  %v2569_v16 = vrot.slane %v2454_v11, 6  ;;  %v11466_v21 = vsel %vm2460_vm7, %v2557_v6, %v2559_v8  ;;  %v2788_v41 = vadd.f32 %v11475_v40, %v2787_v56  ;;  %v2157_v54 = vld [vmem:[#allocation16 + $0x28] sm:$0xff]  ;;  %v2165_v55 = vld [vmem:[#allocation17 + $0x20] sm:$0xff]  ;;  %v2158_v2 = vld [vmem:[#allocation16 + $0x30] sm:$0xff] }
0x103f   :  { %10360 = vpow2.f32 %v8240_v7  ;;  %v11469_v22 = vsel %vm2460_vm7, %v2562_v12, %v2564_v13  ;;  %v11478_v23 = vpack.c.bf16 %v2148_v36, %v2147_v32  ;;  %v2166_v56 = vld [vmem:[#allocation17 + $0x28] sm:$0xff]  ;;  %v11498_v0 = vpack.c.bf16 %v2157_v54, %v2156_v52  ;;  %v2159_v6 = vld [vmem:[#allocation16 + $0x38] sm:$0xff]  ;;  %v2167_v7 = vld [vmem:[#allocation17 + $0x30] sm:$0xff] }
0x1040   :  { %v11472_v44 = vsel %vm2460_vm7, %v2567_v14, %v2569_v16  ;;  %v11500_v1 = vpack.c.bf16 %v2166_v56, %v2165_v55  ;;  %v2168_v8 = vld [vmem:[#allocation17 + $0x38] sm:$0xff]  ;;  %v11510_v12 = vpack.c.bf16 %v2159_v6, %v2158_v2  ;;  %v2174_v14 = vld [vmem:[#allocation19 + $0x20] sm:$0xff]  ;;  %v2175_v16 = vld [vmem:[#allocation19 + $0x28] sm:$0xff] }
0x1041   :  { %v10359_v26 = vpop.eup %10358  ;;  %v11512_v13 = vpack.c.bf16 %v2168_v8, %v2167_v7  ;;  %v2192_v32 = vld [vmem:[#allocation22 + $0x20] sm:$0xff]  ;;  %v2193_v36 = vld [vmem:[#allocation22 + $0x28] sm:$0xff] }
0x1042   :  { %v2795_v27 = vadd.f32 1.0, %v10359_v26  ;;  %v2183_v26 = vld [vmem:[#allocation20 + $0x20] sm:$0xff] }
0x1044   :  { %10362 = vrcp.f32 %v2795_v27  ;;  %v2184_v27 = vld [vmem:[#allocation20 + $0x28] sm:$0xff] }
0x1049   :  { %v10361_v45 = vpop.eup %10360 }
0x104a   :  { %v2802_v28 = vadd.f32 1.0, %v10361_v45  ;;  %v11522_v45 = vpack.c.bf16 %v2175_v16, %v2174_v14 }
0x104c   :  { %10364 = vrcp.f32 %v2802_v28  ;;  %v11524_v28 = vpack.c.bf16 %v2184_v27, %v2183_v26 }
0x104e   :  { %v10363_v11 = vpop.eup %10362 }
0x104f   :  { %v2805_v17 = vmul.f32 %v10363_v11, %v2788_v41  ;;  %v2176_v41 = vld [vmem:[#allocation19 + $0x30] sm:$0xff]  ;;  %v2177_v11 = vld [vmem:[#allocation19 + $0x38] sm:$0xff] }
0x1051   :  { %v2806_v9 = vadd.f32 %v2805_v17, %v2469_v33  ;;  %v11488_v33 = vpack.c.bf16 %v2150_v51, %v2149_v50  ;;  %v2185_v17 = vld [vmem:[#allocation20 + $0x30] sm:$0xff] }
0x1053   :  { %10366 = vtanh.f32 %v2806_v9  ;;  %v2186_v9 = vld [vmem:[#allocation20 + $0x38] sm:$0xff] }
0x1056   :  { %v10365_v30 = vpop.eup %10364 }
0x1057   :  { %v2808_v10 = vsub.f32 1.0, %v10365_v30  ;;  %v2810_v47 = vmul.f32 0.0, %v10365_v30  ;;  %v11534_v30 = vpack.c.bf16 %v2177_v11, %v2176_v41 }
0x105d   :  { %v10367_v43 = vpop.eup %10366 }
0x105e   :  { %v2809_v48 = vmul.f32 %v10367_v43, %v2808_v10  ;;  %v11536_v10 = vpack.c.bf16 %v2186_v9, %v2185_v17  ;;  %v11546_v43 = vpack.c.bf16 %v2193_v36, %v2192_v32  ;;  %v11576_v17 = vld [vmem:[%s12205_s0 + $0x1] ss:$0 sm:$0xff] }
0x105f   :  { %v11580_v36 = vld [vmem:[%s12206_s18 + $0x1] ss:$0 sm:$0xff] }
0x1060   :  { %v11480_v49 = vadd.f32 %v2810_v47, %v2809_v48  ;;  %v2194_v47 = vld [vmem:[#allocation22 + $0x30] sm:$0xff]  ;;  %v2195_v48 = vld [vmem:[#allocation22 + $0x38] sm:$0xff] }
0x1061   :  { %v11553_v50 = vpack.c.bf16 %v2195_v48, %v2194_v47 }
0x1062   :  { %8989 = vmatmul.mubr.msk.f32.vlgmr.msra.gmra.mrb[26].mxu1 %vm992_vm6, %v11480_v49  ;;  %9000 = vmatmul.mubr.msk.f32.vlgmr.msra.gmra.mrb[28].mxu0 %vm992_vm6, %v11480_v49 }
0x1063   :  { %9838 = vmatpush3.bf16.msra.mxu1 %v11331_v31  ;;  %9844 = vmatpush3.bf16.msra.mxu0 %v11478_v23 }
0x1064   :  { %9839 = vmatprep.subr.bf16.mxu1 %v10895_v59  ;;  %9845 = vmatprep.subr.bf16.mxu0 %v10895_v59 }
0x1065   :  { %9010 = vmatprep.mubr.msk.f32.mxu1 %vm10894_vm2, %v10893_v3  ;;  %9021 = vmatprep.mubr.msk.f32.mxu0 %vm10894_vm2, %v10893_v3 }
0x1067   :  { %9841 = vmatpush3.bf16.msra.mxu1 %v11342_v35  ;;  %9847 = vmatpush3.bf16.msra.mxu0 %v11488_v33 }
0x1068   :  { %9848 = vmatprep.subr.bf16.mxu1 %v10895_v59  ;;  %9854 = vmatprep.subr.bf16.mxu0 %v10895_v59 }
0x106a   :  { %9011 = vmatmul.mubr.msk.f32.vlgmr.msra.gmra.mrb[28].mxu1 %vm992_vm6, %v11480_v49  ;;  %9022 = vmatmul.mubr.msk.f32.vlgmr.msra.gmra.mrb[30].mxu0 %vm992_vm6, %v11480_v49 }
0x106b   :  { %9850 = vmatpush3.bf16.msra.mxu1 %v11498_v0  ;;  %9856 = vmatpush3.bf16.msra.mxu0 %v11500_v1 }
0x106c   :  { %9851 = vmatprep.subr.bf16.mxu1 %v10895_v59  ;;  %9857 = vmatprep.subr.bf16.mxu0 %v10895_v59 }
0x106d   :  { %9032 = vmatprep.mubr.msk.f32.mxu1 %vm10894_vm2, %v10893_v3  ;;  %9043 = vmatprep.mubr.msk.f32.mxu0 %vm10894_vm2, %v10893_v3 }
0x106f   :  { %9853 = vmatpush3.bf16.msra.mxu1 %v11510_v12  ;;  %9859 = vmatpush3.bf16.msra.mxu0 %v11512_v13 }
0x1070   :  { %9860 = vmatprep.subr.bf16.mxu0 %v10895_v59  ;;  %9866 = vmatprep.subr.bf16.mxu1 %v10895_v59 }
0x1072   :  { %9033 = vmatmul.mubr.msk.f32.vlgmr.msra.gmra.mrb[30].mxu1 %vm992_vm6, %v11480_v49  ;;  %9044 = vmatmul.mubr.msk.f32.vlgmr.msra.gmra.mrb[32].mxu0 %vm992_vm6, %v11480_v49 }
0x1073   :  { %9862 = vmatpush3.bf16.msra.mxu0 %v11522_v45  ;;  %9868 = vmatpush3.bf16.msra.mxu1 %v11524_v28 }
0x1074   :  { %9863 = vmatprep.subr.bf16.mxu0 %v10895_v59  ;;  %9869 = vmatprep.subr.bf16.mxu1 %v10895_v59 }
0x1075   :  { %9054 = vmatprep.mubr.msk.f32.mxu0 %vm10894_vm2, %v10893_v3  ;;  %9065 = vmatprep.mubr.msk.f32.mxu1 %vm10894_vm2, %v10893_v3 }
0x1077   :  { %9865 = vmatpush3.bf16.msra.mxu0 %v11534_v30  ;;  %9871 = vmatpush3.bf16.msra.mxu1 %v11536_v10 }
0x1078   :  { %9872 = vmatprep.subr.bf16.mxu1 %v10895_v59  ;;  %9878 = vmatprep.subr.bf16.mxu0 %v10895_v59 }
0x107a   :  { %9055 = vmatmul.mubr.f32.vlgmr.msra.gmra.mrb[30].mxu0 %v10893_v3  ;;  %9066 = vmatmul.mubr.f32.vlgmr.msra.gmra.mrb[30].mxu1 %v10893_v3 }
0x107b   :  { %9874 = vmatpush3.bf16.msra.mxu1 %v11546_v43  ;;  %9076 = vmatprep.mubr.msk.f32.mxu1 %vm10894_vm2, %v10893_v3 }
0x107c   :  { %9875 = vmatprep.subr.bf16.mxu1 %v10895_v59  ;;  %9880 = vmatpush3.bf16.msra.mxu0 %v11313_v18 }
0x107d   :  { %9881 = vmatprep.subr.bf16.mxu0 %v10895_v59  ;;  %9087 = vmatprep.mubr.msk.f32.mxu0 %vm10894_vm2, %v10893_v3 }
0x107f   :  { %9877 = vmatpush3.bf16.msra.mxu1 %v11553_v50 }
0x1080   :  { %9884 = vmatprep.subr.bf16.mxu1 %v10895_v59  ;;  %9883 = vmatpush3.bf16.msra.mxu0 %v11320_v25 }
0x1081   :  { %9890 = vmatprep.subr.bf16.mxu0 %v10895_v59 }
0x1082   :  { %9077 = vmatmul.mubr.f32.vlgmr.msra.gmra.mrb[32].mxu1 %v10893_v3 }
0x1083   :  { %9886 = vmatpush3.bf16.msra.mxu1 %v11327_v29  ;;  %9098 = vmatprep.mubr.msk.f32.mxu1 %vm10894_vm2, %v10893_v3 }
0x1084   :  { %9887 = vmatprep.subr.bf16.mxu1 %v10895_v59 }
0x1087   :  { %9889 = vmatpush3.bf16.msra.mxu1 %v11336_v34 }
0x1088   :  { %9896 = vmatprep.subr.bf16.mxu1 %v10895_v59 }
0x1135   :  { %v2881_v51 = vpop.f32.mrb[26].mxu1  ;;  %v2951_v52 = vpop.f32.mrb[28].mxu0 }
0x1136   :  { %v3025_v54 = vadd.f32 %v2881_v51, %v11392_v57  ;;  %v3032_v55 = vadd.f32 %v2951_v52, %v11396_v58  ;;  %v8990_v56 = vpop.f32.mrb[27].mxu1  ;;  %v9001_v2 = vpop.f32.mrb[29].mxu0 }
0x1138   :  { %v8244_v6 = vmul.f32 -1.442695, %v3025_v54  ;;  %v8245_v7 = vmul.f32 -1.442695, %v3032_v55 }
0x113a   :  { %10368 = vpow2.f32 %v8244_v6 }
0x113b   :  { %10370 = vpow2.f32 %v8245_v7 }
0x113d   :  { %v3021_v8 = vpop.f32.mrb[28].mxu1 }
0x113e   :  { %v9012_v14 = vpop.f32.mrb[29].mxu1  ;;  %v3022_v51 = vadd.f32 %v11475_v40, %v3021_v8 }
0x1144   :  { %v10369_v16 = vpop.eup %10368 }
0x1145   :  { %v3029_v26 = vadd.f32 1.0, %v10369_v16  ;;  %v3270_v27 = vpop.f32.mrb[32].mxu0  ;;  %v10371_v11 = vpop.eup %10370 }
0x1146   :  { %v9045_v41 = vpop.f32.mrb[33].mxu0  ;;  %v3036_v57 = vadd.f32 1.0, %v10371_v11 }
0x1147   :  { %10372 = vrcp.f32 %v3029_v26 }
0x1148   :  { %10374 = vrcp.f32 %v3036_v57 }
0x114d   :  { %v3340_v9 = vpop.f32.mrb[30].mxu0  ;;  %v3410_v58 = vpop.f32.mrb[30].mxu1 }
0x114e   :  { %v10244_v32 = vadd.f32 %v11576_v17, %v3340_v9  ;;  %v9056_v47 = vpop.f32.mrb[31].mxu0  ;;  %v9067_v48 = vpop.f32.mrb[31].mxu1  ;;  %v10245_v55 = vadd.f32 %v11580_v36, %v3410_v58 }
0x1150   :  { %v8253_v52 = vmul.f32 -1.442695, %v10244_v32  ;;  %v8254_v6 = vmul.f32 -1.442695, %v10245_v55 }
0x1151   :  { %v10373_v54 = vpop.eup %10372 }
0x1152   :  { %v3039_v56 = vmul.f32 %v10373_v54, %v3022_v51  ;;  %10376 = vpow2.f32 %v8253_v52  ;;  %v10375_v16 = vpop.eup %10374 }
0x1153   :  { %v3042_v8 = vsub.f32 1.0, %v10375_v16  ;;  %v3044_v57 = vmul.f32 %v10375_v16, %v11480_v49  ;;  %v11599_v49 = vld [vmem:[%s12207_s17 + $0x1] ss:$0 sm:$0xff] }
0x1154   :  { %v3040_v2 = vadd.f32 %v3039_v56, %v11430_v38  ;;  %v11589_v38 = vld [vmem:[%s11035_s3 + $0x1] ss:$0 sm:$0xff]  ;;  %v3271_v52 = vadd.f32 %v11599_v49, %v3270_v27 }
0x1155   :  { %v3486_v7 = vpop.f32.mrb[32].mxu1 }
0x1156   :  { %10378 = vtanh.f32 %v3040_v2  ;;  %v9078_v14 = vpop.f32.mrb[33].mxu1  ;;  %v3487_v48 = vadd.f32 %v11589_v38, %v3486_v7 }
0x1157   :  { %10380 = vpow2.f32 %v8254_v6 }
0x115c   :  { %v10377_v26 = vpop.eup %10376 }
0x115d   :  { %v3494_v41 = vadd.f32 1.0, %v10377_v26 }
0x115f   :  { %10382 = vrcp.f32 %v3494_v41 }
0x1160   :  { %v10379_v11 = vpop.eup %10378 }
0x1161   :  { %v3043_v9 = vmul.f32 %v10379_v11, %v3042_v8  ;;  %v10381_v58 = vpop.eup %10380 }
0x1162   :  { %v3501_v47 = vadd.f32 1.0, %v10381_v58 }
0x1163   :  { %v11586_v32 = vadd.f32 %v3044_v57, %v3043_v9 }
0x1164   :  { %10384 = vrcp.f32 %v3501_v47 }
0x1165   :  { %9088 = vmatmul.mubr.msk.f32.vlgmr.msra.gmra.mrb[34].mxu0 %vm992_vm6, %v11586_v32  ;;  %9099 = vmatmul.mubr.msk.f32.vlgmr.msra.gmra.mrb[34].mxu1 %vm992_vm6, %v11586_v32 }
0x1166   :  { %9892 = vmatpush3.bf16.msra.mxu0 %v11331_v31  ;;  %9898 = vmatpush3.bf16.msra.mxu1 %v11478_v23 }
0x1167   :  { %9893 = vmatprep.subr.bf16.mxu0 %v10895_v59  ;;  %9899 = vmatprep.subr.bf16.mxu1 %v10895_v59 }
0x1168   :  { %9109 = vmatprep.mubr.msk.f32.mxu0 %vm10894_vm2, %v10893_v3  ;;  %9120 = vmatprep.mubr.msk.f32.mxu1 %vm10894_vm2, %v10893_v3 }
0x1169   :  { %v10383_v51 = vpop.eup %10382 }
0x116a   :  { %v3504_v54 = vmul.f32 %v10383_v51, %v3487_v48  ;;  %9895 = vmatpush3.bf16.msra.mxu0 %v11342_v35  ;;  %9901 = vmatpush3.bf16.msra.mxu1 %v11488_v33 }
0x116b   :  { %9902 = vmatprep.subr.bf16.mxu0 %v10895_v59  ;;  %9908 = vmatprep.subr.bf16.mxu1 %v10895_v59 }
0x116c   :  { %v3505_v55 = vadd.f32 %v3504_v54, %v3271_v52 }
0x116d   :  { %9110 = vmatmul.mubr.msk.f32.vlgmr.msra.gmra.mrb[36].mxu0 %vm992_vm6, %v11586_v32  ;;  %9121 = vmatmul.mubr.msk.f32.vlgmr.msra.gmra.mrb[36].mxu1 %vm992_vm6, %v11586_v32 }
0x116e   :  { %10386 = vtanh.f32 %v3505_v55  ;;  %9904 = vmatpush3.bf16.msra.mxu0 %v11498_v0  ;;  %9910 = vmatpush3.bf16.msra.mxu1 %v11500_v1  ;;  %v10385_v27 = vpop.eup %10384 }
0x116f   :  { %9905 = vmatprep.subr.bf16.mxu0 %v10895_v59  ;;  %9911 = vmatprep.subr.bf16.mxu1 %v10895_v59  ;;  %v3507_v56 = vsub.f32 1.0, %v10385_v27  ;;  %v3509_v7 = vmul.f32 0.0, %v10385_v27 }
0x1170   :  { %9131 = vmatprep.mubr.msk.f32.mxu0 %vm10894_vm2, %v10893_v3  ;;  %9142 = vmatprep.mubr.msk.f32.mxu1 %vm10894_vm2, %v10893_v3 }
0x1172   :  { %9907 = vmatpush3.bf16.msra.mxu0 %v11510_v12  ;;  %9913 = vmatpush3.bf16.msra.mxu1 %v11512_v13 }
0x1173   :  { %9914 = vmatprep.subr.bf16.mxu1 %v10895_v59  ;;  %9920 = vmatprep.subr.bf16.mxu0 %v10895_v59 }
0x1175   :  { %9132 = vmatmul.mubr.msk.f32.vlgmr.msra.gmra.mrb[38].mxu0 %vm992_vm6, %v11586_v32  ;;  %9143 = vmatmul.mubr.msk.f32.vlgmr.msra.gmra.mrb[38].mxu1 %vm992_vm6, %v11586_v32 }
0x1176   :  { %9916 = vmatpush3.bf16.msra.mxu1 %v11522_v45  ;;  %9922 = vmatpush3.bf16.msra.mxu0 %v11524_v28 }
0x1177   :  { %9917 = vmatprep.subr.bf16.mxu1 %v10895_v59  ;;  %9923 = vmatprep.subr.bf16.mxu0 %v10895_v59 }
0x1178   :  { %v10387_v2 = vpop.eup %10386  ;;  %9153 = vmatprep.mubr.msk.f32.mxu1 %vm10894_vm2, %v10893_v3  ;;  %9164 = vmatprep.mubr.msk.f32.mxu0 %vm10894_vm2, %v10893_v3 }
0x1179   :  { %v3508_v6 = vmul.f32 %v10387_v2, %v3507_v56 }
0x117a   :  { %9919 = vmatpush3.bf16.msra.mxu1 %v11534_v30  ;;  %9925 = vmatpush3.bf16.msra.mxu0 %v11536_v10 }
0x117b   :  { %v11642_v14 = vadd.f32 %v3509_v7, %v3508_v6  ;;  %9926 = vmatprep.subr.bf16.mxu0 %v10895_v59  ;;  %9932 = vmatprep.subr.bf16.mxu1 %v10895_v59 }
0x117d   :  { %9154 = vmatmul.mubr.msk.f32.vlgmr.msra.gmra.mrb[36].mxu1 %vm992_vm6, %v11642_v14  ;;  %9165 = vmatmul.mubr.msk.f32.vlgmr.msra.gmra.mrb[38].mxu0 %vm992_vm6, %v11642_v14 }
0x117e   :  { %9928 = vmatpush3.bf16.msra.mxu0 %v11546_v43  ;;  %9175 = vmatprep.mubr.msk.f32.mxu0 %vm10894_vm2, %v10893_v3 }
0x117f   :  { %9929 = vmatprep.subr.bf16.mxu0 %v10895_v59  ;;  %9934 = vmatpush3.bf16.msra.mxu1 %v11313_v18 }
0x1180   :  { %9935 = vmatprep.subr.bf16.mxu1 %v10895_v59  ;;  %9186 = vmatprep.mubr.msk.f32.mxu1 %vm10894_vm2, %v10893_v3 }
0x1182   :  { %9931 = vmatpush3.bf16.msra.mxu0 %v11553_v50 }
0x1183   :  { %9938 = vmatprep.subr.bf16.mxu0 %v10895_v59  ;;  %9937 = vmatpush3.bf16.msra.mxu1 %v11320_v25 }
0x1184   :  { %9944 = vmatprep.subr.bf16.mxu1 %v10895_v59 }
0x1185   :  { %9176 = vmatmul.mubr.msk.f32.vlgmr.msra.gmra.mrb[40].mxu0 %vm992_vm6, %v11642_v14 }
0x1186   :  { %9940 = vmatpush3.bf16.msra.mxu0 %v11327_v29  ;;  %9197 = vmatprep.mubr.msk.f32.mxu0 %vm10894_vm2, %v10893_v3 }
0x1187   :  { %9941 = vmatprep.subr.bf16.mxu0 %v10895_v59 }
0x118a   :  { %9943 = vmatpush3.bf16.msra.mxu0 %v11336_v34 }
0x118b   :  { %9950 = vmatprep.subr.bf16.mxu0 %v10895_v59 }
0x1238   :  { %v3580_v16 = vpop.f32.mrb[34].mxu0  ;;  %v3650_v26 = vpop.f32.mrb[34].mxu1 }
0x1239   :  { %v3724_v41 = vadd.f32 %v3580_v16, %v11399_v60  ;;  %v3731_v8 = vadd.f32 %v3650_v26, %v11402_v61  ;;  %v9089_v11 = vpop.f32.mrb[35].mxu0  ;;  %v9100_v57 = vpop.f32.mrb[35].mxu1 }
0x123b   :  { %v8258_v9 = vmul.f32 -1.442695, %v3724_v41  ;;  %v8259_v58 = vmul.f32 -1.442695, %v3731_v8 }
0x123d   :  { %10388 = vpow2.f32 %v8258_v9 }
0x123e   :  { %10390 = vpow2.f32 %v8259_v58 }
0x1240   :  { %v3720_v47 = vpop.f32.mrb[36].mxu0 }
0x1241   :  { %v9111_v48 = vpop.f32.mrb[37].mxu0  ;;  %v3721_v16 = vadd.f32 %v11475_v40, %v3720_v47 }
0x1247   :  { %v10389_v51 = vpop.eup %10388 }
0x1248   :  { %v3728_v52 = vadd.f32 1.0, %v10389_v51  ;;  %v3951_v54 = vpop.f32.mrb[38].mxu1  ;;  %v10391_v27 = vpop.eup %10390 }
0x1249   :  { %v9144_v55 = vpop.f32.mrb[39].mxu1  ;;  %v3735_v56 = vadd.f32 1.0, %v10391_v27 }
0x124a   :  { %10392 = vrcp.f32 %v3728_v52 }
0x124b   :  { %10394 = vrcp.f32 %v3735_v56 }
0x1250   :  { %v4024_v2 = vpop.f32.mrb[36].mxu1  ;;  %v4094_v6 = vpop.f32.mrb[38].mxu0 }
0x1251   :  { %v10246_v60 = vadd.f32 %v11576_v17, %v4024_v2  ;;  %v9155_v61 = vpop.f32.mrb[37].mxu1  ;;  %v9166_v7 = vpop.f32.mrb[39].mxu0  ;;  %v10247_v8 = vadd.f32 %v11580_v36, %v4094_v6 }
0x1252   :  { %v3952_v7 = vadd.f32 %v11599_v49, %v3951_v54 }
0x1253   :  { %v8266_v26 = vmul.f32 -1.442695, %v10246_v60  ;;  %v8267_v9 = vmul.f32 -1.442695, %v10247_v8 }
0x1254   :  { %v10393_v41 = vpop.eup %10392 }
0x1255   :  { %v3738_v11 = vmul.f32 %v10393_v41, %v3721_v16  ;;  %10396 = vpow2.f32 %v8266_v26  ;;  %v10395_v51 = vpop.eup %10394 }
0x1256   :  { %v3741_v27 = vsub.f32 1.0, %v10395_v51  ;;  %v3743_v2 = vmul.f32 %v10395_v51, %v11586_v32 }
0x1257   :  { %v3739_v57 = vadd.f32 %v3738_v11, %v11433_v39 }
0x1258   :  { %v4164_v58 = vpop.f32.mrb[40].mxu0 }
0x1259   :  { %10398 = vtanh.f32 %v3739_v57  ;;  %v9177_v48 = vpop.f32.mrb[41].mxu0  ;;  %v4165_v32 = vadd.f32 %v11589_v38, %v4164_v58 }
0x125a   :  { %10400 = vpow2.f32 %v8267_v9 }
0x125f   :  { %v10397_v52 = vpop.eup %10396 }
0x1260   :  { %v4172_v55 = vadd.f32 1.0, %v10397_v52 }
0x1262   :  { %10402 = vrcp.f32 %v4172_v55 }
0x1263   :  { %v10399_v47 = vpop.eup %10398 }
0x1264   :  { %v3742_v56 = vmul.f32 %v10399_v47, %v3741_v27  ;;  %v10401_v60 = vpop.eup %10400 }
0x1265   :  { %v4179_v39 = vadd.f32 1.0, %v10401_v60 }
0x1266   :  { %v11677_v6 = vadd.f32 %v3743_v2, %v3742_v56 }
0x1267   :  { %10404 = vrcp.f32 %v4179_v39 }
0x1268   :  { %9187 = vmatmul.mubr.msk.f32.vlgmr.msra.gmra.mrb[40].mxu1 %vm992_vm6, %v11677_v6  ;;  %9198 = vmatmul.mubr.msk.f32.vlgmr.msra.gmra.mrb[42].mxu0 %vm992_vm6, %v11677_v6 }
0x1269   :  { %9946 = vmatpush3.bf16.msra.mxu1 %v11331_v31  ;;  %9952 = vmatpush3.bf16.msra.mxu0 %v11478_v23 }
0x126a   :  { %9947 = vmatprep.subr.bf16.mxu1 %v10895_v59  ;;  %9953 = vmatprep.subr.bf16.mxu0 %v10895_v59 }
0x126b   :  { %9208 = vmatprep.mubr.msk.f32.mxu1 %vm10894_vm2, %v10893_v3  ;;  %9219 = vmatprep.mubr.msk.f32.mxu0 %vm10894_vm2, %v10893_v3 }
0x126c   :  { %v10403_v61 = vpop.eup %10402 }
0x126d   :  { %v4182_v16 = vmul.f32 %v10403_v61, %v4165_v32  ;;  %9949 = vmatpush3.bf16.msra.mxu1 %v11342_v35  ;;  %9955 = vmatpush3.bf16.msra.mxu0 %v11488_v33 }
0x126e   :  { %9956 = vmatprep.subr.bf16.mxu1 %v10895_v59  ;;  %9962 = vmatprep.subr.bf16.mxu0 %v10895_v59 }
0x126f   :  { %v4183_v26 = vadd.f32 %v4182_v16, %v3952_v7 }
0x1270   :  { %9209 = vmatmul.mubr.msk.f32.vlgmr.msra.gmra.mrb[42].mxu1 %vm992_vm6, %v11677_v6  ;;  %9220 = vmatmul.mubr.msk.f32.vlgmr.msra.gmra.mrb[44].mxu0 %vm992_vm6, %v11677_v6 }
0x1271   :  { %10406 = vtanh.f32 %v4183_v26  ;;  %9958 = vmatpush3.bf16.msra.mxu1 %v11498_v0  ;;  %9964 = vmatpush3.bf16.msra.mxu0 %v11500_v1  ;;  %v10405_v54 = vpop.eup %10404 }
0x1272   :  { %9959 = vmatprep.subr.bf16.mxu1 %v10895_v59  ;;  %9965 = vmatprep.subr.bf16.mxu0 %v10895_v59  ;;  %v4185_v41 = vsub.f32 1.0, %v10405_v54  ;;  %v4187_v57 = vmul.f32 %v10405_v54, %v11642_v14 }
0x1273   :  { %9230 = vmatprep.mubr.msk.f32.mxu1 %vm10894_vm2, %v10893_v3  ;;  %9241 = vmatprep.mubr.msk.f32.mxu0 %vm10894_vm2, %v10893_v3 }
0x1275   :  { %9961 = vmatpush3.bf16.msra.mxu1 %v11510_v12  ;;  %9967 = vmatpush3.bf16.msra.mxu0 %v11512_v13 }
0x1276   :  { %9968 = vmatprep.subr.bf16.mxu0 %v10895_v59  ;;  %9974 = vmatprep.subr.bf16.mxu1 %v10895_v59 }
0x1278   :  { %9231 = vmatmul.mubr.msk.f32.vlgmr.msra.gmra.mrb[44].mxu1 %vm992_vm6, %v11677_v6  ;;  %9242 = vmatmul.mubr.msk.f32.vlgmr.msra.gmra.mrb[46].mxu0 %vm992_vm6, %v11677_v6 }
0x1279   :  { %9970 = vmatpush3.bf16.msra.mxu0 %v11522_v45  ;;  %9976 = vmatpush3.bf16.msra.mxu1 %v11524_v28 }
0x127a   :  { %9971 = vmatprep.subr.bf16.mxu0 %v10895_v59  ;;  %9977 = vmatprep.subr.bf16.mxu1 %v10895_v59 }
0x127b   :  { %v10407_v8 = vpop.eup %10406  ;;  %9252 = vmatprep.mubr.msk.f32.mxu0 %vm10894_vm2, %v10893_v3  ;;  %9263 = vmatprep.mubr.msk.f32.mxu1 %vm10894_vm2, %v10893_v3 }
0x127c   :  { %v4186_v11 = vmul.f32 %v10407_v8, %v4185_v41 }
0x127d   :  { %9973 = vmatpush3.bf16.msra.mxu0 %v11534_v30  ;;  %9979 = vmatpush3.bf16.msra.mxu1 %v11536_v10 }
0x127e   :  { %v11728_v9 = vadd.f32 %v4187_v57, %v4186_v11  ;;  %9980 = vmatprep.subr.bf16.mxu1 %v10895_v59  ;;  %9986 = vmatprep.subr.bf16.mxu0 %v10895_v59 }
0x1280   :  { %9253 = vmatmul.mubr.msk.f32.vlgmr.msra.gmra.mrb[44].mxu0 %vm992_vm6, %v11728_v9  ;;  %9264 = vmatmul.mubr.msk.f32.vlgmr.msra.gmra.mrb[44].mxu1 %vm992_vm6, %v11728_v9 }
0x1281   :  { %9982 = vmatpush3.bf16.msra.mxu1 %v11546_v43  ;;  %9274 = vmatprep.mubr.msk.f32.mxu1 %vm10894_vm2, %v10893_v3 }
0x1282   :  { %9983 = vmatprep.subr.bf16.mxu1 %v10895_v59  ;;  %9988 = vmatpush3.bf16.msra.mxu0 %v11313_v18 }
0x1283   :  { %9989 = vmatprep.subr.bf16.mxu0 %v10895_v59  ;;  %9285 = vmatprep.mubr.msk.f32.mxu0 %vm10894_vm2, %v10893_v3 }
0x1285   :  { %9985 = vmatpush3.bf16.msra.mxu1 %v11553_v50 }
0x1286   :  { %9992 = vmatprep.subr.bf16.mxu1 %v10895_v59  ;;  %9991 = vmatpush3.bf16.msra.mxu0 %v11320_v25 }
0x1287   :  { %9998 = vmatprep.subr.bf16.mxu0 %v10895_v59 }
0x1288   :  { %9275 = vmatmul.mubr.msk.f32.vlgmr.msra.gmra.mrb[46].mxu1 %vm992_vm6, %v11728_v9 }
0x1289   :  { %9994 = vmatpush3.bf16.msra.mxu1 %v11327_v29  ;;  %9296 = vmatprep.mubr.msk.f32.mxu1 %vm10894_vm2, %v10893_v3 }
0x128a   :  { %9995 = vmatprep.subr.bf16.mxu1 %v10895_v59 }
0x128d   :  { %9997 = vmatpush3.bf16.msra.mxu1 %v11336_v34 }
0x128e   :  { %10004 = vmatprep.subr.bf16.mxu1 %v10895_v59 }
0x133b   :  { %v4258_v14 = vpop.f32.mrb[40].mxu1  ;;  %v4328_v58 = vpop.f32.mrb[42].mxu0 }
0x133c   :  { %v4402_v48 = vadd.f32 %v4258_v14, %v11405_v62  ;;  %v4409_v51 = vadd.f32 %v4328_v58, %v11415_v15  ;;  %v9188_v52 = vpop.f32.mrb[41].mxu1  ;;  %v9199_v55 = vpop.f32.mrb[43].mxu0 }
0x133e   :  { %v8271_v27 = vmul.f32 -1.442695, %v4402_v48  ;;  %v8272_v47 = vmul.f32 -1.442695, %v4409_v51 }
0x1340   :  { %10408 = vpow2.f32 %v8271_v27 }
0x1341   :  { %10410 = vpow2.f32 %v8272_v47 }
0x1343   :  { %v4398_v2 = vpop.f32.mrb[42].mxu1 }
0x1344   :  { %v9210_v56 = vpop.f32.mrb[43].mxu1  ;;  %v4399_v8 = vadd.f32 %v11475_v40, %v4398_v2 }
0x134a   :  { %v10409_v60 = vpop.eup %10408 }
0x134b   :  { %v4406_v39 = vadd.f32 1.0, %v10409_v60  ;;  %v4629_v32 = vpop.f32.mrb[46].mxu0  ;;  %v10411_v7 = vpop.eup %10410 }
0x134c   :  { %v9243_v61 = vpop.f32.mrb[47].mxu0  ;;  %v4413_v16 = vadd.f32 1.0, %v10411_v7 }
0x134d   :  { %10412 = vrcp.f32 %v4406_v39 }
0x134e   :  { %10414 = vrcp.f32 %v4413_v16 }
0x1353   :  { %v4702_v26 = vpop.f32.mrb[44].mxu0  ;;  %v4772_v54 = vpop.f32.mrb[44].mxu1 }
0x1354   :  { %v10248_v62 = vadd.f32 %v11576_v17, %v4702_v26  ;;  %v9254_v15 = vpop.f32.mrb[45].mxu0  ;;  %v9265_v41 = vpop.f32.mrb[45].mxu1  ;;  %v10249_v14 = vadd.f32 %v11580_v36, %v4772_v54  ;;  %v4630_v54 = vadd.f32 %v11599_v49, %v4629_v32 }
0x1356   :  { %v8279_v11 = vmul.f32 -1.442695, %v10248_v62  ;;  %v8280_v51 = vmul.f32 -1.442695, %v10249_v14 }
0x1357   :  { %v10413_v57 = vpop.eup %10412 }
0x1358   :  { %v4416_v58 = vmul.f32 %v10413_v57, %v4399_v8  ;;  %10416 = vpow2.f32 %v8279_v11  ;;  %v10415_v27 = vpop.eup %10414 }
0x1359   :  { %v4419_v60 = vsub.f32 1.0, %v10415_v27  ;;  %v4421_v39 = vmul.f32 %v10415_v27, %v11677_v6 }
0x135a   :  { %v4417_v48 = vadd.f32 %v4416_v58, %v11436_v42 }
0x135b   :  { %v4842_v52 = vpop.f32.mrb[46].mxu1 }
0x135c   :  { %10418 = vtanh.f32 %v4417_v48  ;;  %v9276_v55 = vpop.f32.mrb[47].mxu1  ;;  %v4843_v6 = vadd.f32 %v11589_v38, %v4842_v52 }
0x135d   :  { %10420 = vpow2.f32 %v8280_v51 }
0x1362   :  { %v10417_v47 = vpop.eup %10416 }
0x1363   :  { %v4850_v56 = vadd.f32 1.0, %v10417_v47 }
0x1365   :  { %10422 = vrcp.f32 %v4850_v56 }
0x1366   :  { %v10419_v2 = vpop.eup %10418 }
0x1367   :  { %v4420_v61 = vmul.f32 %v10419_v2, %v4419_v60  ;;  %v10421_v7 = vpop.eup %10420 }
0x1368   :  { %v4857_v42 = vadd.f32 1.0, %v10421_v7 }
0x1369   :  { %v11763_v16 = vadd.f32 %v4421_v39, %v4420_v61 }
0x136a   :  { %10424 = vrcp.f32 %v4857_v42 }
0x136b   :  { %9286 = vmatmul.mubr.msk.f32.vlgmr.msra.gmra.mrb[48].mxu0 %vm992_vm6, %v11763_v16  ;;  %9297 = vmatmul.mubr.msk.f32.vlgmr.msra.gmra.mrb[48].mxu1 %vm992_vm6, %v11763_v16 }
0x136c   :  { %10000 = vmatpush3.bf16.msra.mxu0 %v11331_v31  ;;  %10006 = vmatpush3.bf16.msra.mxu1 %v11478_v23 }
0x136d   :  { %10001 = vmatprep.subr.bf16.mxu0 %v10895_v59  ;;  %10007 = vmatprep.subr.bf16.mxu1 %v10895_v59 }
0x136e   :  { %9307 = vmatprep.mubr.msk.f32.mxu0 %vm10894_vm2, %v10893_v3  ;;  %9318 = vmatprep.mubr.msk.f32.mxu1 %vm10894_vm2, %v10893_v3 }
0x136f   :  { %v10423_v26 = vpop.eup %10422 }
0x1370   :  { %v4860_v62 = vmul.f32 %v10423_v26, %v4843_v6  ;;  %10003 = vmatpush3.bf16.msra.mxu0 %v11342_v35  ;;  %10009 = vmatpush3.bf16.msra.mxu1 %v11488_v33 }
0x1371   :  { %10010 = vmatprep.subr.bf16.mxu0 %v10895_v59  ;;  %10016 = vmatprep.subr.bf16.mxu1 %v10895_v59 }
0x1372   :  { %v4861_v15 = vadd.f32 %v4860_v62, %v4630_v54 }
0x1373   :  { %9308 = vmatmul.mubr.msk.f32.vlgmr.msra.gmra.mrb[50].mxu0 %vm992_vm6, %v11763_v16  ;;  %9319 = vmatmul.mubr.msk.f32.vlgmr.msra.gmra.mrb[50].mxu1 %vm992_vm6, %v11763_v16 }
0x1374   :  { %10426 = vtanh.f32 %v4861_v15  ;;  %10012 = vmatpush3.bf16.msra.mxu0 %v11498_v0  ;;  %10018 = vmatpush3.bf16.msra.mxu1 %v11500_v1  ;;  %v10425_v32 = vpop.eup %10424 }
0x1375   :  { %10013 = vmatprep.subr.bf16.mxu0 %v10895_v59  ;;  %10019 = vmatprep.subr.bf16.mxu1 %v10895_v59  ;;  %v4863_v41 = vsub.f32 1.0, %v10425_v32  ;;  %v4865_v57 = vmul.f32 %v10425_v32, %v11728_v9 }
0x1376   :  { %9329 = vmatprep.mubr.msk.f32.mxu0 %vm10894_vm2, %v10893_v3  ;;  %9340 = vmatprep.mubr.msk.f32.mxu1 %vm10894_vm2, %v10893_v3 }
0x1378   :  { %10015 = vmatpush3.bf16.msra.mxu0 %v11510_v12  ;;  %10021 = vmatpush3.bf16.msra.mxu1 %v11512_v13 }
0x1379   :  { %10022 = vmatprep.subr.bf16.mxu1 %v10895_v59  ;;  %10028 = vmatprep.subr.bf16.mxu0 %v10895_v59 }
0x137b   :  { %9330 = vmatmul.mubr.msk.f32.vlgmr.msra.gmra.mrb[52].mxu0 %vm992_vm6, %v11763_v16  ;;  %9341 = vmatmul.mubr.msk.f32.vlgmr.msra.gmra.mrb[52].mxu1 %vm992_vm6, %v11763_v16 }
0x137c   :  { %10024 = vmatpush3.bf16.msra.mxu1 %v11522_v45  ;;  %10030 = vmatpush3.bf16.msra.mxu0 %v11524_v28 }
0x137d   :  { %10025 = vmatprep.subr.bf16.mxu1 %v10895_v59  ;;  %10031 = vmatprep.subr.bf16.mxu0 %v10895_v59 }
0x137e   :  { %v10427_v8 = vpop.eup %10426  ;;  %9351 = vmatprep.mubr.msk.f32.mxu1 %vm10894_vm2, %v10893_v3  ;;  %9362 = vmatprep.mubr.msk.f32.mxu0 %vm10894_vm2, %v10893_v3 }
0x137f   :  { %v4864_v11 = vmul.f32 %v10427_v8, %v4863_v41 }
0x1380   :  { %10027 = vmatpush3.bf16.msra.mxu1 %v11534_v30  ;;  %10033 = vmatpush3.bf16.msra.mxu0 %v11536_v10 }
0x1381   :  { %v11814_v14 = vadd.f32 %v4865_v57, %v4864_v11  ;;  %10034 = vmatprep.subr.bf16.mxu0 %v10895_v59  ;;  %10040 = vmatprep.subr.bf16.mxu1 %v10895_v59 }
0x1383   :  { %9352 = vmatmul.mubr.msk.f32.vlgmr.msra.gmra.mrb[50].mxu1 %vm992_vm6, %v11814_v14  ;;  %9363 = vmatmul.mubr.msk.f32.vlgmr.msra.gmra.mrb[52].mxu0 %vm992_vm6, %v11814_v14 }
0x1384   :  { %10036 = vmatpush3.bf16.msra.mxu0 %v11546_v43  ;;  %9373 = vmatprep.mubr.msk.f32.mxu0 %vm10894_vm2, %v10893_v3 }
0x1385   :  { %10037 = vmatprep.subr.bf16.mxu0 %v10895_v59  ;;  %10042 = vmatpush3.bf16.msra.mxu1 %v11313_v18 }
0x1386   :  { %10043 = vmatprep.subr.bf16.mxu1 %v10895_v59  ;;  %9384 = vmatprep.mubr.msk.f32.mxu1 %vm10894_vm2, %v10893_v3 }
0x1388   :  { %10039 = vmatpush3.bf16.msra.mxu0 %v11553_v50 }
0x1389   :  { %10046 = vmatprep.subr.bf16.mxu0 %v10895_v59  ;;  %10045 = vmatpush3.bf16.msra.mxu1 %v11320_v25 }
0x138a   :  { %10052 = vmatprep.subr.bf16.mxu1 %v10895_v59 }
0x138b   :  { %9374 = vmatmul.mubr.msk.f32.vlgmr.msra.gmra.mrb[54].mxu0 %vm992_vm6, %v11814_v14 }
0x138c   :  { %10048 = vmatpush3.bf16.msra.mxu0 %v11327_v29  ;;  %9395 = vmatprep.mubr.msk.f32.mxu0 %vm10894_vm2, %v10893_v3 }
0x138d   :  { %10049 = vmatprep.subr.bf16.mxu0 %v10895_v59 }
0x1390   :  { %10051 = vmatpush3.bf16.msra.mxu0 %v11336_v34 }
0x1391   :  { %10058 = vmatprep.subr.bf16.mxu0 %v10895_v59 }
0x143e   :  { %v4936_v9 = vpop.f32.mrb[48].mxu0  ;;  %v5006_v58 = vpop.f32.mrb[48].mxu1 }
0x143f   :  { %v5080_v48 = vadd.f32 %v4936_v9, %v11419_v19  ;;  %v5087_v51 = vadd.f32 %v5006_v58, %v11422_v20  ;;  %v9287_v52 = vpop.f32.mrb[49].mxu0  ;;  %v9298_v55 = vpop.f32.mrb[49].mxu1 }
0x1441   :  { %v8284_v27 = vmul.f32 -1.442695, %v5080_v48  ;;  %v8285_v47 = vmul.f32 -1.442695, %v5087_v51 }
0x1443   :  { %10428 = vpow2.f32 %v8284_v27 }
0x1444   :  { %10430 = vpow2.f32 %v8285_v47 }
0x1446   :  { %v5076_v56 = vpop.f32.mrb[50].mxu0 }
0x1447   :  { %v9309_v60 = vpop.f32.mrb[51].mxu0  ;;  %v5077_v15 = vadd.f32 %v11475_v40, %v5076_v56 }
0x144d   :  { %v10429_v2 = vpop.eup %10428 }
0x144e   :  { %v5084_v39 = vadd.f32 1.0, %v10429_v2  ;;  %v5307_v61 = vpop.f32.mrb[52].mxu1  ;;  %v10431_v42 = vpop.eup %10430 }
0x144f   :  { %v9342_v7 = vpop.f32.mrb[53].mxu1  ;;  %v5091_v6 = vadd.f32 1.0, %v10431_v42 }
0x1450   :  { %10432 = vrcp.f32 %v5084_v39  ;;  %v5308_v7 = vadd.f32 %v11599_v49, %v5307_v61 }
0x1451   :  { %10434 = vrcp.f32 %v5091_v6 }
0x1456   :  { %v5380_v26 = vpop.f32.mrb[50].mxu1  ;;  %v5450_v54 = vpop.f32.mrb[52].mxu0 }
0x1457   :  { %v10250_v19 = vadd.f32 %v11576_v17, %v5380_v26  ;;  %v9353_v20 = vpop.f32.mrb[51].mxu1  ;;  %v9364_v62 = vpop.f32.mrb[53].mxu0  ;;  %v10251_v8 = vadd.f32 %v11580_v36, %v5450_v54 }
0x1459   :  { %v8292_v32 = vmul.f32 -1.442695, %v10250_v19  ;;  %v8293_v9 = vmul.f32 -1.442695, %v10251_v8 }
0x145a   :  { %v10433_v41 = vpop.eup %10432 }
0x145b   :  { %v5094_v11 = vmul.f32 %v10433_v41, %v5077_v15  ;;  %10436 = vpow2.f32 %v8292_v32  ;;  %v10435_v51 = vpop.eup %10434 }
0x145c   :  { %v5097_v27 = vsub.f32 1.0, %v10435_v51  ;;  %v5099_v47 = vmul.f32 %v10435_v51, %v11763_v16 }
0x145d   :  { %v5095_v57 = vadd.f32 %v5094_v11, %v11440_v46 }
0x145e   :  { %v5520_v58 = vpop.f32.mrb[54].mxu0 }
0x145f   :  { %10438 = vtanh.f32 %v5095_v57  ;;  %v9375_v48 = vpop.f32.mrb[55].mxu0  ;;  %v5521_v16 = vadd.f32 %v11589_v38, %v5520_v58 }
0x1460   :  { %10440 = vpow2.f32 %v8293_v9 }
0x1465   :  { %v10437_v52 = vpop.eup %10436 }
0x1466   :  { %v5528_v55 = vadd.f32 1.0, %v10437_v52 }
0x1468   :  { %10442 = vrcp.f32 %v5528_v55 }
0x1469   :  { %v10439_v40 = vpop.eup %10438 }
0x146a   :  { %v5098_v56 = vmul.f32 %v10439_v40, %v5097_v27  ;;  %v10441_v60 = vpop.eup %10440 }
0x146b   :  { %v5535_v46 = vadd.f32 1.0, %v10441_v60 }
0x146c   :  { %v11849_v2 = vadd.f32 %v5099_v47, %v5098_v56 }
0x146d   :  { %10444 = vrcp.f32 %v5535_v46 }
0x146e   :  { %9385 = vmatmul.mubr.msk.f32.vlgmr.msra.gmra.mrb[54].mxu1 %vm992_vm6, %v11849_v2  ;;  %9396 = vmatmul.mubr.msk.f32.vlgmr.msra.gmra.mrb[56].mxu0 %vm992_vm6, %v11849_v2 }
0x146f   :  { %10054 = vmatpush3.bf16.msra.mxu1 %v11331_v31  ;;  %10060 = vmatpush3.bf16.msra.mxu0 %v11478_v23 }
0x1470   :  { %10055 = vmatprep.subr.bf16.mxu1 %v10895_v59  ;;  %10061 = vmatprep.subr.bf16.mxu0 %v10895_v59 }
0x1471   :  { %9406 = vmatprep.mubr.msk.f32.mxu1 %vm10894_vm2, %v10893_v3  ;;  %9417 = vmatprep.mubr.msk.f32.mxu0 %vm10894_vm2, %v10893_v3 }
0x1472   :  { %v10443_v39 = vpop.eup %10442 }
0x1473   :  { %v5538_v42 = vmul.f32 %v10443_v39, %v5521_v16  ;;  %10057 = vmatpush3.bf16.msra.mxu1 %v11342_v35  ;;  %10063 = vmatpush3.bf16.msra.mxu0 %v11488_v33  ;;  %v11932_v16 = vld [vmem:[%s11035_s3] ss:$0 sm:$0xff] }
0x1474   :  { %10064 = vmatprep.subr.bf16.mxu1 %v10895_v59  ;;  %10070 = vmatprep.subr.bf16.mxu0 %v10895_v59 }
0x1475   :  { %v5539_v6 = vadd.f32 %v5538_v42, %v5308_v7 }
0x1476   :  { %9407 = vmatmul.mubr.msk.f32.vlgmr.msra.gmra.mrb[56].mxu1 %vm992_vm6, %v11849_v2  ;;  %9418 = vmatmul.mubr.msk.f32.vlgmr.msra.gmra.mrb[58].mxu0 %vm992_vm6, %v11849_v2 }
0x1477   :  { %10446 = vtanh.f32 %v5539_v6  ;;  %10066 = vmatpush3.bf16.msra.mxu1 %v11498_v0  ;;  %10072 = vmatpush3.bf16.msra.mxu0 %v11500_v1  ;;  %v10445_v61 = vpop.eup %10444 }
0x1478   :  { %10067 = vmatprep.subr.bf16.mxu1 %v10895_v59  ;;  %10073 = vmatprep.subr.bf16.mxu0 %v10895_v59  ;;  %v5541_v26 = vsub.f32 1.0, %v10445_v61  ;;  %v5543_v20 = vmul.f32 %v10445_v61, %v11814_v14 }
0x1479   :  { %9428 = vmatprep.mubr.msk.f32.mxu1 %vm10894_vm2, %v10893_v3  ;;  %9439 = vmatprep.mubr.msk.f32.mxu0 %vm10894_vm2, %v10893_v3 }
0x147b   :  { %10069 = vmatpush3.bf16.msra.mxu1 %v11510_v12  ;;  %10075 = vmatpush3.bf16.msra.mxu0 %v11512_v13 }
0x147c   :  { %10076 = vmatprep.subr.bf16.mxu0 %v10895_v59  ;;  %10082 = vmatprep.subr.bf16.mxu1 %v10895_v59 }
0x147e   :  { %9429 = vmatmul.mubr.msk.f32.vlgmr.msra.gmra.mrb[58].mxu1 %vm992_vm6, %v11849_v2  ;;  %9440 = vmatmul.mubr.msk.f32.vlgmr.msra.gmra.mrb[60].mxu0 %vm992_vm6, %v11849_v2 }
0x147f   :  { %10078 = vmatpush3.bf16.msra.mxu0 %v11522_v45  ;;  %10084 = vmatpush3.bf16.msra.mxu1 %v11524_v28 }
0x1480   :  { %10079 = vmatprep.subr.bf16.mxu0 %v10895_v59  ;;  %10085 = vmatprep.subr.bf16.mxu1 %v10895_v59 }
0x1481   :  { %v10447_v54 = vpop.eup %10446  ;;  %9450 = vmatprep.mubr.msk.f32.mxu0 %vm10894_vm2, %v10893_v3  ;;  %9461 = vmatprep.mubr.msk.f32.mxu1 %vm10894_vm2, %v10893_v3 }
0x1482   :  { %v5542_v19 = vmul.f32 %v10447_v54, %v5541_v26 }
0x1483   :  { %10081 = vmatpush3.bf16.msra.mxu0 %v11534_v30  ;;  %10087 = vmatpush3.bf16.msra.mxu1 %v11536_v10 }
0x1484   :  { %v11900_v62 = vadd.f32 %v5543_v20, %v5542_v19  ;;  %10088 = vmatprep.subr.bf16.mxu1 %v10895_v59  ;;  %10094 = vmatprep.subr.bf16.mxu0 %v10895_v59 }
0x1486   :  { %9451 = vmatmul.mubr.msk.f32.vlgmr.msra.gmra.mrb[58].mxu0 %vm992_vm6, %v11900_v62  ;;  %9462 = vmatmul.mubr.msk.f32.vlgmr.msra.gmra.mrb[58].mxu1 %vm992_vm6, %v11900_v62 }
0x1487   :  { %10090 = vmatpush3.bf16.msra.mxu1 %v11546_v43  ;;  %9472 = vmatprep.mubr.msk.f32.mxu1 %vm10894_vm2, %v10893_v3 }
0x1488   :  { %10091 = vmatprep.subr.bf16.mxu1 %v10895_v59  ;;  %10096 = vmatpush3.bf16.msra.mxu0 %v11313_v18 }
0x1489   :  { %10097 = vmatprep.subr.bf16.mxu0 %v10895_v59  ;;  %9483 = vmatprep.mubr.msk.f32.mxu0 %vm10894_vm2, %v10893_v3 }
0x148b   :  { %10093 = vmatpush3.bf16.msra.mxu1 %v11553_v50 }
0x148c   :  { %10100 = vmatprep.subr.bf16.mxu1 %v10895_v59  ;;  %10099 = vmatpush3.bf16.msra.mxu0 %v11320_v25 }
0x148d   :  { %10106 = vmatprep.subr.bf16.mxu0 %v10895_v59 }
0x148e   :  { %9473 = vmatmul.mubr.msk.f32.vlgmr.msra.gmra.mrb[60].mxu1 %vm992_vm6, %v11900_v62 }
0x148f   :  { %10102 = vmatpush3.bf16.msra.mxu1 %v11327_v29  ;;  %9494 = vmatprep.mubr.msk.f32.mxu1 %vm10894_vm2, %v10893_v3 }
0x1490   :  { %10103 = vmatprep.subr.bf16.mxu1 %v10895_v59 }
0x1493   :  { %10105 = vmatpush3.bf16.msra.mxu1 %v11336_v34 }
0x1494   :  { %10112 = vmatprep.subr.bf16.mxu1 %v10895_v59 }
0x1541   :  { %v5614_v14 = vpop.f32.mrb[54].mxu1  ;;  %v5684_v15 = vpop.f32.mrb[56].mxu0 }
0x1542   :  { %v5758_v32 = vadd.f32 %v5614_v14, %v11427_v37  ;;  %v5765_v41 = vadd.f32 %v5684_v15, %v11444_v24  ;;  %v9386_v8 = vpop.f32.mrb[55].mxu1  ;;  %v9397_v11 = vpop.f32.mrb[57].mxu0 }
0x1544   :  { %v8297_v57 = vmul.f32 -1.442695, %v5758_v32  ;;  %v8298_v9 = vmul.f32 -1.442695, %v5765_v41 }
0x1546   :  { %10448 = vpow2.f32 %v8297_v57 }
0x1547   :  { %10450 = vpow2.f32 %v8298_v9 }
0x1549   :  { %v5754_v58 = vpop.f32.mrb[56].mxu1 }
0x154a   :  { %v9408_v48 = vpop.f32.mrb[57].mxu1  ;;  %v5755_v39 = vadd.f32 %v11932_v16, %v5754_v58 }
0x1550   :  { %v10449_v51 = vpop.eup %10448 }
0x1551   :  { %v5762_v52 = vadd.f32 1.0, %v10449_v51  ;;  %v5985_v55 = vpop.f32.mrb[60].mxu0  ;;  %v10451_v40 = vpop.eup %10450 }
0x1552   :  { %v9441_v27 = vpop.f32.mrb[61].mxu0  ;;  %v5769_v47 = vadd.f32 1.0, %v10451_v40  ;;  %v5986_v58 = vadd.f32 %v11599_v49, %v5985_v55 }
0x1553   :  { %10452 = vrcp.f32 %v5762_v52 }
0x1554   :  { %10454 = vrcp.f32 %v5769_v47 }
0x1559   :  { %v6058_v56 = vpop.f32.mrb[58].mxu0  ;;  %v6128_v37 = vpop.f32.mrb[58].mxu1 }
0x155a   :  { %v10252_v24 = vadd.f32 %v11576_v17, %v6058_v56  ;;  %v9452_v60 = vpop.f32.mrb[59].mxu0  ;;  %v9463_v46 = vpop.f32.mrb[59].mxu1  ;;  %v10253_v6 = vadd.f32 %v11580_v36, %v6128_v37 }
0x155c   :  { %v8305_v7 = vmul.f32 -1.442695, %v10252_v24  ;;  %v8306_v54 = vmul.f32 -1.442695, %v10253_v6 }
0x155d   :  { %v10453_v42 = vpop.eup %10452 }
0x155e   :  { %v5772_v61 = vmul.f32 %v10453_v42, %v5755_v39  ;;  %10456 = vpow2.f32 %v8305_v7  ;;  %v10455_v17 = vpop.eup %10454 }
0x155f   :  { %v5775_v32 = vsub.f32 1.0, %v10455_v17  ;;  %v5777_v8 = vmul.f32 %v10455_v17, %v11849_v2 }
0x1560   :  { %v5773_v26 = vadd.f32 %v5772_v61, %v11450_v63 }
0x1561   :  { %v6198_v19 = vpop.f32.mrb[60].mxu1 }
0x1562   :  { %10458 = vtanh.f32 %v5773_v26  ;;  %v9474_v20 = vpop.f32.mrb[61].mxu1  ;;  %v6199_v2 = vadd.f32 %v11589_v38, %v6198_v19 }
0x1563   :  { %10460 = vpow2.f32 %v8306_v54 }
0x1568   :  { %v10457_v14 = vpop.eup %10456 }
0x1569   :  { %v6206_v15 = vadd.f32 1.0, %v10457_v14 }
0x156b   :  { %10462 = vrcp.f32 %v6206_v15 }
0x156c   :  { %v10459_v41 = vpop.eup %10458 }
0x156d   :  { %v5776_v11 = vmul.f32 %v10459_v41, %v5775_v32  ;;  %v10461_v57 = vpop.eup %10460  ;;  %v12025_v32 = vld [vmem:[%s12206_s18 + $0x1] ss:$0 sm:$0xff] }
0x156e   :  { %v6213_v63 = vadd.f32 1.0, %v10461_v57 }
0x156f   :  { %v11938_v36 = vadd.f32 %v5777_v8, %v5776_v11 }
0x1570   :  { %10464 = vrcp.f32 %v6213_v63 }
0x1571   :  { %9484 = vmatmul.mubr.msk.f32.vlgmr.msra.gmra.mrb[62].mxu0 %vm992_vm6, %v11938_v36  ;;  %9495 = vmatmul.mubr.msk.f32.vlgmr.msra.gmra.mrb[62].mxu1 %vm992_vm6, %v11938_v36 }
0x1572   :  { %10108 = vmatpush3.bf16.msra.mxu0 %v11331_v31  ;;  %10114 = vmatpush3.bf16.msra.mxu1 %v11478_v23 }
0x1573   :  { %10109 = vmatprep.subr.bf16.mxu0 %v10895_v59  ;;  %10115 = vmatprep.subr.bf16.mxu1 %v10895_v59 }
0x1574   :  { %9505 = vmatprep.mubr.msk.f32.mxu0 %vm10894_vm2, %v10893_v3  ;;  %9516 = vmatprep.mubr.msk.f32.mxu1 %vm10894_vm2, %v10893_v3 }
0x1575   :  { %v10463_v9 = vpop.eup %10462 }
0x1576   :  { %v6216_v48 = vmul.f32 %v10463_v9, %v6199_v2  ;;  %10111 = vmatpush3.bf16.msra.mxu0 %v11342_v35  ;;  %10117 = vmatpush3.bf16.msra.mxu1 %v11488_v33 }
0x1577   :  { %10118 = vmatprep.subr.bf16.mxu0 %v10895_v59  ;;  %10124 = vmatprep.subr.bf16.mxu1 %v10895_v59 }
0x1578   :  { %v6217_v38 = vadd.f32 %v6216_v48, %v5986_v58 }
0x1579   :  { %9506 = vmatmul.mubr.msk.f32.vlgmr.msra.gmra.mrb[64].mxu0 %vm992_vm6, %v11938_v36  ;;  %9517 = vmatmul.mubr.msk.f32.vlgmr.msra.gmra.mrb[64].mxu1 %vm992_vm6, %v11938_v36 }
0x157a   :  { %10466 = vtanh.f32 %v6217_v38  ;;  %10120 = vmatpush3.bf16.msra.mxu0 %v11498_v0  ;;  %10126 = vmatpush3.bf16.msra.mxu1 %v11500_v1  ;;  %v10465_v49 = vpop.eup %10464 }
0x157b   :  { %10121 = vmatprep.subr.bf16.mxu0 %v10895_v59  ;;  %10127 = vmatprep.subr.bf16.mxu1 %v10895_v59  ;;  %v6219_v51 = vsub.f32 1.0, %v10465_v49  ;;  %v6221_v27 = vmul.f32 %v10465_v49, %v11900_v62 }
0x157c   :  { %9527 = vmatprep.mubr.msk.f32.mxu0 %vm10894_vm2, %v10893_v3  ;;  %9538 = vmatprep.mubr.msk.f32.mxu1 %vm10894_vm2, %v10893_v3 }
0x157e   :  { %10123 = vmatpush3.bf16.msra.mxu0 %v11510_v12  ;;  %10129 = vmatpush3.bf16.msra.mxu1 %v11512_v13 }
0x157f   :  { %10130 = vmatprep.subr.bf16.mxu1 %v10895_v59  ;;  %10136 = vmatprep.subr.bf16.mxu0 %v10895_v59 }
0x1581   :  { %9528 = vmatmul.mubr.msk.f32.vlgmr.msra.gmra.mrb[66].mxu0 %vm992_vm6, %v11938_v36  ;;  %9539 = vmatmul.mubr.msk.f32.vlgmr.msra.gmra.mrb[66].mxu1 %vm992_vm6, %v11938_v36 }
0x1582   :  { %10132 = vmatpush3.bf16.msra.mxu1 %v11522_v45  ;;  %10138 = vmatpush3.bf16.msra.mxu0 %v11524_v28 }
0x1583   :  { %10133 = vmatprep.subr.bf16.mxu1 %v10895_v59  ;;  %10139 = vmatprep.subr.bf16.mxu0 %v10895_v59 }
0x1584   :  { %v10467_v52 = vpop.eup %10466  ;;  %9549 = vmatprep.mubr.msk.f32.mxu1 %vm10894_vm2, %v10893_v3  ;;  %9560 = vmatprep.mubr.msk.f32.mxu0 %vm10894_vm2, %v10893_v3 }
0x1585   :  { %v6220_v55 = vmul.f32 %v10467_v52, %v6219_v51 }
0x1586   :  { %10135 = vmatpush3.bf16.msra.mxu1 %v11534_v30  ;;  %10141 = vmatpush3.bf16.msra.mxu0 %v11536_v10 }
0x1587   :  { %v11989_v40 = vadd.f32 %v6221_v27, %v6220_v55  ;;  %10142 = vmatprep.subr.bf16.mxu0 %v10895_v59  ;;  %10148 = vmatprep.subr.bf16.mxu1 %v10895_v59 }
0x1589   :  { %9550 = vmatmul.mubr.msk.f32.vlgmr.msra.gmra.mrb[64].mxu1 %vm992_vm6, %v11989_v40  ;;  %9561 = vmatmul.mubr.msk.f32.vlgmr.msra.gmra.mrb[66].mxu0 %vm992_vm6, %v11989_v40 }
0x158a   :  { %10144 = vmatpush3.bf16.msra.mxu0 %v11546_v43  ;;  %9571 = vmatprep.mubr.msk.f32.mxu0 %vm10894_vm2, %v10893_v3 }
0x158b   :  { %10145 = vmatprep.subr.bf16.mxu0 %v10895_v59  ;;  %10150 = vmatpush3.bf16.msra.mxu1 %v11313_v18 }
0x158c   :  { %10151 = vmatprep.subr.bf16.mxu1 %v10895_v59  ;;  %9582 = vmatprep.mubr.msk.f32.mxu1 %vm10894_vm2, %v10893_v3 }
0x158e   :  { %10147 = vmatpush3.bf16.msra.mxu0 %v11553_v50 }
0x158f   :  { %10154 = vmatprep.subr.bf16.mxu0 %v10895_v59  ;;  %10153 = vmatpush3.bf16.msra.mxu1 %v11320_v25 }
0x1590   :  { %10160 = vmatprep.subr.bf16.mxu1 %v10895_v59 }
0x1591   :  { %9572 = vmatmul.mubr.msk.f32.vlgmr.msra.gmra.mrb[68].mxu0 %vm992_vm6, %v11989_v40 }
0x1592   :  { %10156 = vmatpush3.bf16.msra.mxu0 %v11327_v29  ;;  %9593 = vmatprep.mubr.msk.f32.mxu0 %vm10894_vm2, %v10893_v3 }
0x1593   :  { %10157 = vmatprep.subr.bf16.mxu0 %v10895_v59 }
0x1596   :  { %10159 = vmatpush3.bf16.msra.mxu0 %v11336_v34 }
0x1597   :  { %10166 = vmatprep.subr.bf16.mxu0 %v10895_v59 }
0x1644   :  { %v6292_v18 = vpop.f32.mrb[62].mxu0  ;;  %v6362_v62 = vpop.f32.mrb[62].mxu1 }
0x1645   :  { %v6436_v25 = vadd.f32 %v6292_v18, %v11453_v4  ;;  %v6443_v47 = vadd.f32 %v6362_v62, %v11456_v5  ;;  %v9485_v56 = vpop.f32.mrb[63].mxu0  ;;  %v9496_v37 = vpop.f32.mrb[63].mxu1  ;;  %v12020_v5 = vld [vmem:[%s12205_s0 + $0x1] ss:$0 sm:$0xff] }
0x1647   :  { %v8310_v24 = vmul.f32 -1.442695, %v6436_v25  ;;  %v8311_v29 = vmul.f32 -1.442695, %v6443_v47  ;;  %v12049_v25 = vld [vmem:[%s12207_s17 + $0x1] ss:$0 sm:$0xff] }
0x1649   :  { %10468 = vpow2.f32 %v8310_v24 }
0x164a   :  { %10470 = vpow2.f32 %v8311_v29 }
0x164c   :  { %v6432_v60 = vpop.f32.mrb[64].mxu0 }
0x164d   :  { %v9507_v46 = vpop.f32.mrb[65].mxu0  ;;  %v6433_v17 = vadd.f32 %v11932_v16, %v6432_v60 }
0x1653   :  { %v10469_v39 = vpop.eup %10468 }
0x1654   :  { %v6440_v7 = vadd.f32 1.0, %v10469_v39  ;;  %v6663_v34 = vpop.f32.mrb[66].mxu1  ;;  %v10471_v6 = vpop.eup %10470 }
0x1655   :  { %v9540_v42 = vpop.f32.mrb[67].mxu1  ;;  %v6447_v61 = vadd.f32 1.0, %v10471_v6 }
0x1656   :  { %10472 = vrcp.f32 %v6440_v7 }
0x1657   :  { %10474 = vrcp.f32 %v6447_v61 }
0x165c   :  { %v6736_v4 = vpop.f32.mrb[64].mxu1  ;;  %v6806_v26 = vpop.f32.mrb[66].mxu0 }
0x165d   :  { %v10254_v54 = vadd.f32 %v12020_v5, %v6736_v4  ;;  %v9551_v19 = vpop.f32.mrb[65].mxu1  ;;  %v9562_v20 = vpop.f32.mrb[67].mxu0  ;;  %v10255_v41 = vadd.f32 %v12025_v32, %v6806_v26 }
0x165f   :  { %v8318_v14 = vmul.f32 -1.442695, %v10254_v54  ;;  %v8319_v57 = vmul.f32 -1.442695, %v10255_v41 }
0x1660   :  { %v10473_v15 = vpop.eup %10472 }
0x1661   :  { %v6450_v8 = vmul.f32 %v10473_v15, %v6433_v17  ;;  %10476 = vpow2.f32 %v8318_v14  ;;  %v10475_v9 = vpop.eup %10474 }
0x1662   :  { %v6453_v38 = vsub.f32 1.0, %v10475_v9  ;;  %v6455_v51 = vmul.f32 %v10475_v9, %v11938_v36  ;;  %v12041_v36 = vld [vmem:[%s11035_s3 + $0x1] ss:$0 sm:$0xff]  ;;  %s10896_s3 = smov [#allocation23]  }
0x1663   :  { %v6451_v11 = vadd.f32 %v6450_v8, %v11460_v53 }
0x1664   :  { %v6876_v63 = vpop.f32.mrb[68].mxu0 }
0x1665   :  { %10478 = vtanh.f32 %v6451_v11  ;;  %v9573_v2 = vpop.f32.mrb[69].mxu0  ;;  %v6877_v18 = vadd.f32 %v12041_v36, %v6876_v63 }
0x1666   :  { %10480 = vpow2.f32 %v8319_v57 }
0x166b   :  { %v10477_v58 = vpop.eup %10476 }
0x166c   :  { %v6884_v48 = vadd.f32 1.0, %v10477_v58 }
0x166e   :  { %10482 = vrcp.f32 %v6884_v48 }
0x166f   :  { %v10479_v49 = vpop.eup %10478 }
0x1670   :  { %v6454_v52 = vmul.f32 %v10479_v49, %v6453_v38  ;;  %v10481_v55 = vpop.eup %10480 }
0x1671   :  { %v6891_v53 = vadd.f32 1.0, %v10481_v55 }
0x1672   :  { %v12030_v27 = vadd.f32 %v6455_v51, %v6454_v52 }
0x1673   :  { %10484 = vrcp.f32 %v6891_v53 }
0x1674   :  { %9583 = vmatmul.mubr.msk.f32.vlgmr.msra.gmra.mrb[68].mxu1 %vm992_vm6, %v12030_v27  ;;  %9594 = vmatmul.mubr.msk.f32.vlgmr.msra.gmra.mrb[70].mxu0 %vm992_vm6, %v12030_v27 }
0x1675   :  { %10162 = vmatpush3.bf16.msra.mxu1 %v11331_v31  ;;  %10168 = vmatpush3.bf16.msra.mxu0 %v11478_v23  ;;  %v6664_v31 = vadd.f32 %v12049_v25, %v6663_v34 }
0x1676   :  { %10163 = vmatprep.subr.bf16.mxu1 %v10895_v59  ;;  %10169 = vmatprep.subr.bf16.mxu0 %v10895_v59 }
0x1677   :  { %9604 = vmatprep.mubr.msk.f32.mxu1 %vm10894_vm2, %v10893_v3  ;;  %9615 = vmatprep.mubr.msk.f32.mxu0 %vm10894_vm2, %v10893_v3 }
0x1678   :  { %v10483_v62 = vpop.eup %10482 }
0x1679   :  { %v6894_v47 = vmul.f32 %v10483_v62, %v6877_v18  ;;  %10165 = vmatpush3.bf16.msra.mxu1 %v11342_v35  ;;  %10171 = vmatpush3.bf16.msra.mxu0 %v11488_v33 }
0x167a   :  { %10172 = vmatprep.subr.bf16.mxu1 %v10895_v59  ;;  %10178 = vmatprep.subr.bf16.mxu0 %v10895_v59 }
0x167b   :  { %v6895_v56 = vadd.f32 %v6894_v47, %v6664_v31 }
0x167c   :  { %9605 = vmatmul.mubr.msk.f32.vlgmr.msra.gmra.mrb[70].mxu1 %vm992_vm6, %v12030_v27  ;;  %9616 = vmatmul.mubr.msk.f32.vlgmr.msra.gmra.mrb[72].mxu0 %vm992_vm6, %v12030_v27 }
0x167d   :  { %10486 = vtanh.f32 %v6895_v56  ;;  %10174 = vmatpush3.bf16.msra.mxu1 %v11498_v0  ;;  %10180 = vmatpush3.bf16.msra.mxu0 %v11500_v1  ;;  %v10485_v35 = vpop.eup %10484 }
0x167e   :  { %10175 = vmatprep.subr.bf16.mxu1 %v10895_v59  ;;  %10181 = vmatprep.subr.bf16.mxu0 %v10895_v59  ;;  %v6897_v37 = vsub.f32 1.0, %v10485_v35  ;;  %v6899_v60 = vmul.f32 %v10485_v35, %v11989_v40 }
0x167f   :  { %9626 = vmatprep.mubr.msk.f32.mxu1 %vm10894_vm2, %v10893_v3  ;;  %9637 = vmatprep.mubr.msk.f32.mxu0 %vm10894_vm2, %v10893_v3 }
0x1681   :  { %10177 = vmatpush3.bf16.msra.mxu1 %v11510_v12  ;;  %10183 = vmatpush3.bf16.msra.mxu0 %v11512_v13 }
0x1682   :  { %10184 = vmatprep.subr.bf16.mxu0 %v10895_v59  ;;  %10190 = vmatprep.subr.bf16.mxu1 %v10895_v59 }
0x1684   :  { %9627 = vmatmul.mubr.msk.f32.vlgmr.msra.gmra.mrb[72].mxu1 %vm992_vm6, %v12030_v27  ;;  %9638 = vmatmul.mubr.msk.f32.vlgmr.msra.gmra.mrb[74].mxu0 %vm992_vm6, %v12030_v27 }
0x1685   :  { %10186 = vmatpush3.bf16.msra.mxu0 %v11522_v45  ;;  %10192 = vmatpush3.bf16.msra.mxu1 %v11524_v28 }
0x1686   :  { %10187 = vmatprep.subr.bf16.mxu0 %v10895_v59  ;;  %10193 = vmatprep.subr.bf16.mxu1 %v10895_v59 }
0x1687   :  { %v10487_v24 = vpop.eup %10486  ;;  %9648 = vmatprep.mubr.msk.f32.mxu0 %vm10894_vm2, %v10893_v3  ;;  %9659 = vmatprep.mubr.msk.f32.mxu1 %vm10894_vm2, %v10893_v3 }
0x1688   :  { %v6898_v29 = vmul.f32 %v10487_v24, %v6897_v37  ;;  %v8027_v24 = vld [vmem:[%s11040_s24 + $0x8] sm:$0xff] }
0x1689   :  { %10189 = vmatpush3.bf16.msra.mxu0 %v11534_v30  ;;  %10195 = vmatpush3.bf16.msra.mxu1 %v11536_v10 }
0x168a   :  { %v12087_v46 = vadd.f32 %v6899_v60, %v6898_v29  ;;  %10196 = vmatprep.subr.bf16.mxu1 %v10895_v59  ;;  %10202 = vmatprep.subr.bf16.mxu0 %v10895_v59  ;;  %v8028_v29 = vld [vmem:[%s11040_s24 + $0x10] sm:$0xff] }
0x168c   :  { %9649 = vmatmul.mubr.msk.f32.vlgmr.msra.gmra.mrb[72].mxu0 %vm992_vm6, %v12087_v46  ;;  %9660 = vmatmul.mubr.msk.f32.vlgmr.msra.gmra.mrb[72].mxu1 %vm992_vm6, %v12087_v46 }
0x168d   :  { %10198 = vmatpush3.bf16.msra.mxu1 %v11546_v43  ;;  %9670 = vmatprep.mubr.msk.f32.mxu1 %vm10894_vm2, %v10893_v3 }
0x168e   :  { %10199 = vmatprep.subr.bf16.mxu1 %v10895_v59  ;;  %10204 = vmatpush3.bf16.msra.mxu0 %v11478_v23 }
0x168f   :  { %10205 = vmatprep.subr.bf16.mxu0 %v10895_v59  ;;  %9681 = vmatprep.mubr.msk.f32.mxu0 %vm10894_vm2, %v10893_v3 }
0x1691   :  { %10201 = vmatpush3.bf16.msra.mxu1 %v11553_v50 }
0x1692   :  { %10208 = vmatprep.subr.bf16.mxu1 %v10895_v59  ;;  %10207 = vmatpush3.bf16.msra.mxu0 %v11488_v33 }
0x1693   :  { %10214 = vmatprep.subr.bf16.mxu0 %v10895_v59 }
0x1694   :  { %9671 = vmatmul.mubr.msk.f32.vlgmr.msra.gmra.mrb[74].mxu1 %vm992_vm6, %v12087_v46 }
0x1695   :  { %10210 = vmatpush3.bf16.msra.mxu1 %v11498_v0  ;;  %9692 = vmatprep.mubr.msk.f32.mxu1 %vm10894_vm2, %v10893_v3 }
0x1696   :  { %10211 = vmatprep.subr.bf16.mxu1 %v10895_v59 }
0x1699   :  { %10213 = vmatpush3.bf16.msra.mxu1 %v11510_v12 }
0x169a   :  { %10226 = vmatprep.subr.bf16.mxu1 %v10895_v59 }
0x1747   :  { %v6970_v23 = vpop.f32.mrb[68].mxu1  ;;  %v7040_v40 = vpop.f32.mrb[70].mxu0 }
0x1748   :  { %v7114_v33 = vadd.f32 %v6970_v23, %v11466_v21  ;;  %v7121_v39 = vadd.f32 %v7040_v40, %v11469_v22  ;;  %v9584_v7 = vpop.f32.mrb[69].mxu1  ;;  %v9595_v34 = vpop.f32.mrb[71].mxu0 }
0x174a   :  { %v8323_v42 = vmul.f32 -1.442695, %v7114_v33  ;;  %v8324_v0 = vmul.f32 -1.442695, %v7121_v39 }
0x174c   :  { %10488 = vpow2.f32 %v8323_v42 }
0x174d   :  { %10490 = vpow2.f32 %v8324_v0 }
0x174f   :  { %v7110_v6 = vpop.f32.mrb[70].mxu1 }
0x1750   :  { %v9606_v61 = vpop.f32.mrb[71].mxu1  ;;  %v7111_v41 = vadd.f32 %v11932_v16, %v7110_v6 }
0x1756   :  { %v10489_v4 = vpop.eup %10488 }
0x1757   :  { %v7118_v26 = vadd.f32 1.0, %v10489_v4  ;;  %v7341_v54 = vpop.f32.mrb[74].mxu0  ;;  %v10491_v19 = vpop.eup %10490 }
0x1758   :  { %v9639_v12 = vpop.f32.mrb[75].mxu0  ;;  %v7125_v20 = vadd.f32 1.0, %v10491_v19  ;;  %v7342_v47 = vadd.f32 %v12049_v25, %v7341_v54 }
0x1759   :  { %10492 = vrcp.f32 %v7118_v26 }
0x175a   :  { %10494 = vrcp.f32 %v7125_v20 }
0x175f   :  { %v7414_v17 = vpop.f32.mrb[72].mxu0  ;;  %v7484_v14 = vpop.f32.mrb[72].mxu1 }
0x1760   :  { %v10256_v21 = vadd.f32 %v12020_v5, %v7414_v17  ;;  %v9650_v22 = vpop.f32.mrb[73].mxu0  ;;  %v9661_v15 = vpop.f32.mrb[73].mxu1  ;;  %v10257_v57 = vadd.f32 %v12025_v32, %v7484_v14 }
0x1762   :  { %v8331_v8 = vmul.f32 -1.442695, %v10256_v21  ;;  %v8332_v9 = vmul.f32 -1.442695, %v10257_v57 }
0x1763   :  { %v10493_v11 = vpop.eup %10492 }
0x1764   :  { %v7128_v63 = vmul.f32 %v10493_v11, %v7111_v41  ;;  %10496 = vpow2.f32 %v8331_v8  ;;  %v10495_v38 = vpop.eup %10494  ;;  %v8341_v8 = vld [vmem:[%s11045_s19] ss:$0 sm:$0xff] }
0x1765   :  { %v7131_v52 = vsub.f32 1.0, %v10495_v38  ;;  %v7133_v53 = vmul.f32 %v10495_v38, %v12030_v27 }
0x1766   :  { %v7129_v2 = vadd.f32 %v7128_v63, %v11472_v44 }
0x1767   :  { %v7554_v58 = vpop.f32.mrb[74].mxu1 }
0x1768   :  { %10498 = vtanh.f32 %v7129_v2  ;;  %v9672_v48 = vpop.f32.mrb[75].mxu1  ;;  %v7555_v31 = vadd.f32 %v12041_v36, %v7554_v58 }
0x1769   :  { %10500 = vpow2.f32 %v8332_v9 }
0x176e   :  { %v10497_v49 = vpop.eup %10496 }
0x176f   :  { %v7562_v51 = vadd.f32 1.0, %v10497_v49 }
0x1771   :  { %10502 = vrcp.f32 %v7562_v51 }
0x1772   :  { %v10499_v16 = vpop.eup %10498 }
0x1773   :  { %v7132_v55 = vmul.f32 %v10499_v16, %v7131_v52  ;;  %v10501_v18 = vpop.eup %10500 }
0x1774   :  { %v7569_v44 = vadd.f32 1.0, %v10501_v18 }
0x1775   :  { %v7134_v62 = vadd.f32 %v7133_v53, %v7132_v55 }
0x1776   :  { %10504 = vrcp.f32 %v7569_v44 }
0x1777   :  { %9682 = vmatmul.mubr.msk.f32.vlgmr.msra.gmra.mrb[76].mxu0 %vm992_vm6, %v7134_v62  ;;  %9693 = vmatmul.mubr.msk.f32.vlgmr.msra.gmra.mrb[76].mxu1 %vm992_vm6, %v7134_v62 }
0x1778   :  { %10216 = vmatpush3.bf16.msra.mxu0 %v11500_v1  ;;  %9703 = vmatprep.mubr.msk.f32.mxu0 %vm10894_vm2, %v10893_v3 }
0x1779   :  { %10217 = vmatprep.subr.bf16.mxu0 %v10895_v59  ;;  %10228 = vmatpush3.bf16.msra.mxu1 %v11524_v28 }
0x177a   :  { %10229 = vmatprep.subr.bf16.mxu1 %v10895_v59  ;;  %9725 = vmatprep.mubr.msk.f32.mxu1 %vm10894_vm2, %v10893_v3 }
0x177b   :  { %v10503_v27 = vpop.eup %10502 }
0x177c   :  { %v7572_v56 = vmul.f32 %v10503_v27, %v7555_v31  ;;  %10219 = vmatpush3.bf16.msra.mxu0 %v11512_v13 }
0x177d   :  { %10220 = vmatprep.subr.bf16.mxu0 %v10895_v59  ;;  %10231 = vmatpush3.bf16.msra.mxu1 %v11536_v10 }
0x177e   :  { %v7573_v1 = vadd.f32 %v7572_v56, %v7342_v47  ;;  %10232 = vmatprep.subr.bf16.mxu1 %v10895_v59 }
0x177f   :  { %9704 = vmatmul.mubr.msk.f32.vlgmr.msra.gmra.mrb[78].mxu0 %vm992_vm6, %v7134_v62 }
0x1780   :  { %10506 = vtanh.f32 %v7573_v1  ;;  %10222 = vmatpush3.bf16.msra.mxu0 %v11522_v45  ;;  %9714 = vmatprep.mubr.msk.f32.mxu0 %vm10894_vm2, %v10893_v3  ;;  %v10505_v13 = vpop.eup %10504 }
0x1781   :  { %10223 = vmatprep.subr.bf16.mxu0 %v10895_v59  ;;  %v7575_v28 = vsub.f32 1.0, %v10505_v13  ;;  %v7577_v37 = vmul.f32 %v10505_v13, %v12087_v46  ;;  %v8029_v46 = vld [vmem:[%s11040_s24 + $0x18] sm:$0xff] }
0x1782   :  { %v10242_v23 = vpack.c.bf16 %v8029_v46, %v8028_v29 }
0x1784   :  { %10225 = vmatpush3.bf16.msra.mxu0 %v11534_v30  ;;  %v8026_v30 = vld [vmem:[%s11040_s24] sm:$0xff]  ;;  %s8118_s24 = sshll.u32 %s10896_s3, 4  ;;  %s8119_s24 = int_to_ptr.vmem [resolvable:$true] %s8118_s24 }
0x1785   :  { %10238 = vmatprep.subr.bf16.mxu0 %v10895_v59  ;;  %v10239_v60 = vpack.c.bf16 %v8027_v24, %v8026_v30  ;;  %s10809_s22 = scalar_lea.vmem %s8119_s24, 32  ;;  %p10814_p7 = scmp.lt.s32.totalorder %s8119_s24, %s8119_s24 }
0x1786   :  { %p10810_p6 = scmp.ne.s32.totalorder %s8119_s24, %s10809_s22  ;;  %p10815_p8 = scmp.lt.s32.totalorder %s10809_s22, %s10809_s22 }
0x1788   :  { %p10816_p9 = por %p10815_p8, %p10814_p7 }
0x178a   :  { %v10507_v10 = vpop.eup %10506  ;;  %p10817_p10 = pnand %p10816_p9, %p10810_p6 }
0x178b   :  { %v7576_v35 = vmul.f32 %v10507_v10, %v7575_v28 }
0x178d   :  { %v7578_v45 = vadd.f32 %v7577_v37, %v7576_v35 }
0x178f   :  { %9715 = vmatmul.mubr.msk.f32.vlgmr.msra.gmra.mrb[76].mxu0 %vm992_vm6, %v7578_v45  ;;  %9726 = vmatmul.mubr.msk.f32.vlgmr.msra.gmra.mrb[76].mxu1 %vm992_vm6, %v7578_v45 }
0x1790   :  { %10234 = vmatpush3.bf16.msra.mxu1 %v11546_v43  ;;  %9736 = vmatprep.mubr.msk.f32.mxu1 %vm10894_vm2, %v10893_v3 }
0x1791   :  { %10235 = vmatprep.subr.bf16.mxu1 %v10895_v59  ;;  %9747 = vmatprep.mubr.msk.f32.mxu0 %vm10894_vm2, %v10893_v3 }
0x1792   :  { %10240 = vmatpush3.bf16.msra.mxu0 %v10239_v60 }
0x1793   :  { %10241 = vmatprep.subr.bf16.mxu0 %v10895_v59 }
0x1794   :  { %10237 = vmatpush3.bf16.msra.mxu1 %v11553_v50 }
0x1796   :  { %10243 = vmatpush3.bf16.msra.mxu0 %v10242_v23 }
0x1797   :  { %9737 = vmatmul.mubr.msk.f32.vlgmr.msra.gmra.mrb[78].mxu1 %vm992_vm6, %v7578_v45 }
0x1852   :  { %v7788_v43 = vpop.f32.mrb[78].mxu0 }
0x1853   :  { %v9705_v40 = vpop.f32.mrb[79].mxu0 }
0x1862   :  { %v7861_v33 = vpop.f32.mrb[76].mxu0  ;;  %v7931_v39 = vpop.f32.mrb[76].mxu1 }
0x1863   :  { %v10258_v3 = vadd.f32 %v12020_v5, %v7861_v33  ;;  %v9716_v7 = vpop.f32.mrb[77].mxu0  ;;  %v9727_v50 = vpop.f32.mrb[77].mxu1  ;;  %v10259_v42 = vadd.f32 %v12025_v32, %v7931_v39  ;;  %v7789_v5 = vadd.f32 %v12049_v25, %v7788_v43 }
0x1865   :  { %v8339_v34 = vmul.f32 -1.442695, %v10258_v3  ;;  %v8340_v0 = vmul.f32 -1.442695, %v10259_v42 }
0x1867   :  { %10508 = vpow2.f32 %v8339_v34 }
0x1868   :  { %10510 = vpow2.f32 %v8340_v0 }
0x186a   :  { %v8001_v6 = vpop.f32.mrb[78].mxu1 }
0x186b   :  { %v9738_v61 = vpop.f32.mrb[79].mxu1  ;;  %v8002_v12 = vadd.f32 %v12041_v36, %v8001_v6 }
0x1871   :  { %v10509_v4 = vpop.eup %10508 }
0x1872   :  { %v8009_v26 = vadd.f32 1.0, %v10509_v4  ;;  %v10511_v59 = vpop.eup %10510 }
0x1873   :  { %v8016_v54 = vadd.f32 1.0, %v10511_v59 }
0x1874   :  { %10512 = vrcp.f32 %v8009_v26 }
0x1875   :  { %10514 = vrcp.f32 %v8016_v54 }
0x187e   :  { %v10513_v19 = vpop.eup %10512 }
0x187f   :  { %v8019_v20 = vmul.f32 %v10513_v19, %v8002_v12  ;;  %v10515_v32 = vpop.eup %10514 }
0x1880   :  { %v8022_v14 = vsub.f32 1.0, %v10515_v32  ;;  %v8024_v15 = vmul.f32 %v10515_v32, %v7578_v45 }
0x1881   :  { %v8020_v17 = vadd.f32 %v8019_v20, %v7789_v5 }
0x1883   :  { %10516 = vtanh.f32 %v8020_v17 }
0x188d   :  { %v10517_v21 = vpop.eup %10516 }
0x188e   :  { %v8023_v22 = vmul.f32 %v10517_v21, %v8022_v14 }
0x1890   :  { %v8025_v41 = vadd.f32 %v8024_v15, %v8023_v22 }
0x1892   :  { %9748 = vmatmul.mubr.msk.f32.vlgmr.msra.gmra.mrb[80].mxu0 %vm992_vm6, %v8025_v41 }
0x1965   :  { %v8106_v11 = vpop.f32.mrb[80].mxu0 }
0x1966   :  { %v8107_v36 = vadd.f32 %v8341_v8, %v8106_v11  ;;  %v9749_v57 = vpop.f32.mrb[81].mxu0 }
0x1968   :  { %8111 = vst.msk [vmem:[#allocation23] sm:$0x3] %vm8110_vm8, %v8107_v36 }
0x1969   :  { %10820 = shalt.err (!%p10817_p10)
}
0x196a   :  { %s10821_s23 = scalar_lea.hbm %s11050_s8, 32 }
0x196b   :  { %p10822_p11 = scmp.ne.s32.totalorder %s11050_s8, %s10821_s23  ;;  %p10825_p12 = scmp.lt.u32.totalorder %s10821_s23, %s11050_s8 }
0x196d   :  { %p10827_p13 = pnand %p10825_p12, %p10822_p11 }
0x196f   :  { %10830 = shalt.err (!%p10827_p13)
}
0x1970   :  { %8121 = dma.vmem_to_hbm [thread:$0]  %s8119_s24, 32, %s11050_s8, [#allocation4]  }
0x1971   :  { %10845 = dma.done.wait [#allocation4], 32  }
0x1972   :  { %10846 = vsyncadd [#allocation4], 4294967264 }
0x1973   :  { %8125 = vsyncpa [#allocation3], 1 }
0x1974   :  { %8126 = vsyncpa [#allocation6], 1 }
0x1975   :  { %8127 = vsyncpa [#allocation9], 1 }
0x1976   :  { %8128 = vsyncpa [#allocation12], 1 }
0x1977   :  { %8129 = vsyncpa [#allocation15], 1 }
0x1978   :  { %8130 = vsyncpa [#allocation18], 1 }
0x1979   :  { %8131 = vsyncpa [#allocation21], 1 }
0x197a   :  { %8132 = vsyncpa [#allocation4], 1 }

</bundles_post_ra>
